<compile_context>
chip_gen: v7x
topology: tpu7x:2x2x1
jax: 0.10.0
libtpu: 0.0.40
codegen_flags: <defaults>
</compile_context>

<pallas_src>
import jax
import jax.numpy as jnp
from jax.experimental import pallas as pl
from jax.experimental.pallas import tpu as pltpu


# ----------------------------------------------------------------------------
# Kernel: Bb packed images per grid step, everything lane-dense.
# ----------------------------------------------------------------------------
def residual_kernel(x_ref, rhs1_ref, rhs2_ref, c1_ref, c2_ref,
                    wse1_ref, wse2_ref, out_ref):
    f32 = jnp.float32
    Bb, H, WCo = x_ref.shape
    WCm = rhs2_ref.shape[0]          # W * inner_channels
    M = Bb * H                       # packed matmul rows

    x = x_ref[...].reshape(M, WCo)   # bf16, lane-dense rows (leading-dim collapse)

    # Row-position masks: vertical taps must not bleed across packed images.
    row = jax.lax.broadcasted_iota(jnp.int32, (M, 1), 0)
    rmod = row % H
    up_ok = rmod != 0                # row has a valid row above (same image)
    dn_ok = rmod != (H - 1)          # row has a valid row below (same image)

    def tap_sum(up, mid, dn):
        # out[i] = mid[i] + up[i-1] + dn[i+1], masked at image boundaries.
        up_s = jnp.where(up_ok, pltpu.roll(up, shift=1, axis=0), 0.0)
        dn_s = jnp.where(dn_ok, pltpu.roll(dn, shift=M - 1, axis=0), 0.0)
        return mid + up_s + dn_s

    # ---- fused MXU call #1: conv1's 3 vertical taps + residual 1x1 conv ----
    r1 = jnp.dot(x, rhs1_ref[...], preferred_element_type=f32)   # (M, 3*WCm+WCo)
    y1 = tap_sum(r1[:, :WCm], r1[:, WCm:2 * WCm], r1[:, 2 * WCm:3 * WCm])
    x3 = r1[:, 3 * WCm:3 * WCm + WCo]                            # residual path

    # BN1 (eval, folded with conv1 bias) + ReLU
    c1 = c1_ref[...]                                             # (2, WCm): scale, shift
    y1 = jnp.maximum(y1 * c1[0:1, :] + c1[1:2, :], 0.0)

    # ---- fused MXU call #2: conv2's 3 vertical taps ----
    r2 = jnp.dot(y1.astype(jnp.bfloat16), rhs2_ref[...],
                 preferred_element_type=f32)                     # (M, 3*WCo)
    y2 = tap_sum(r2[:, :WCo], r2[:, WCo:2 * WCo], r2[:, 2 * WCo:3 * WCo])

    # BN2 (eval, folded with conv2 bias); dropout is identity in eval mode
    c2 = c2_ref[...]                                             # (3, WCo): scale, shift, b3
    y2 = y2 * c2[0:1, :] + c2[1:2, :]

    # ---- SE (per packed image, on the VPU; weights pre-tiled lane-dense) ----
    y2i = y2.reshape(Bb, H, WCo)                                 # leading-dim split
    colsum = jnp.sum(y2i, axis=1)                                # (Bb, WCo)
    wse1 = wse1_ref[...]                                         # (cr, WCo), 1/(H*W) folded in
    wse2 = wse2_ref[...]                                         # (cr, WCo)
    gate_pre = None
    for r in range(wse1.shape[0]):                               # cr is tiny; unrolled at trace
        h_r = jnp.maximum(
            jnp.sum(colsum * wse1[r:r + 1, :], axis=1, keepdims=True), 0.0)   # (Bb, 1)
        term = h_r * wse2[r:r + 1, :]                            # (Bb, WCo)
        gate_pre = term if gate_pre is None else gate_pre + term
    gate = jax.nn.sigmoid(gate_pre)                              # (Bb, WCo)

    # ---- residual add (1x1-conv path + bias) + final ReLU ----
    x3i = (x3 + c2[2:3, :]).reshape(Bb, H, WCo)
    out_ref[...] = jnp.maximum(y2i * gate[:, None, :] + x3i, 0.0)


# ----------------------------------------------------------------------------
# Parameter generation (torch-equivalent shapes) and kernel-side preprocessing.
# ----------------------------------------------------------------------------
def make_params(key, outer_channels, inner_channels, reduction=16):
    co, cm = outer_channels, inner_channels
    cr = max(co // reduction, 1)
    ks = jax.random.split(key, 16)
    p = {}
    p["w1"] = 0.1 * jax.random.normal(ks[0], (3, 3, co, cm), jnp.float32)   # (ky,kx,cin,cout)
    p["b1"] = 0.1 * jax.random.normal(ks[1], (cm,), jnp.float32)
    p["w2"] = 0.1 * jax.random.normal(ks[2], (3, 3, cm, co), jnp.float32)
    p["b2"] = 0.1 * jax.random.normal(ks[3], (co,), jnp.float32)
    p["w3"] = 0.1 * jax.random.normal(ks[4], (co, co), jnp.float32)         # 1x1 conv (cin,cout)
    p["b3"] = 0.1 * jax.random.normal(ks[5], (co,), jnp.float32)
    # BatchNorm params / running stats (eval mode)
    p["g1"] = 1.0 + 0.1 * jax.random.normal(ks[6], (cm,), jnp.float32)
    p["be1"] = 0.1 * jax.random.normal(ks[7], (cm,), jnp.float32)
    p["rm1"] = 0.1 * jax.random.normal(ks[8], (cm,), jnp.float32)
    p["rv1"] = jnp.abs(1.0 + 0.1 * jax.random.normal(ks[9], (cm,), jnp.float32))
    p["g2"] = 1.0 + 0.1 * jax.random.normal(ks[10], (co,), jnp.float32)
    p["be2"] = 0.1 * jax.random.normal(ks[11], (co,), jnp.float32)
    p["rm2"] = 0.1 * jax.random.normal(ks[12], (co,), jnp.float32)
    p["rv2"] = jnp.abs(1.0 + 0.1 * jax.random.normal(ks[13], (co,), jnp.float32))
    # SE (bias-free): fc1 in torch (out,in)=(cr,co) layout, fc2 in (in,out)=(cr,co) layout
    p["wse1"] = 0.2 * jax.random.normal(ks[14], (cr, co), jnp.float32)
    p["wse2"] = 0.2 * jax.random.normal(ks[15], (cr, co), jnp.float32)
    return p


def _banded_conv_matrices(w, W):
    """w: (3,3,Cin,Cout) -> (3, W*Cin, W*Cout); one banded matrix per vertical tap."""
    _, _, cin, cout = w.shape
    mats = []
    for ky in range(3):
        acc = jnp.zeros((W, cin, W, cout), jnp.float32)
        for kx in range(3):
            # E[p_in, p_out] = 1 iff p_in = p_out + kx - 1 ('same' padding handled by zeros)
            E = jnp.eye(W, W, k=-(kx - 1), dtype=jnp.float32)
            acc = acc + jnp.einsum("pj,cm->pcjm", E, w[ky, kx])
        mats.append(acc.reshape(W * cin, W * cout))
    return jnp.stack(mats, axis=0)


def prepare_params(params, H, W):
    """Fold BN (eval) + conv biases, build fused banded/block-diag matmul weights,
    pack per-lane constants, pre-tile SE weights (1/(H*W) folded into wse1)."""
    eps = 1e-5
    co = params["w2"].shape[-1]

    s1 = params["g1"] / jnp.sqrt(params["rv1"] + eps)
    t1 = params["be1"] - params["rm1"] * s1 + params["b1"] * s1
    s2 = params["g2"] / jnp.sqrt(params["rv2"] + eps)
    t2 = params["be2"] - params["rm2"] * s2 + params["b2"] * s2

    a1 = _banded_conv_matrices(params["w1"], W)          # (3, W*Co, W*Cm)
    a2 = _banded_conv_matrices(params["w2"], W)          # (3, W*Cm, W*Co)
    eye = jnp.eye(W, dtype=jnp.float32)
    a3 = jnp.einsum("pj,co->pcjo", eye, params["w3"]).reshape(W * co, W * co)

    # Fused wide RHS matrices: shared-LHS matmuls collapse into one MXU call each.
    rhs1 = jnp.concatenate([a1[0], a1[1], a1[2], a3], axis=1).astype(jnp.bfloat16)
    rhs2 = jnp.concatenate([a2[0], a2[1], a2[2]], axis=1).astype(jnp.bfloat16)

    # Packed per-lane constants (lane layout n = w*C + c  =>  tile channel vectors W times).
    c1 = jnp.stack([jnp.tile(s1, W), jnp.tile(t1, W)], axis=0)                       # (2, W*Cm)
    c2 = jnp.stack([jnp.tile(s2, W), jnp.tile(t2, W), jnp.tile(params["b3"], W)], 0)  # (3, W*Co)

    # SE weights pre-tiled to lane-dense rows; global-avg-pool 1/(H*W) folded into wse1.
    wse1_t = jnp.tile(params["wse1"], (1, W)) * (1.0 / float(H * W))                 # (cr, W*Co)
    wse2_t = jnp.tile(params["wse2"], (1, W))                                        # (cr, W*Co)

    return {"rhs1": rhs1, "rhs2": rhs2, "c1": c1, "c2": c2,
            "wse1": wse1_t, "wse2": wse2_t}


# ----------------------------------------------------------------------------
# Public wrapper: NCHW in / NCHW out (matches the PyTorch module).
# ----------------------------------------------------------------------------
def _choose_block_batch(B, H, target_rows=256):
    """Pack images so M = Bb*H approaches an MXU-friendly row count, keeping
    the grid length >= 2 when possible (both v7x TensorCores busy)."""
    bb = max(1, min(B, max(1, target_rows // H)))
    while bb > 1 and (B % bb != 0 or B // bb < 2):
        bb -= 1
    return bb


@jax.jit
def residual_forward(x_nchw, prep):
    B, Co, H, W = x_nchw.shape
    WCo = W * Co
    # Lane-dense layout + bf16 cast in the wrapper (halves input DMA bytes).
    x_ld = jnp.transpose(x_nchw, (0, 2, 3, 1)).reshape(B, H, WCo).astype(jnp.bfloat16)

    bb = _choose_block_batch(B, H)
    grid = (B // bb,)

    def const_spec(arr):
        nd = arr.ndim
        # Constant blocks: index never changes -> single-buffer to save VMEM.
        return pl.BlockSpec(arr.shape, lambda b: (0,) * nd,
                            pipeline_mode=pl.Buffered(1))

    out_ld = pl.pallas_call(
        residual_kernel,
        out_shape=jax.ShapeDtypeStruct((B, H, WCo), jnp.float32),
        grid=grid,
        in_specs=[
            pl.BlockSpec((bb, H, WCo), lambda b: (b, 0, 0)),   # x (Bb packed images)
            const_spec(prep["rhs1"]),
            const_spec(prep["rhs2"]),
            const_spec(prep["c1"]),
            const_spec(prep["c2"]),
            const_spec(prep["wse1"]),
            const_spec(prep["wse2"]),
        ],
        out_specs=pl.BlockSpec((bb, H, WCo), lambda b: (b, 0, 0)),
        compiler_params=pltpu.CompilerParams(
            dimension_semantics=("parallel",),
        ),
    )(x_ld, prep["rhs1"], prep["rhs2"], prep["c1"], prep["c2"],
      prep["wse1"], prep["wse2"])

    return jnp.transpose(out_ld.reshape(B, H, W, Co), (0, 3, 1, 2))


# ----------------------------------------------------------------------------
# Pure-JAX reference (eval mode) for a correctness check.
# ----------------------------------------------------------------------------
def residual_reference(x_nchw, params):
    eps = 1e-5
    dn = ("NHWC", "HWIO", "NHWC")
    x = jnp.transpose(x_nchw, (0, 2, 3, 1))
    y = jax.lax.conv_general_dilated(x, params["w1"], (1, 1), "SAME",
                                     dimension_numbers=dn) + params["b1"]
    s1 = params["g1"] / jnp.sqrt(params["rv1"] + eps)
    y = jnp.maximum((y - params["rm1"]) * s1 + params["be1"], 0.0)
    y = jax.lax.conv_general_dilated(y, params["w2"], (1, 1), "SAME",
                                     dimension_numbers=dn) + params["b2"]
    s2 = params["g2"] / jnp.sqrt(params["rv2"] + eps)
    y = (y - params["rm2"]) * s2 + params["be2"]
    pooled = jnp.mean(y, axis=(1, 2))                             # (B, Co)
    hidden = jnp.maximum(pooled @ params["wse1"].T, 0.0)          # (B, cr)
    gate = jax.nn.sigmoid(hidden @ params["wse2"])                # (B, Co)
    y = y * gate[:, None, None, :]
    x3 = jnp.einsum("bhwc,co->bhwo", x, params["w3"]) + params["b3"]
    out = jnp.maximum(y + x3, 0.0)
    return jnp.transpose(out, (0, 3, 1, 2))


if __name__ == "__main__":
    # Residual(outer_channels=32, inner_channels=16, use_1x1conv=True, dropout=0.1), eval mode.
    # B=8 exercises batch packing (Bb=4 -> M=64 rows, grid=2 for megacore).
    B, Co, Cm, H, W = 8, 32, 16, 16, 16
    key = jax.random.PRNGKey(0)
    kx_, kp = jax.random.split(key)
    x = jax.random.normal(kx_, (B, Co, H, W), jnp.float32)        # NCHW like PyTorch
    params = make_params(kp, outer_channels=Co, inner_channels=Cm)
    prep = prepare_params(params, H, W)

    out = residual_forward(x, prep)
    jax.block_until_ready(out)

    assert out.shape == (B, Co, H, W)
    assert bool(jnp.all(out >= 0.0))                              # final ReLU
    ref = residual_reference(x, params)
    max_err = float(jnp.max(jnp.abs(out - ref)))
    assert bool(jnp.allclose(out, ref, atol=0.05, rtol=0.05)), \
        f"mismatch vs reference: max abs error {max_err}"
    print("KERNEL_OK")
</pallas_src>

<mosaic_0001>
module attributes {stable_mosaic.version = 11 : i64} {
  func.func @residual_kernel(%arg0: i32, %arg1: memref<4x16x512xbf16, #tpu.memory_space<vmem>>, %arg2: memref<512x1280xbf16, #tpu.memory_space<vmem>>, %arg3: memref<256x1536xbf16, #tpu.memory_space<vmem>>, %arg4: memref<2x256xf32, #tpu.memory_space<vmem>>, %arg5: memref<3x512xf32, #tpu.memory_space<vmem>>, %arg6: memref<2x512xf32, #tpu.memory_space<vmem>>, %arg7: memref<2x512xf32, #tpu.memory_space<vmem>>, %arg8: memref<4x16x512xf32, #tpu.memory_space<vmem>>) attributes {dimension_semantics = [#tpu.dimension_semantics<parallel>], iteration_bounds = array<i64: 2>, scalar_prefetch = 0 : i64, scratch_operands = 0 : i64, tpu.core_type = #tpu.core_type<tc>, window_params = [{transform_indices = @transform_0, window_bounds = array<i64: 4, 16, 512>}, {pipeline_mode = #tpu.pipeline_mode<synchronous>, transform_indices = @transform_1, window_bounds = array<i64: 512, 1280>}, {pipeline_mode = #tpu.pipeline_mode<synchronous>, transform_indices = @transform_2, window_bounds = array<i64: 256, 1536>}, {pipeline_mode = #tpu.pipeline_mode<synchronous>, transform_indices = @transform_3, window_bounds = array<i64: 2, 256>}, {pipeline_mode = #tpu.pipeline_mode<synchronous>, transform_indices = @transform_4, window_bounds = array<i64: 3, 512>}, {pipeline_mode = #tpu.pipeline_mode<synchronous>, transform_indices = @transform_5, window_bounds = array<i64: 2, 512>}, {pipeline_mode = #tpu.pipeline_mode<synchronous>, transform_indices = @transform_6, window_bounds = array<i64: 2, 512>}, {transform_indices = @transform_7, window_bounds = array<i64: 4, 16, 512>}]} {
    %c0 = arith.constant 0 : index
    %c0_0 = arith.constant 0 : index
    %c0_1 = arith.constant 0 : index
    %0 = vector.load %arg1[%c0, %c0_0, %c0_1] : memref<4x16x512xbf16, #tpu.memory_space<vmem>>, vector<4x16x512xbf16>
    %1 = vector.shape_cast %0 : vector<4x16x512xbf16> to vector<64x512xbf16>
    %2 = tpu.iota {dimensions = array<i32: 0>} : vector<64x1xi32>
    %c16_i32 = arith.constant 16 : i32
    %c0_i32 = arith.constant 0 : i32
    %3 = arith.cmpi eq, %c16_i32, %c0_i32 : i32
    %c1_i32 = arith.constant 1 : i32
    %4 = arith.select %3, %c1_i32, %c16_i32 : i32
    %5 = vector.broadcast %4 : i32 to vector<64x1xi32>
    %6 = arith.remsi %2, %5 : vector<64x1xi32>
    %c0_i32_2 = arith.constant 0 : i32
    %7 = vector.broadcast %c0_i32_2 : i32 to vector<64x1xi32>
    %8 = arith.cmpi ne, %6, %7 : vector<64x1xi32>
    %c0_i32_3 = arith.constant 0 : i32
    %9 = vector.broadcast %c0_i32_3 : i32 to vector<64x1xi32>
    %10 = arith.cmpi slt, %6, %9 : vector<64x1xi32>
    %c0_i32_4 = arith.constant 0 : i32
    %11 = arith.cmpi slt, %4, %c0_i32_4 : i32
    %12 = vector.broadcast %11 : i1 to vector<64x1xi1>
    %13 = vector.broadcast %12 : vector<64x1xi1> to vector<64x1xi1>
    %14 = arith.xori %10, %13 : vector<64x1xi1>
    %15 = arith.andi %14, %8 : vector<64x1xi1>
    %16 = vector.broadcast %4 : i32 to vector<64x1xi32>
    %17 = arith.addi %6, %16 : vector<64x1xi32>
    %18 = arith.select %15, %17, %6 : vector<64x1xi1>, vector<64x1xi32>
    %c0_i32_5 = arith.constant 0 : i32
    %19 = vector.broadcast %c0_i32_5 : i32 to vector<64x1xi32>
    %20 = arith.cmpi ne, %18, %19 : vector<64x1xi32>
    %c15_i32 = arith.constant 15 : i32
    %21 = vector.broadcast %c15_i32 : i32 to vector<64x1xi32>
    %22 = arith.cmpi ne, %18, %21 : vector<64x1xi32>
    %c0_6 = arith.constant 0 : index
    %c0_7 = arith.constant 0 : index
    %23 = vector.load %arg2[%c0_6, %c0_7] : memref<512x1280xbf16, #tpu.memory_space<vmem>>, vector<512x1280xbf16>
    %cst = arith.constant dense<0.000000e+00> : vector<64x1280xf32>
    %24 = tpu.matmul %1, %23, %cst {dimension_numbers = #tpu.dot_dimension_numbers<[1], [0], [0], [1], [0, 0, 1, 1], [], []>} : vector<64x512xbf16>, vector<512x1280xbf16>, vector<64x1280xf32> -> vector<64x1280xf32>
    %25 = vector.extract_strided_slice %24 {offsets = [0, 0], sizes = [64, 256], strides = [1, 1]} : vector<64x1280xf32> to vector<64x256xf32>
    %26 = vector.extract_strided_slice %24 {offsets = [0, 256], sizes = [64, 256], strides = [1, 1]} : vector<64x1280xf32> to vector<64x256xf32>
    %27 = vector.extract_strided_slice %24 {offsets = [0, 512], sizes = [64, 256], strides = [1, 1]} : vector<64x1280xf32> to vector<64x256xf32>
    %c1_i32_8 = arith.constant 1 : i32
    %28 = tpu.dynamic_rotate %25 by %c1_i32_8 dim 0 : vector<64x256xf32>, i32 -> vector<64x256xf32>
    %cst_9 = arith.constant 0.000000e+00 : f32
    %29 = vector.shape_cast %20 : vector<64x1xi1> to vector<64x1xi1>
    %30 = vector.broadcast %29 : vector<64x1xi1> to vector<64x256xi1>
    %31 = vector.broadcast %cst_9 : f32 to vector<64x256xf32>
    %32 = arith.select %30, %28, %31 : vector<64x256xi1>, vector<64x256xf32>
    %c63_i32 = arith.constant 63 : i32
    %33 = tpu.dynamic_rotate %27 by %c63_i32 dim 0 : vector<64x256xf32>, i32 -> vector<64x256xf32>
    %cst_10 = arith.constant 0.000000e+00 : f32
    %34 = vector.shape_cast %22 : vector<64x1xi1> to vector<64x1xi1>
    %35 = vector.broadcast %34 : vector<64x1xi1> to vector<64x256xi1>
    %36 = vector.broadcast %cst_10 : f32 to vector<64x256xf32>
    %37 = arith.select %35, %33, %36 : vector<64x256xi1>, vector<64x256xf32>
    %38 = arith.addf %26, %32 : vector<64x256xf32>
    %39 = arith.addf %38, %37 : vector<64x256xf32>
    %40 = vector.extract_strided_slice %24 {offsets = [0, 768], sizes = [64, 512], strides = [1, 1]} : vector<64x1280xf32> to vector<64x512xf32>
    %c0_11 = arith.constant 0 : index
    %c0_12 = arith.constant 0 : index
    %41 = vector.load %arg4[%c0_11, %c0_12] : memref<2x256xf32, #tpu.memory_space<vmem>>, vector<2x256xf32>
    %42 = vector.extract_strided_slice %41 {offsets = [0, 0], sizes = [1, 256], strides = [1, 1]} : vector<2x256xf32> to vector<1x256xf32>
    %43 = vector.broadcast %42 : vector<1x256xf32> to vector<64x256xf32>
    %44 = arith.mulf %39, %43 : vector<64x256xf32>
    %45 = vector.extract_strided_slice %41 {offsets = [1, 0], sizes = [1, 256], strides = [1, 1]} : vector<2x256xf32> to vector<1x256xf32>
    %46 = vector.broadcast %45 : vector<1x256xf32> to vector<64x256xf32>
    %47 = arith.addf %44, %46 : vector<64x256xf32>
    %cst_13 = arith.constant 0.000000e+00 : f32
    %48 = vector.broadcast %cst_13 : f32 to vector<64x256xf32>
    %49 = arith.maximumf %47, %48 : vector<64x256xf32>
    %50 = arith.truncf %49 : vector<64x256xf32> to vector<64x256xbf16>
    %c0_14 = arith.constant 0 : index
    %c0_15 = arith.constant 0 : index
    %51 = vector.load %arg3[%c0_14, %c0_15] : memref<256x1536xbf16, #tpu.memory_space<vmem>>, vector<256x1536xbf16>
    %cst_16 = arith.constant dense<0.000000e+00> : vector<64x1536xf32>
    %52 = tpu.matmul %50, %51, %cst_16 {dimension_numbers = #tpu.dot_dimension_numbers<[1], [0], [0], [1], [0, 0, 1, 1], [], []>} : vector<64x256xbf16>, vector<256x1536xbf16>, vector<64x1536xf32> -> vector<64x1536xf32>
    %53 = vector.extract_strided_slice %52 {offsets = [0, 0], sizes = [64, 512], strides = [1, 1]} : vector<64x1536xf32> to vector<64x512xf32>
    %54 = vector.extract_strided_slice %52 {offsets = [0, 512], sizes = [64, 512], strides = [1, 1]} : vector<64x1536xf32> to vector<64x512xf32>
    %55 = vector.extract_strided_slice %52 {offsets = [0, 1024], sizes = [64, 512], strides = [1, 1]} : vector<64x1536xf32> to vector<64x512xf32>
    %c1_i32_17 = arith.constant 1 : i32
    %56 = tpu.dynamic_rotate %53 by %c1_i32_17 dim 0 : vector<64x512xf32>, i32 -> vector<64x512xf32>
    %cst_18 = arith.constant 0.000000e+00 : f32
    %57 = vector.shape_cast %20 : vector<64x1xi1> to vector<64x1xi1>
    %58 = vector.broadcast %57 : vector<64x1xi1> to vector<64x512xi1>
    %59 = vector.broadcast %cst_18 : f32 to vector<64x512xf32>
    %60 = arith.select %58, %56, %59 : vector<64x512xi1>, vector<64x512xf32>
    %c63_i32_19 = arith.constant 63 : i32
    %61 = tpu.dynamic_rotate %55 by %c63_i32_19 dim 0 : vector<64x512xf32>, i32 -> vector<64x512xf32>
    %cst_20 = arith.constant 0.000000e+00 : f32
    %62 = vector.shape_cast %22 : vector<64x1xi1> to vector<64x1xi1>
    %63 = vector.broadcast %62 : vector<64x1xi1> to vector<64x512xi1>
    %64 = vector.broadcast %cst_20 : f32 to vector<64x512xf32>
    %65 = arith.select %63, %61, %64 : vector<64x512xi1>, vector<64x512xf32>
    %66 = arith.addf %54, %60 : vector<64x512xf32>
    %67 = arith.addf %66, %65 : vector<64x512xf32>
    %c0_21 = arith.constant 0 : index
    %c0_22 = arith.constant 0 : index
    %68 = vector.load %arg5[%c0_21, %c0_22] : memref<3x512xf32, #tpu.memory_space<vmem>>, vector<3x512xf32>
    %69 = vector.extract_strided_slice %68 {offsets = [0, 0], sizes = [1, 512], strides = [1, 1]} : vector<3x512xf32> to vector<1x512xf32>
    %70 = vector.broadcast %69 : vector<1x512xf32> to vector<64x512xf32>
    %71 = arith.mulf %67, %70 : vector<64x512xf32>
    %72 = vector.extract_strided_slice %68 {offsets = [1, 0], sizes = [1, 512], strides = [1, 1]} : vector<3x512xf32> to vector<1x512xf32>
    %73 = vector.broadcast %72 : vector<1x512xf32> to vector<64x512xf32>
    %74 = arith.addf %71, %73 : vector<64x512xf32>
    %75 = vector.shape_cast %74 : vector<64x512xf32> to vector<4x16x512xf32>
    %cst_23 = arith.constant dense<0.000000e+00> : vector<4x512xf32>
    %76 = vector.multi_reduction <add>, %75, %cst_23 [1] : vector<4x16x512xf32> to vector<4x512xf32>
    %c0_24 = arith.constant 0 : index
    %c0_25 = arith.constant 0 : index
    %77 = vector.load %arg6[%c0_24, %c0_25] : memref<2x512xf32, #tpu.memory_space<vmem>>, vector<2x512xf32>
    %c0_26 = arith.constant 0 : index
    %c0_27 = arith.constant 0 : index
    %78 = vector.load %arg7[%c0_26, %c0_27] : memref<2x512xf32, #tpu.memory_space<vmem>>, vector<2x512xf32>
    %79 = vector.extract_strided_slice %77 {offsets = [0, 0], sizes = [1, 512], strides = [1, 1]} : vector<2x512xf32> to vector<1x512xf32>
    %80 = vector.broadcast %79 : vector<1x512xf32> to vector<4x512xf32>
    %81 = arith.mulf %76, %80 : vector<4x512xf32>
    %cst_28 = arith.constant dense<0.000000e+00> : vector<4xf32>
    %82 = vector.multi_reduction <add>, %81, %cst_28 [1] : vector<4x512xf32> to vector<4xf32>
    %83 = vector.shape_cast %82 : vector<4xf32> to vector<4x1xf32>
    %cst_29 = arith.constant 0.000000e+00 : f32
    %84 = vector.broadcast %cst_29 : f32 to vector<4x1xf32>
    %85 = arith.maximumf %83, %84 : vector<4x1xf32>
    %86 = vector.extract_strided_slice %78 {offsets = [0, 0], sizes = [1, 512], strides = [1, 1]} : vector<2x512xf32> to vector<1x512xf32>
    %87 = vector.broadcast %85 : vector<4x1xf32> to vector<4x512xf32>
    %88 = vector.broadcast %86 : vector<1x512xf32> to vector<4x512xf32>
    %89 = arith.mulf %87, %88 : vector<4x512xf32>
    %90 = vector.extract_strided_slice %77 {offsets = [1, 0], sizes = [1, 512], strides = [1, 1]} : vector<2x512xf32> to vector<1x512xf32>
    %91 = vector.broadcast %90 : vector<1x512xf32> to vector<4x512xf32>
    %92 = arith.mulf %76, %91 : vector<4x512xf32>
    %cst_30 = arith.constant dense<0.000000e+00> : vector<4xf32>
    %93 = vector.multi_reduction <add>, %92, %cst_30 [1] : vector<4x512xf32> to vector<4xf32>
    %94 = vector.shape_cast %93 : vector<4xf32> to vector<4x1xf32>
    %cst_31 = arith.constant 0.000000e+00 : f32
    %95 = vector.broadcast %cst_31 : f32 to vector<4x1xf32>
    %96 = arith.maximumf %94, %95 : vector<4x1xf32>
    %97 = vector.extract_strided_slice %78 {offsets = [1, 0], sizes = [1, 512], strides = [1, 1]} : vector<2x512xf32> to vector<1x512xf32>
    %98 = vector.broadcast %96 : vector<4x1xf32> to vector<4x512xf32>
    %99 = vector.broadcast %97 : vector<1x512xf32> to vector<4x512xf32>
    %100 = arith.mulf %98, %99 : vector<4x512xf32>
    %101 = arith.addf %89, %100 : vector<4x512xf32>
    %102 = arith.negf %101 : vector<4x512xf32>
    %103 = math.exp %102 : vector<4x512xf32>
    %cst_32 = arith.constant 1.000000e+00 : f32
    %104 = vector.broadcast %cst_32 : f32 to vector<4x512xf32>
    %105 = arith.addf %104, %103 : vector<4x512xf32>
    %106 = arith.divf %104, %105 : vector<4x512xf32>
    %107 = vector.extract_strided_slice %68 {offsets = [2, 0], sizes = [1, 512], strides = [1, 1]} : vector<3x512xf32> to vector<1x512xf32>
    %108 = vector.broadcast %107 : vector<1x512xf32> to vector<64x512xf32>
    %109 = arith.addf %40, %108 : vector<64x512xf32>
    %110 = vector.shape_cast %109 : vector<64x512xf32> to vector<4x16x512xf32>
    %111 = vector.shape_cast %106 : vector<4x512xf32> to vector<4x1x512xf32>
    %112 = vector.broadcast %111 : vector<4x1x512xf32> to vector<4x16x512xf32>
    %113 = arith.mulf %75, %112 : vector<4x16x512xf32>
    %114 = arith.addf %113, %110 : vector<4x16x512xf32>
    %cst_33 = arith.constant 0.000000e+00 : f32
    %115 = vector.broadcast %cst_33 : f32 to vector<4x16x512xf32>
    %116 = arith.maximumf %114, %115 : vector<4x16x512xf32>
    %c0_34 = arith.constant 0 : index
    %c0_35 = arith.constant 0 : index
    %c0_36 = arith.constant 0 : index
    %117 = vector.load %arg8[%c0_34, %c0_35, %c0_36] : memref<4x16x512xf32, #tpu.memory_space<vmem>>, vector<4x16x512xf32>
    tpu.vector_store %arg8[%c0_34, %c0_35, %c0_36], %116 {strides = array<i32>} : memref<4x16x512xf32, #tpu.memory_space<vmem>>, vector<4x16x512xf32>,
    return
  }
  func.func @transform_0(%arg0: i32) -> (i32, i32, i32) {
    %c0_i32 = arith.constant 0 : i32
    %c0_i32_0 = arith.constant 0 : i32
    %c0_i32_1 = arith.constant 0 : i32
    return %arg0, %c0_i32, %c0_i32_0 : i32, i32, i32
  }
  func.func @transform_1(%arg0: i32) -> (i32, i32) {
    %c0_i32 = arith.constant 0 : i32
    %c0_i32_0 = arith.constant 0 : i32
    %c0_i32_1 = arith.constant 0 : i32
    return %c0_i32, %c0_i32_0 : i32, i32
  }
  func.func @transform_2(%arg0: i32) -> (i32, i32) {
    %c0_i32 = arith.constant 0 : i32
    %c0_i32_0 = arith.constant 0 : i32
    %c0_i32_1 = arith.constant 0 : i32
    return %c0_i32, %c0_i32_0 : i32, i32
  }
  func.func @transform_3(%arg0: i32) -> (i32, i32) {
    %c0_i32 = arith.constant 0 : i32
    %c0_i32_0 = arith.constant 0 : i32
    %c0_i32_1 = arith.constant 0 : i32
    return %c0_i32, %c0_i32_0 : i32, i32
  }
  func.func @transform_4(%arg0: i32) -> (i32, i32) {
    %c0_i32 = arith.constant 0 : i32
    %c0_i32_0 = arith.constant 0 : i32
    %c0_i32_1 = arith.constant 0 : i32
    return %c0_i32, %c0_i32_0 : i32, i32
  }
  func.func @transform_5(%arg0: i32) -> (i32, i32) {
    %c0_i32 = arith.constant 0 : i32
    %c0_i32_0 = arith.constant 0 : i32
    %c0_i32_1 = arith.constant 0 : i32
    return %c0_i32, %c0_i32_0 : i32, i32
  }
  func.func @transform_6(%arg0: i32) -> (i32, i32) {
    %c0_i32 = arith.constant 0 : i32
    %c0_i32_0 = arith.constant 0 : i32
    %c0_i32_1 = arith.constant 0 : i32
    return %c0_i32, %c0_i32_0 : i32, i32
  }
  func.func @transform_7(%arg0: i32) -> (i32, i32, i32) {
    %c0_i32 = arith.constant 0 : i32
    %c0_i32_0 = arith.constant 0 : i32
    %c0_i32_1 = arith.constant 0 : i32
    return %arg0, %c0_i32, %c0_i32_0 : i32, i32, i32
  }
}

</mosaic_0001>

<bundles_post_ra>
// kernel: residual_forward.1
= control target key start
LH: loop header
LB: loop body
LE: loop exit
PB: predicated region body
PF: predicated region fallthrough
CT: control target
= control target key end

     0   :  { %s7717_s24 = smov 0   ;;  %s10846_s0 = inlined_call_operand.vmem [shape: bf16[8,16,512], index: 0, kind: input, shape index: {}]   ;;  %s10847_s1 = inlined_call_operand.vmem [shape: bf16[512,1280], index: 1, kind: input, shape index: {}]   ;;  %s10848_s2 = inlined_call_operand.vmem [shape: bf16[256,1536], index: 2, kind: input, shape index: {}]   ;;  %s10849_s3 = inlined_call_operand.vmem [shape: f32[2,256], index: 3, kind: input, shape index: {}]   ;;  %s10850_s4 = inlined_call_operand.vmem [shape: f32[3,512], index: 4, kind: input, shape index: {}]   ;;  %s10851_s5 = inlined_call_operand.vmem [shape: f32[2,512], index: 5, kind: input, shape index: {}]   ;;  %s10852_s6 = inlined_call_operand.vmem [shape: f32[2,512], index: 6, kind: input, shape index: {}]   ;;  %s10853_s7 = inlined_call_operand.vmem [shape: f32[8,16,512], index: 7, kind: output, shape index: {}]  }
   0x1 LB: > { %s6208_s25 = sadd.s32 4294967295, %s7674_s24   ;;  %p6212_p0 = scmp.ge.s32.totalorder %s7674_s24, 1  ;;  %s7674_s24 = sphi %s7717_s24, %s17_s24  }
   0x2   : > { %p239_p1 = scmp.lt.s32.totalorder %s7674_s24, 3 }
   0x4   : > { %p240_p2 = pnand %p6212_p0, %p239_p1 }
   0x6   : > { %243 = sbr.rel (%p240_p2) target bundleno = 1202 (0x4b2), region = 48 }
   0xd   : > { %v6844_v0 = vld [vmem:[%s10847_s1 + $0x4] ss:$40 sps:$4 sm:$0xff]   ;;  %v6846_v1 = vld [vmem:[%s10847_s1] ss:$40 sps:$4 sm:$0xff]   ;;  %v6849_v3 = vld [vmem:[%s10847_s1 + $0x54] ss:$40 sps:$4 sm:$0xff]  }
   0xe   : > { %2424 = vmatprep.subr.bf16.mxu0 %v6844_v0  ;;  %v6847_v2 = vld [vmem:[%s10847_s1 + $0xc] ss:$40 sps:$4 sm:$0xff]   ;;  %v6851_v4 = vld [vmem:[%s10847_s1 + $0x8] ss:$40 sps:$4 sm:$0xff]   ;;  %v6853_v6 = vld [vmem:[%s10847_s1 + $0x5c] ss:$40 sps:$4 sm:$0xff]  }
   0xf   : > { %2425 = vmatpush1.bf16.msra.mxu0 %v6846_v1  ;;  %v6852_v5 = vld [vmem:[%s10847_s1 + $0x50] ss:$40 sps:$4 sm:$0xff]   ;;  %2570 = vmatprep.subr.bf16.mxu1 %v6847_v2  ;;  %v6855_v7 = vld [vmem:[%s10847_s1 + $0xa4] ss:$40 sps:$4 sm:$0xff]   ;;  %v6858_v9 = vld [vmem:[%s10847_s1 + $0xa0] ss:$40 sps:$4 sm:$0xff]  }
  0x10   : > { %2426 = vmatprep.subr.bf16.mxu0 %v6849_v3  ;;  %2571 = vmatpush1.bf16.msra.mxu1 %v6851_v4  ;;  %v6857_v8 = vld [vmem:[%s10847_s1 + $0x58] ss:$40 sps:$4 sm:$0xff]   ;;  %v6859_v10 = vld [vmem:[%s10847_s1 + $0xac] ss:$40 sps:$4 sm:$0xff]   ;;  %v6863_v12 = vld [vmem:[%s10847_s1 + $0xa8] ss:$40 sps:$4 sm:$0xff]  }
  0x11   : > { %2572 = vmatprep.subr.bf16.mxu1 %v6853_v6  ;;  %v6861_v11 = vld [vmem:[%s10847_s1 + $0xf4] ss:$40 sps:$4 sm:$0xff]   ;;  %v6864_v14 = vld [vmem:[%s10847_s1 + $0xf0] ss:$40 sps:$4 sm:$0xff]   ;;  %v6867_v15 = vld [vmem:[%s10847_s1 + $0x144] ss:$40 sps:$4 sm:$0xff]  }
  0x12   : > { %v6865_v13 = vld [vmem:[%s10847_s1 + $0xfc] ss:$40 sps:$4 sm:$0xff]   ;;  %v6869_v16 = vld [vmem:[%s10847_s1 + $0xf8] ss:$40 sps:$4 sm:$0xff]   ;;  %v6871_v17 = vld [vmem:[%s10847_s1 + $0x14c] ss:$40 sps:$4 sm:$0xff]  }
  0x13   : > { %2427 = vmatpush1.bf16.msra.mxu0 %v6852_v5  ;;  %v6870_v18 = vld [vmem:[%s10847_s1 + $0x140] ss:$40 sps:$4 sm:$0xff]   ;;  %v6873_v19 = vld [vmem:[%s10847_s1 + $0x194] ss:$40 sps:$4 sm:$0xff]   ;;  %v6876_v22 = vld [vmem:[%s10847_s1 + $0x190] ss:$40 sps:$4 sm:$0xff]  }
  0x14   : > { %2428 = vmatprep.subr.bf16.mxu0 %v6855_v7  ;;  %2573 = vmatpush1.bf16.msra.mxu1 %v6857_v8  ;;  %v6875_v20 = vld [vmem:[%s10847_s1 + $0x148] ss:$40 sps:$4 sm:$0xff]   ;;  %v6877_v21 = vld [vmem:[%s10847_s1 + $0x19c] ss:$40 sps:$4 sm:$0xff]   ;;  %v6881_v24 = vld [vmem:[%s10847_s1 + $0x198] ss:$40 sps:$4 sm:$0xff]  }
  0x15   : > { %2574 = vmatprep.subr.bf16.mxu1 %v6859_v10  ;;  %v6879_v23 = vld [vmem:[%s10847_s1 + $0x1e4] ss:$40 sps:$4 sm:$0xff]   ;;  %v6882_v26 = vld [vmem:[%s10847_s1 + $0x1e0] ss:$40 sps:$4 sm:$0xff]   ;;  %v6885_v27 = vld [vmem:[%s10847_s1 + $0x234] ss:$40 sps:$4 sm:$0xff]  }
  0x16   : > { %v6883_v25 = vld [vmem:[%s10847_s1 + $0x1ec] ss:$40 sps:$4 sm:$0xff]   ;;  %v6887_v28 = vld [vmem:[%s10847_s1 + $0x1e8] ss:$40 sps:$4 sm:$0xff]   ;;  %v6889_v29 = vld [vmem:[%s10847_s1 + $0x23c] ss:$40 sps:$4 sm:$0xff]  }
  0x17   : > { %2429 = vmatpush1.bf16.msra.mxu0 %v6858_v9  ;;  %s6213_s21 = sshll.u32 %s6208_s25, 2  ;;  %v6888_v30 = vld [vmem:[%s10847_s1 + $0x230] ss:$40 sps:$4 sm:$0xff]   ;;  %v6891_v31 = vld [vmem:[%s10847_s1 + $0x284] ss:$40 sps:$4 sm:$0xff]   ;;  %vm5580_vm10 = vcmask 1041409  }
  0x18   : > { %2430 = vmatprep.subr.bf16.mxu0 %v6861_v11  ;;  %2575 = vmatpush1.bf16.msra.mxu1 %v6863_v12  ;;  %v6893_v32 = vld [vmem:[%s10847_s1 + $0x238] ss:$40 sps:$4 sm:$0xff]   ;;  %p274_p3 = scmp.lt.s32.totalorder %s6213_s21, 7  ;;  %v6895_v33 = vld [vmem:[%s10847_s1 + $0x28c] ss:$40 sps:$4 sm:$0xff]   ;;  %vm5583_vm11 = vcmask 1042434  }
  0x19   : > { %2576 = vmatprep.subr.bf16.mxu1 %v6865_v13  ;;  %v6894_v34 = vld [vmem:[%s10847_s1 + $0x280] ss:$40 sps:$4 sm:$0xff]   ;;  %v6897_v35 = vld [vmem:[%s10847_s1 + $0x2d4] ss:$40 sps:$4 sm:$0xff]   ;;  %v6900_v38 = vld [vmem:[%s10847_s1 + $0x2d0] ss:$40 sps:$4 sm:$0xff]  }
  0x1a   : > { %v6899_v36 = vld [vmem:[%s10847_s1 + $0x288] ss:$40 sps:$4 sm:$0xff]   ;;  %s11066_s21 = smov (!%p274_p3, %s6213_s21), 7  ;;  %v6901_v37 = vld [vmem:[%s10847_s1 + $0x2dc] ss:$40 sps:$4 sm:$0xff]   ;;  %vm5586_vm12 = vcmask 1043459  }
  0x1b   : > { %2431 = vmatpush1.bf16.msra.mxu0 %v6864_v14  ;;  %v6903_v39 = vld [vmem:[%s10847_s1 + $0x324] ss:$40 sps:$4 sm:$0xff]   ;;  %v6905_v40 = vld [vmem:[%s10847_s1 + $0x2d8] ss:$40 sps:$4 sm:$0xff]   ;;  %s6753_s23 = sshll.u32 %s11066_s21, 5  ;;  %vm5610_vm13 = vcmask 1043456  }
  0x1c   : > { %2432 = vmatprep.subr.bf16.mxu0 %v6867_v15  ;;  %2577 = vmatpush1.bf16.msra.mxu1 %v6869_v16  ;;  %v6907_v41 = vld [vmem:[%s10847_s1 + $0x32c] ss:$40 sps:$4 sm:$0xff]   ;;  %v6906_v42 = vld [vmem:[%s10847_s1 + $0x320] ss:$40 sps:$4 sm:$0xff]   ;;  %s7868_s12 = scalar_lea.vmem %s10846_s0, %s6753_s23  ;;  %v6912_v45 = vld [vmem:[%s10847_s1 + $0x370] ss:$40 sps:$4 sm:$0xff]  }
  0x1d   : > { %2578 = vmatprep.subr.bf16.mxu1 %v6871_v17  ;;  %v6909_v43 = vld [vmem:[%s10847_s1 + $0x374] ss:$40 sps:$4 sm:$0xff]   ;;  %v6911_v44 = vld [vmem:[%s10847_s1 + $0x328] ss:$40 sps:$4 sm:$0xff]   ;;  %v6915_v48 = vld [vmem:[%s10847_s1 + $0x3c4] ss:$40 sps:$4 sm:$0xff]  }
  0x1e   : > { %v6913_v46 = vld [vmem:[%s10847_s1 + $0x37c] ss:$40 sps:$4 sm:$0xff]   ;;  %v6917_v49 = vld [vmem:[%s10847_s1 + $0x378] ss:$40 sps:$4 sm:$0xff]   ;;  %v6919_v50 = vld [vmem:[%s10847_s1 + $0x3cc] ss:$40 sps:$4 sm:$0xff]  }
  0x1f   : > { %2433 = vmatpush1.bf16.msra.mxu0 %v6870_v18  ;;  %v7877_v47 = vld [vmem:[%s7868_s12 + $0x4] ss:$16 sps:$4 sm:$0xff]   ;;  %v6918_v51 = vld [vmem:[%s10847_s1 + $0x3c0] ss:$40 sps:$4 sm:$0xff]   ;;  %v6924_v55 = vld [vmem:[%s10847_s1 + $0x410] ss:$40 sps:$4 sm:$0xff]  }
  0x20   : > { %2434 = vmatprep.subr.bf16.mxu0 %v6873_v19  ;;  %2579 = vmatpush1.bf16.msra.mxu1 %v6875_v20  ;;  %v6921_v52 = vld [vmem:[%s10847_s1 + $0x414] ss:$40 sps:$4 sm:$0xff]   ;;  %v6923_v53 = vld [vmem:[%s10847_s1 + $0x3c8] ss:$40 sps:$4 sm:$0xff]   ;;  %v6927_v56 = vld [vmem:[%s10847_s1 + $0x464] ss:$40 sps:$4 sm:$0xff]  }
  0x21   : > { %2580 = vmatprep.subr.bf16.mxu1 %v6877_v21  ;;  %2456 = vmatprep.mubr.bf16.mxu0 %v7877_v47  ;;  %v6925_v54 = vld [vmem:[%s10847_s1 + $0x41c] ss:$40 sps:$4 sm:$0xff]   ;;  %v6929_v57 = vld [vmem:[%s10847_s1 + $0x418] ss:$40 sps:$4 sm:$0xff]   ;;  %v6931_v58 = vld [vmem:[%s10847_s1 + $0x46c] ss:$40 sps:$4 sm:$0xff]  }
  0x22   : > { %2602 = vmatprep.mubr.bf16.mxu1 %v7877_v47  ;;  %v6930_v59 = vld [vmem:[%s10847_s1 + $0x460] ss:$40 sps:$4 sm:$0xff]   ;;  %v6933_v60 = vld [vmem:[%s10847_s1 + $0x4b4] ss:$40 sps:$4 sm:$0xff]   ;;  %v6936_v63 = vld [vmem:[%s10847_s1 + $0x4b0] ss:$40 sps:$4 sm:$0xff]  }
  0x23   : > { %2435 = vmatpush1.bf16.msra.mxu0 %v6876_v22  ;;  %v6935_v61 = vld [vmem:[%s10847_s1 + $0x468] ss:$40 sps:$4 sm:$0xff]   ;;  %v6937_v62 = vld [vmem:[%s10847_s1 + $0x4bc] ss:$40 sps:$4 sm:$0xff]   ;;  %v6944_v1 = vld [vmem:[%s10847_s1 + $0x4b8] ss:$40 sps:$4 sm:$0xff]  }
  0x24   : > { %2436 = vmatprep.subr.bf16.mxu0 %v6879_v23  ;;  %2581 = vmatpush1.bf16.msra.mxu1 %v6881_v24  ;;  %v6943_v0 = vld [vmem:[%s10847_s1 + $0x504] ss:$40 sps:$4 sm:$0xff]   ;;  %v6945_v2 = vld [vmem:[%s7868_s12] ss:$16 sps:$4 sm:$0xff]   ;;  %v6951_v5 = vld [vmem:[%s10847_s1 + $0x554] ss:$40 sps:$4 sm:$0xff]  }
  0x25   : > { %2582 = vmatprep.subr.bf16.mxu1 %v6883_v25  ;;  %v6948_v3 = vld [vmem:[%s10847_s1 + $0x50c] ss:$40 sps:$4 sm:$0xff]   ;;  %v6941_v4 = vld [vmem:[%s10847_s1 + $0x500] ss:$40 sps:$4 sm:$0xff]   ;;  %v6954_v7 = vld [vmem:[%s10847_s1 + $0x55c] ss:$40 sps:$4 sm:$0xff]  }
  0x26   : > { %v6946_v6 = vld [vmem:[%s10847_s1 + $0x508] ss:$40 sps:$4 sm:$0xff]   ;;  %v6952_v9 = vld [vmem:[%s10847_s1 + $0x558] ss:$40 sps:$4 sm:$0xff]   ;;  %v6957_v10 = vld [vmem:[%s10847_s1 + $0x5a4] ss:$40 sps:$4 sm:$0xff]  }
  0x27   : > { %2437 = vmatpush1.bf16.msra.mxu0 %v6882_v26  ;;  %v6949_v8 = vld [vmem:[%s10847_s1 + $0x550] ss:$40 sps:$4 sm:$0xff]   ;;  %v6960_v11 = vld [vmem:[%s10847_s1 + $0x5ac] ss:$40 sps:$4 sm:$0xff]   ;;  %v6955_v13 = vld [vmem:[%s10847_s1 + $0x5a0] ss:$40 sps:$4 sm:$0xff]  }
  0x28   : > { %2438 = vmatprep.subr.bf16.mxu0 %v6885_v27  ;;  %2583 = vmatpush1.bf16.msra.mxu1 %v6887_v28  ;;  %v7964_v12 = vld [vmem:[%s7868_s12 + $0x24] ss:$16 sps:$4 sm:$0xff]   ;;  %v7005_v14 = vld [vmem:[%s7868_s12 + $0x20] ss:$16 sps:$4 sm:$0xff]   ;;  %s6754_s15 = sshll.u32 %s11066_s21, 6 }
  0x29   : > { %2584 = vmatprep.subr.bf16.mxu1 %v6889_v29  ;;  %v6963_v15 = vld [vmem:[%s10847_s1 + $0x5f4] ss:$40 sps:$4 sm:$0xff]   ;;  %v6958_v16 = vld [vmem:[%s10847_s1 + $0x5a8] ss:$40 sps:$4 sm:$0xff]   ;;  %v6969_v19 = vld [vmem:[%s10847_s1 + $0x644] ss:$40 sps:$4 sm:$0xff]   ;;  %s10777_s17 = scalar_lea.vmem %s10853_s7, %s6754_s15 }
  0x2a   : > { %v6966_v17 = vld [vmem:[%s10847_s1 + $0x5fc] ss:$40 sps:$4 sm:$0xff]   ;;  %v6961_v18 = vld [vmem:[%s10847_s1 + $0x5f0] ss:$40 sps:$4 sm:$0xff]   ;;  %v6972_v22 = vld [vmem:[%s10847_s1 + $0x64c] ss:$40 sps:$4 sm:$0xff]  }
  0x2b   : > { %2439 = vmatpush1.bf16.msra.mxu0 %v6888_v30  ;;  %v7988_v20 = vld [vmem:[%s7868_s12 + $0x44] ss:$16 sps:$4 sm:$0xff]   ;;  %v6964_v21 = vld [vmem:[%s10847_s1 + $0x5f8] ss:$40 sps:$4 sm:$0xff]   ;;  %v6970_v26 = vld [vmem:[%s10847_s1 + $0x648] ss:$40 sps:$4 sm:$0xff]  }
  0x2c   : > { %2440 = vmatprep.subr.bf16.mxu0 %v6891_v31  ;;  %2585 = vmatpush1.bf16.msra.mxu1 %v6893_v32  ;;  %v7020_v23 = vld [vmem:[%s7868_s12 + $0x40] ss:$16 sps:$4 sm:$0xff]   ;;  %v6975_v25 = vld [vmem:[%s10847_s1 + $0x694] ss:$40 sps:$4 sm:$0xff]   ;;  %v6981_v30 = vld [vmem:[%s10847_s1 + $0x6e4] ss:$40 sps:$4 sm:$0xff]  }
  0x2d   : > { %2586 = vmatprep.subr.bf16.mxu1 %v6895_v33  ;;  %v6967_v24 = vld [vmem:[%s10847_s1 + $0x640] ss:$40 sps:$4 sm:$0xff]   ;;  %v6973_v27 = vld [vmem:[%s10847_s1 + $0x690] ss:$40 sps:$4 sm:$0xff]   ;;  %v6978_v28 = vld [vmem:[%s10847_s1 + $0x69c] ss:$40 sps:$4 sm:$0xff]  }
  0x2e   : > { %v7030_v29 = vld [vmem:[%s7868_s12 + $0x64] ss:$16 sps:$4 sm:$0xff]   ;;  %v6976_v31 = vld [vmem:[%s10847_s1 + $0x698] ss:$40 sps:$4 sm:$0xff]  }
  0x2f   : > { %2441 = vmatpush1.bf16.msra.mxu0 %v6894_v34  ;;  %v6984_v32 = vld [vmem:[%s10847_s1 + $0x6ec] ss:$40 sps:$4 sm:$0xff]   ;;  %v7035_v33 = vld [vmem:[%s7868_s12 + $0x60] ss:$16 sps:$4 sm:$0xff]  }
  0x30   : > { %2442 = vmatprep.subr.bf16.mxu0 %v6897_v35  ;;  %2587 = vmatpush1.bf16.msra.mxu1 %v6899_v36  ;;  %v6979_v34 = vld [vmem:[%s10847_s1 + $0x6e0] ss:$40 sps:$4 sm:$0xff]   ;;  %v6987_v36 = vld [vmem:[%s10847_s1 + $0x734] ss:$40 sps:$4 sm:$0xff]  }
  0x31   : > { %2588 = vmatprep.subr.bf16.mxu1 %v6901_v37  ;;  %v6982_v35 = vld [vmem:[%s10847_s1 + $0x6e8] ss:$40 sps:$4 sm:$0xff]   ;;  %v6990_v37 = vld [vmem:[%s10847_s1 + $0x73c] ss:$40 sps:$4 sm:$0xff]  }
  0x33   : > { %2443 = vmatpush1.bf16.msra.mxu0 %v6900_v38  ;;  %v7045_v38 = vld [vmem:[%s7868_s12 + $0xc] ss:$16 sps:$4 sm:$0xff]  }
  0x34   : > { %2444 = vmatprep.subr.bf16.mxu0 %v6903_v39  ;;  %2589 = vmatpush1.bf16.msra.mxu1 %v6905_v40  ;;  %v6985_v39 = vld [vmem:[%s10847_s1 + $0x730] ss:$40 sps:$4 sm:$0xff]   ;;  %v6993_v40 = vld [vmem:[%s10847_s1 + $0x784] ss:$40 sps:$4 sm:$0xff]  }
  0x35   : > { %2590 = vmatprep.subr.bf16.mxu1 %v6907_v41  ;;  %v6988_v41 = vld [vmem:[%s10847_s1 + $0x738] ss:$40 sps:$4 sm:$0xff]  }
  0x37   : > { %2445 = vmatpush1.bf16.msra.mxu0 %v6906_v42  ;;  %v6996_v42 = vld [vmem:[%s10847_s1 + $0x78c] ss:$40 sps:$4 sm:$0xff]  }
  0x38   : > { %2446 = vmatprep.subr.bf16.mxu0 %v6909_v43  ;;  %2591 = vmatpush1.bf16.msra.mxu1 %v6911_v44  ;;  %v6991_v43 = vld [vmem:[%s10847_s1 + $0x780] ss:$40 sps:$4 sm:$0xff]   ;;  %v6999_v44 = vld [vmem:[%s10847_s1 + $0x7d4] ss:$40 sps:$4 sm:$0xff]  }
  0x39   : > { %2592 = vmatprep.subr.bf16.mxu1 %v6913_v46  ;;  %v7004_v46 = vld [vmem:[%s10847_s1 + $0x7dc] ss:$40 sps:$4 sm:$0xff]  }
  0x3b   : > { %2447 = vmatpush1.bf16.msra.mxu0 %v6912_v45  ;;  %v6994_v45 = vld [vmem:[%s10847_s1 + $0x788] ss:$40 sps:$4 sm:$0xff]  }
  0x3c   : > { %2448 = vmatprep.subr.bf16.mxu0 %v6915_v48  ;;  %2593 = vmatpush1.bf16.msra.mxu1 %v6917_v49  ;;  %v6997_v48 = vld [vmem:[%s10847_s1 + $0x7d0] ss:$40 sps:$4 sm:$0xff]   ;;  %v7008_v49 = vld [vmem:[%s10847_s1 + $0x824] ss:$40 sps:$4 sm:$0xff]  }
  0x3d   : > { %2594 = vmatprep.subr.bf16.mxu1 %v6919_v50  ;;  %v7002_v50 = vld [vmem:[%s10847_s1 + $0x7d8] ss:$40 sps:$4 sm:$0xff]  }
  0x3f   : > { %2449 = vmatpush1.bf16.msra.mxu0 %v6918_v51  ;;  %v7011_v51 = vld [vmem:[%s10847_s1 + $0x82c] ss:$40 sps:$4 sm:$0xff]  }
  0x40   : > { %2450 = vmatprep.subr.bf16.mxu0 %v6921_v52  ;;  %2595 = vmatpush1.bf16.msra.mxu1 %v6923_v53  ;;  %v7006_v52 = vld [vmem:[%s10847_s1 + $0x820] ss:$40 sps:$4 sm:$0xff]   ;;  %v7014_v53 = vld [vmem:[%s10847_s1 + $0x874] ss:$40 sps:$4 sm:$0xff]  }
  0x41   : > { %2596 = vmatprep.subr.bf16.mxu1 %v6925_v54  ;;  %v7009_v54 = vld [vmem:[%s10847_s1 + $0x828] ss:$40 sps:$4 sm:$0xff]  }
  0x43   : > { %2451 = vmatpush1.bf16.msra.mxu0 %v6924_v55  ;;  %v7019_v55 = vld [vmem:[%s10847_s1 + $0x87c] ss:$40 sps:$4 sm:$0xff]  }
  0x44   : > { %2452 = vmatprep.subr.bf16.mxu0 %v6927_v56  ;;  %2597 = vmatpush1.bf16.msra.mxu1 %v6929_v57  ;;  %v7012_v56 = vld [vmem:[%s10847_s1 + $0x870] ss:$40 sps:$4 sm:$0xff]   ;;  %v7023_v57 = vld [vmem:[%s10847_s1 + $0x8c4] ss:$40 sps:$4 sm:$0xff]  }
  0x45   : > { %2598 = vmatprep.subr.bf16.mxu1 %v6931_v58  ;;  %v7017_v58 = vld [vmem:[%s10847_s1 + $0x878] ss:$40 sps:$4 sm:$0xff]  }
  0x47   : > { %2453 = vmatpush1.bf16.msra.mxu0 %v6930_v59  ;;  %v7026_v59 = vld [vmem:[%s10847_s1 + $0x8cc] ss:$40 sps:$4 sm:$0xff]  }
  0x48   : > { %2454 = vmatprep.subr.bf16.mxu0 %v6933_v60  ;;  %2599 = vmatpush1.bf16.msra.mxu1 %v6935_v61  ;;  %v7021_v60 = vld [vmem:[%s10847_s1 + $0x8c0] ss:$40 sps:$4 sm:$0xff]   ;;  %v7029_v61 = vld [vmem:[%s10847_s1 + $0x914] ss:$40 sps:$4 sm:$0xff]  }
  0x49   : > { %2600 = vmatprep.subr.bf16.mxu1 %v6937_v62  ;;  %v7024_v62 = vld [vmem:[%s10847_s1 + $0x8c8] ss:$40 sps:$4 sm:$0xff]  }
  0x4b   : > { %2455 = vmatpush1.bf16.msra.mxu0 %v6936_v63  ;;  %v7034_v63 = vld [vmem:[%s10847_s1 + $0x91c] ss:$40 sps:$4 sm:$0xff]  }
  0x4c   : > { %2497 = vmatprep.subr.bf16.mxu0 %v6943_v0  ;;  %2601 = vmatpush1.bf16.msra.mxu1 %v6944_v1  ;;  %v7027_v0 = vld [vmem:[%s10847_s1 + $0x910] ss:$40 sps:$4 sm:$0xff]   ;;  %v7038_v1 = vld [vmem:[%s10847_s1 + $0x964] ss:$40 sps:$4 sm:$0xff]  }
  0x4d   : > { %2643 = vmatprep.subr.bf16.mxu1 %v6948_v3  ;;  %v7041_v3 = vld [vmem:[%s10847_s1 + $0x96c] ss:$40 sps:$4 sm:$0xff]  }
  0x4e   : > { %2457 = vmatmul.mubr.bf16.vlgmr.msra.gmra.mrb[0].mxu0 %v6945_v2 }
  0x4f   : > { %2498 = vmatpush1.bf16.msra.mxu0 %v6941_v4  ;;  %2603 = vmatmul.mubr.bf16.vlgmr.msra.gmra.mrb[0].mxu1 %v6945_v2  ;;  %v7032_v2 = vld [vmem:[%s10847_s1 + $0x918] ss:$40 sps:$4 sm:$0xff]  }
  0x50   : > { %2499 = vmatprep.subr.bf16.mxu0 %v6951_v5  ;;  %2644 = vmatpush1.bf16.msra.mxu1 %v6946_v6  ;;  %v7036_v4 = vld [vmem:[%s10847_s1 + $0x960] ss:$40 sps:$4 sm:$0xff]   ;;  %v7044_v5 = vld [vmem:[%s10847_s1 + $0x9b4] ss:$40 sps:$4 sm:$0xff]  }
  0x51   : > { %2645 = vmatprep.subr.bf16.mxu1 %v6954_v7  ;;  %2466 = vmatprep.mubr.bf16.mxu0 %v7964_v12  ;;  %v7039_v6 = vld [vmem:[%s10847_s1 + $0x968] ss:$40 sps:$4 sm:$0xff]   ;;  %v7049_v7 = vld [vmem:[%s10847_s1 + $0x9bc] ss:$40 sps:$4 sm:$0xff]  }
  0x52   : > { %2612 = vmatprep.mubr.bf16.mxu1 %v7964_v12 }
  0x53   : > { %2500 = vmatpush1.bf16.msra.mxu0 %v6949_v8  ;;  %v7042_v8 = vld [vmem:[%s10847_s1 + $0x9b0] ss:$40 sps:$4 sm:$0xff]  }
  0x54   : > { %2501 = vmatprep.subr.bf16.mxu0 %v6957_v10  ;;  %2646 = vmatpush1.bf16.msra.mxu1 %v6952_v9  ;;  %v7053_v9 = vld [vmem:[%s10847_s1 + $0x14] ss:$40 sps:$4 sm:$0xff]   ;;  %v7047_v10 = vld [vmem:[%s10847_s1 + $0x9b8] ss:$40 sps:$4 sm:$0xff]  }
  0x55   : > { %2647 = vmatprep.subr.bf16.mxu1 %v6960_v11  ;;  %v7050_v11 = vld [vmem:[%s7868_s12 + $0x8] ss:$16 sps:$4 sm:$0xff]  }
  0x56   : > { %2467 = vmatmul.mubr.bf16.gmra.mrb[4].mxu0 %v7005_v14 }
  0x57   : > { %2502 = vmatpush1.bf16.msra.mxu0 %v6955_v13  ;;  %2613 = vmatmul.mubr.bf16.gmra.mrb[4].mxu1 %v7005_v14  ;;  %v7051_v13 = vld [vmem:[%s10847_s1 + $0x10] ss:$40 sps:$4 sm:$0xff]   ;;  %v7057_v14 = vld [vmem:[%s7868_s12 + $0x2c] ss:$16 sps:$4 sm:$0xff]  }
  0x58   : > { %2503 = vmatprep.subr.bf16.mxu0 %v6963_v15  ;;  %2648 = vmatpush1.bf16.msra.mxu1 %v6958_v16  ;;  %v7056_v15 = vld [vmem:[%s10847_s1 + $0x64] ss:$40 sps:$4 sm:$0xff]   ;;  %v7054_v16 = vld [vmem:[%s10847_s1 + $0x60] ss:$40 sps:$4 sm:$0xff]  }
  0x59   : > { %2649 = vmatprep.subr.bf16.mxu1 %v6966_v17  ;;  %2476 = vmatprep.mubr.bf16.mxu0 %v7988_v20  ;;  %v7062_v17 = vld [vmem:[%s10847_s1 + $0xb4] ss:$40 sps:$4 sm:$0xff]  }
  0x5a   : > { %2622 = vmatprep.mubr.bf16.mxu1 %v7988_v20 }
  0x5b   : > { %2504 = vmatpush1.bf16.msra.mxu0 %v6961_v18  ;;  %v7141_v18 = vld [vmem:[%s10847_s1 + $0x18] ss:$40 sps:$4 sm:$0xff]  }
  0x5c   : > { %2505 = vmatprep.subr.bf16.mxu0 %v6969_v19  ;;  %2650 = vmatpush1.bf16.msra.mxu1 %v6964_v21  ;;  %v7143_v19 = vld [vmem:[%s10847_s1 + $0x1c] ss:$40 sps:$4 sm:$0xff]   ;;  %v7059_v21 = vld [vmem:[%s7868_s12 + $0x28] ss:$16 sps:$4 sm:$0xff]  }
  0x5d   : > { %2651 = vmatprep.subr.bf16.mxu1 %v6972_v22  ;;  %v7060_v22 = vld [vmem:[%s10847_s1 + $0xb0] ss:$40 sps:$4 sm:$0xff]  }
  0x5e   : > { %2477 = vmatmul.mubr.bf16.gmra.mrb[8].mxu0 %v7020_v23 }
  0x5f   : > { %2506 = vmatpush1.bf16.msra.mxu0 %v6967_v24  ;;  %2623 = vmatmul.mubr.bf16.gmra.mrb[8].mxu1 %v7020_v23  ;;  %v7066_v23 = vld [vmem:[%s7868_s12 + $0x4c] ss:$16 sps:$4 sm:$0xff]  }
  0x60   : > { %2507 = vmatprep.subr.bf16.mxu0 %v6975_v25  ;;  %2652 = vmatpush1.bf16.msra.mxu1 %v6970_v26  ;;  %v7149_v24 = vld [vmem:[%s10847_s1 + $0x6c] ss:$40 sps:$4 sm:$0xff]   ;;  %v7147_v26 = vld [vmem:[%s10847_s1 + $0x68] ss:$40 sps:$4 sm:$0xff]  }
  0x61   : > { %2486 = vmatprep.mubr.bf16.mxu0 %v7030_v29  ;;  %2653 = vmatprep.subr.bf16.mxu1 %v6978_v28  ;;  %v7065_v25 = vld [vmem:[%s10847_s1 + $0x104] ss:$40 sps:$4 sm:$0xff]   ;;  %v7063_v28 = vld [vmem:[%s10847_s1 + $0x100] ss:$40 sps:$4 sm:$0xff]  }
  0x62   : > { %2632 = vmatprep.mubr.bf16.mxu1 %v7030_v29  ;;  %v7071_v29 = vld [vmem:[%s10847_s1 + $0x154] ss:$40 sps:$4 sm:$0xff]  }
  0x63   : > { %2508 = vmatpush1.bf16.msra.mxu0 %v6973_v27  ;;  %v7155_v27 = vld [vmem:[%s10847_s1 + $0xbc] ss:$40 sps:$4 sm:$0xff]  }
  0x64   : > { %2509 = vmatprep.subr.bf16.mxu0 %v6981_v30  ;;  %2654 = vmatpush1.bf16.msra.mxu1 %v6976_v31  ;;  %v7153_v30 = vld [vmem:[%s10847_s1 + $0xb8] ss:$40 sps:$4 sm:$0xff]  }
  0x65   : > { %2655 = vmatprep.subr.bf16.mxu1 %v6984_v32  ;;  %v7068_v31 = vld [vmem:[%s7868_s12 + $0x48] ss:$16 sps:$4 sm:$0xff]   ;;  %v7161_v32 = vld [vmem:[%s10847_s1 + $0x10c] ss:$40 sps:$4 sm:$0xff]  }
  0x66   : > { %2487 = vmatmul.mubr.bf16.gmra.mrb[12].mxu0 %v7035_v33 }
  0x67   : > { %2510 = vmatpush1.bf16.msra.mxu0 %v6979_v34  ;;  %2633 = vmatmul.mubr.bf16.gmra.mrb[12].mxu1 %v7035_v33  ;;  %v7069_v33 = vld [vmem:[%s10847_s1 + $0x150] ss:$40 sps:$4 sm:$0xff]   ;;  %v7075_v34 = vld [vmem:[%s7868_s12 + $0x6c] ss:$16 sps:$4 sm:$0xff]  }
  0x68   : > { %2511 = vmatprep.subr.bf16.mxu0 %v6987_v36  ;;  %2656 = vmatpush1.bf16.msra.mxu1 %v6982_v35  ;;  %v7074_v35 = vld [vmem:[%s10847_s1 + $0x1a4] ss:$40 sps:$4 sm:$0xff]   ;;  %v7159_v36 = vld [vmem:[%s10847_s1 + $0x108] ss:$40 sps:$4 sm:$0xff]  }
  0x69   : > { %2529 = vmatprep.mubr.bf16.mxu0 %v7045_v38  ;;  %2657 = vmatprep.subr.bf16.mxu1 %v6990_v37  ;;  %v7167_v37 = vld [vmem:[%s10847_s1 + $0x15c] ss:$40 sps:$4 sm:$0xff]  }
  0x6a   : > { %2675 = vmatprep.mubr.bf16.mxu1 %v7045_v38  ;;  %v7072_v38 = vld [vmem:[%s10847_s1 + $0x1a0] ss:$40 sps:$4 sm:$0xff]  }
  0x6b   : > { %2512 = vmatpush1.bf16.msra.mxu0 %v6985_v39  ;;  %v7080_v39 = vld [vmem:[%s10847_s1 + $0x1f4] ss:$40 sps:$4 sm:$0xff]  }
  0x6c   : > { %2513 = vmatprep.subr.bf16.mxu0 %v6993_v40  ;;  %2658 = vmatpush1.bf16.msra.mxu1 %v6988_v41  ;;  %v7165_v40 = vld [vmem:[%s10847_s1 + $0x158] ss:$40 sps:$4 sm:$0xff]  }
  0x6d   : > { %2659 = vmatprep.subr.bf16.mxu1 %v6996_v42  ;;  %v7077_v41 = vld [vmem:[%s7868_s12 + $0x68] ss:$16 sps:$4 sm:$0xff]   ;;  %v7173_v42 = vld [vmem:[%s10847_s1 + $0x1ac] ss:$40 sps:$4 sm:$0xff]  }
  0x6f   : > { %2514 = vmatpush1.bf16.msra.mxu0 %v6991_v43  ;;  %v7078_v43 = vld [vmem:[%s10847_s1 + $0x1f0] ss:$40 sps:$4 sm:$0xff]  }
  0x70   : > { %2515 = vmatprep.subr.bf16.mxu0 %v6999_v44  ;;  %2660 = vmatpush1.bf16.msra.mxu1 %v6994_v45  ;;  %v7083_v44 = vld [vmem:[%s10847_s1 + $0x244] ss:$40 sps:$4 sm:$0xff]   ;;  %v7171_v45 = vld [vmem:[%s10847_s1 + $0x1a8] ss:$40 sps:$4 sm:$0xff]  }
  0x71   : > { %2661 = vmatprep.subr.bf16.mxu1 %v7004_v46  ;;  %v7176_v46 = vld [vmem:[%s10847_s1 + $0x1fc] ss:$40 sps:$4 sm:$0xff]  }
  0x73   : > { %2516 = vmatpush1.bf16.msra.mxu0 %v6997_v48  ;;  %v7081_v48 = vld [vmem:[%s10847_s1 + $0x240] ss:$40 sps:$4 sm:$0xff]  }
  0x74   : > { %2517 = vmatprep.subr.bf16.mxu0 %v7008_v49  ;;  %2662 = vmatpush1.bf16.msra.mxu1 %v7002_v50  ;;  %v7086_v49 = vld [vmem:[%s10847_s1 + $0x294] ss:$40 sps:$4 sm:$0xff]   ;;  %v7174_v50 = vld [vmem:[%s10847_s1 + $0x1f8] ss:$40 sps:$4 sm:$0xff]  }
  0x75   : > { %2663 = vmatprep.subr.bf16.mxu1 %v7011_v51  ;;  %v7179_v51 = vld [vmem:[%s10847_s1 + $0x24c] ss:$40 sps:$4 sm:$0xff]  }
  0x77   : > { %2518 = vmatpush1.bf16.msra.mxu0 %v7006_v52  ;;  %v7084_v52 = vld [vmem:[%s10847_s1 + $0x290] ss:$40 sps:$4 sm:$0xff]  }
  0x78   : > { %2519 = vmatprep.subr.bf16.mxu0 %v7014_v53  ;;  %2664 = vmatpush1.bf16.msra.mxu1 %v7009_v54  ;;  %v7089_v53 = vld [vmem:[%s10847_s1 + $0x2e4] ss:$40 sps:$4 sm:$0xff]  }
  0x79   : > { %2665 = vmatprep.subr.bf16.mxu1 %v7019_v55  ;;  %v7182_v54 = vld [vmem:[%s10847_s1 + $0x29c] ss:$40 sps:$4 sm:$0xff]   ;;  %v7087_v55 = vld [vmem:[%s10847_s1 + $0x2e0] ss:$40 sps:$4 sm:$0xff]  }
  0x7b   : > { %2520 = vmatpush1.bf16.msra.mxu0 %v7012_v56  ;;  %v7092_v56 = vld [vmem:[%s10847_s1 + $0x334] ss:$40 sps:$4 sm:$0xff]  }
  0x7c   : > { %2521 = vmatprep.subr.bf16.mxu0 %v7023_v57  ;;  %2666 = vmatpush1.bf16.msra.mxu1 %v7017_v58  ;;  %v7180_v57 = vld [vmem:[%s10847_s1 + $0x298] ss:$40 sps:$4 sm:$0xff]   ;;  %v7185_v58 = vld [vmem:[%s10847_s1 + $0x2ec] ss:$40 sps:$4 sm:$0xff]  }
  0x7d   : > { %2667 = vmatprep.subr.bf16.mxu1 %v7026_v59  ;;  %v7090_v59 = vld [vmem:[%s10847_s1 + $0x330] ss:$40 sps:$4 sm:$0xff]  }
  0x7f   : > { %2522 = vmatpush1.bf16.msra.mxu0 %v7021_v60  ;;  %v7095_v60 = vld [vmem:[%s10847_s1 + $0x384] ss:$40 sps:$4 sm:$0xff]  }
  0x80   : > { %2523 = vmatprep.subr.bf16.mxu0 %v7029_v61  ;;  %2668 = vmatpush1.bf16.msra.mxu1 %v7024_v62  ;;  %v7183_v61 = vld [vmem:[%s10847_s1 + $0x2e8] ss:$40 sps:$4 sm:$0xff]   ;;  %v7188_v62 = vld [vmem:[%s10847_s1 + $0x33c] ss:$40 sps:$4 sm:$0xff]  }
  0x81   : > { %2669 = vmatprep.subr.bf16.mxu1 %v7034_v63  ;;  %v7093_v63 = vld [vmem:[%s10847_s1 + $0x380] ss:$40 sps:$4 sm:$0xff]  }
  0x83   : > { %2524 = vmatpush1.bf16.msra.mxu0 %v7027_v0  ;;  %v7098_v0 = vld [vmem:[%s10847_s1 + $0x3d4] ss:$40 sps:$4 sm:$0xff]  }
  0x84   : > { %2525 = vmatprep.subr.bf16.mxu0 %v7038_v1  ;;  %2670 = vmatpush1.bf16.msra.mxu1 %v7032_v2  ;;  %v7186_v1 = vld [vmem:[%s10847_s1 + $0x338] ss:$40 sps:$4 sm:$0xff]   ;;  %v7191_v2 = vld [vmem:[%s10847_s1 + $0x38c] ss:$40 sps:$4 sm:$0xff]  }
  0x85   : > { %2671 = vmatprep.subr.bf16.mxu1 %v7041_v3  ;;  %v7096_v3 = vld [vmem:[%s10847_s1 + $0x3d0] ss:$40 sps:$4 sm:$0xff]  }
  0x87   : > { %2526 = vmatpush1.bf16.msra.mxu0 %v7036_v4  ;;  %v7101_v4 = vld [vmem:[%s10847_s1 + $0x424] ss:$40 sps:$4 sm:$0xff]  }
  0x88   : > { %2527 = vmatprep.subr.bf16.mxu0 %v7044_v5  ;;  %2672 = vmatpush1.bf16.msra.mxu1 %v7039_v6  ;;  %v7189_v5 = vld [vmem:[%s10847_s1 + $0x388] ss:$40 sps:$4 sm:$0xff]   ;;  %v7194_v6 = vld [vmem:[%s10847_s1 + $0x3dc] ss:$40 sps:$4 sm:$0xff]  }
  0x89   : > { %2673 = vmatprep.subr.bf16.mxu1 %v7049_v7  ;;  %v7099_v7 = vld [vmem:[%s10847_s1 + $0x420] ss:$40 sps:$4 sm:$0xff]  }
  0x8b   : > { %2528 = vmatpush1.bf16.msra.mxu0 %v7042_v8  ;;  %v7104_v8 = vld [vmem:[%s10847_s1 + $0x474] ss:$40 sps:$4 sm:$0xff]  }
  0x8c   : > { %2716 = vmatprep.subr.bf16.mxu0 %v7053_v9  ;;  %2674 = vmatpush1.bf16.msra.mxu1 %v7047_v10  ;;  %v7192_v9 = vld [vmem:[%s10847_s1 + $0x3d8] ss:$40 sps:$4 sm:$0xff]   ;;  %v7197_v10 = vld [vmem:[%s10847_s1 + $0x42c] ss:$40 sps:$4 sm:$0xff]  }
  0x8d   : > { %2862 = vmatprep.subr.bf16.mxu1 %v7143_v19  ;;  %v7203_v19 = vld [vmem:[%s10847_s1 + $0x4cc] ss:$40 sps:$4 sm:$0xff]  }
  0x8e   : > { %2530 = vmatmul.mubr.bf16.vlgmr.msra.gmra.mrb[0].mxu0 %v7050_v11 }
  0x8f   : > { %2717 = vmatpush1.bf16.msra.mxu0 %v7051_v13  ;;  %2539 = vmatprep.mubr.bf16.mxu0 %v7057_v14  ;;  %v7107_v13 = vld [vmem:[%s10847_s1 + $0x4c4] ss:$40 sps:$4 sm:$0xff]  }
  0x90   : > { %2676 = vmatmul.mubr.bf16.vlgmr.msra.gmra.mrb[0].mxu1 %v7050_v11  ;;  %2718 = vmatprep.subr.bf16.mxu0 %v7056_v15  ;;  %v7102_v11 = vld [vmem:[%s10847_s1 + $0x470] ss:$40 sps:$4 sm:$0xff]   ;;  %v7105_v15 = vld [vmem:[%s10847_s1 + $0x4c0] ss:$40 sps:$4 sm:$0xff]  }
  0x91   : > { %2685 = vmatprep.mubr.bf16.mxu1 %v7057_v14  ;;  %2863 = vmatpush1.bf16.msra.mxu1 %v7141_v18  ;;  %v7195_v14 = vld [vmem:[%s10847_s1 + $0x428] ss:$40 sps:$4 sm:$0xff]   ;;  %v7198_v18 = vld [vmem:[%s10847_s1 + $0x478] ss:$40 sps:$4 sm:$0xff]  }
  0x92   : > { %2864 = vmatprep.subr.bf16.mxu1 %v7149_v24  ;;  %v7206_v24 = vld [vmem:[%s10847_s1 + $0x51c] ss:$40 sps:$4 sm:$0xff]  }
  0x93   : > { %2719 = vmatpush1.bf16.msra.mxu0 %v7054_v16  ;;  %v7200_v16 = vld [vmem:[%s10847_s1 + $0x47c] ss:$40 sps:$4 sm:$0xff]  }
  0x94   : > { %2720 = vmatprep.subr.bf16.mxu0 %v7062_v17  ;;  %v7110_v17 = vld [vmem:[%s10847_s1 + $0x514] ss:$40 sps:$4 sm:$0xff]  }
  0x95   : > { %2865 = vmatpush1.bf16.msra.mxu1 %v7147_v26  ;;  %v8357_v26 = vld [vmem:[%s7868_s12] ss:$16 sps:$4 sm:$0xff]  }
  0x96   : > { %2540 = vmatmul.mubr.bf16.gmra.mrb[4].mxu0 %v7059_v21  ;;  %2866 = vmatprep.subr.bf16.mxu1 %v7155_v27  ;;  %v7116_v27 = vld [vmem:[%s10847_s1 + $0x5b4] ss:$40 sps:$4 sm:$0xff]  }
  0x97   : > { %2721 = vmatpush1.bf16.msra.mxu0 %v7060_v22  ;;  %2549 = vmatprep.mubr.bf16.mxu0 %v7066_v23  ;;  %v7113_v22 = vld [vmem:[%s10847_s1 + $0x564] ss:$40 sps:$4 sm:$0xff]  }
  0x98   : > { %2686 = vmatmul.mubr.bf16.gmra.mrb[4].mxu1 %v7059_v21  ;;  %2722 = vmatprep.subr.bf16.mxu0 %v7065_v25  ;;  %v7108_v21 = vld [vmem:[%s10847_s1 + $0x510] ss:$40 sps:$4 sm:$0xff]   ;;  %v7111_v25 = vld [vmem:[%s10847_s1 + $0x560] ss:$40 sps:$4 sm:$0xff]  }
  0x99   : > { %2695 = vmatprep.mubr.bf16.mxu1 %v7066_v23  ;;  %2867 = vmatpush1.bf16.msra.mxu1 %v7153_v30  ;;  %v7201_v23 = vld [vmem:[%s10847_s1 + $0x4c8] ss:$40 sps:$4 sm:$0xff]  }
  0x9a   : > { %2868 = vmatprep.subr.bf16.mxu1 %v7161_v32  ;;  %v7114_v30 = vld [vmem:[%s10847_s1 + $0x5b0] ss:$40 sps:$4 sm:$0xff]   ;;  %v7218_v32 = vld [vmem:[%s10847_s1 + $0x5bc] ss:$40 sps:$4 sm:$0xff]  }
  0x9b   : > { %2723 = vmatpush1.bf16.msra.mxu0 %v7063_v28  ;;  %v7204_v28 = vld [vmem:[%s10847_s1 + $0x518] ss:$40 sps:$4 sm:$0xff]  }
  0x9c   : > { %2724 = vmatprep.subr.bf16.mxu0 %v7071_v29  ;;  %v7212_v29 = vld [vmem:[%s10847_s1 + $0x56c] ss:$40 sps:$4 sm:$0xff]  }
  0x9d   : > { %2869 = vmatpush1.bf16.msra.mxu1 %v7159_v36  ;;  %v8394_v36 = vld [vmem:[%s7868_s12 + $0x20] ss:$16 sps:$4 sm:$0xff]  }
  0x9e   : > { %2550 = vmatmul.mubr.bf16.gmra.mrb[8].mxu0 %v7068_v31  ;;  %2870 = vmatprep.subr.bf16.mxu1 %v7167_v37  ;;  %v7216_v37 = vld [vmem:[%s10847_s1 + $0x5b8] ss:$40 sps:$4 sm:$0xff]  }
  0x9f   : > { %2725 = vmatpush1.bf16.msra.mxu0 %v7069_v33  ;;  %2559 = vmatprep.mubr.bf16.mxu0 %v7075_v34  ;;  %v7117_v33 = vld [vmem:[%s10847_s1 + $0x600] ss:$40 sps:$4 sm:$0xff]  }
  0xa0   : > { %2696 = vmatmul.mubr.bf16.gmra.mrb[8].mxu1 %v7068_v31  ;;  %2726 = vmatprep.subr.bf16.mxu0 %v7074_v35  ;;  %v7119_v31 = vld [vmem:[%s10847_s1 + $0x604] ss:$40 sps:$4 sm:$0xff]   ;;  %v7122_v35 = vld [vmem:[%s10847_s1 + $0x654] ss:$40 sps:$4 sm:$0xff]  }
  0xa1   : > { %2705 = vmatprep.mubr.bf16.mxu1 %v7075_v34  ;;  %2871 = vmatpush1.bf16.msra.mxu1 %v7165_v40  ;;  %v8387_v34 = vld [vmem:[%s7868_s12 + $0x24] ss:$16 sps:$4 sm:$0xff]   ;;  %v7222_v40 = vld [vmem:[%s10847_s1 + $0x608] ss:$40 sps:$4 sm:$0xff]  }
  0xa2   : > { %2872 = vmatprep.subr.bf16.mxu1 %v7173_v42  ;;  %v8418_v42 = vld [vmem:[%s7868_s12 + $0x44] ss:$16 sps:$4 sm:$0xff]  }
  0xa3   : > { %2727 = vmatpush1.bf16.msra.mxu0 %v7072_v38  ;;  %v7224_v38 = vld [vmem:[%s10847_s1 + $0x60c] ss:$40 sps:$4 sm:$0xff]  }
  0xa4   : > { %2728 = vmatprep.subr.bf16.mxu0 %v7080_v39  ;;  %v7120_v39 = vld [vmem:[%s10847_s1 + $0x650] ss:$40 sps:$4 sm:$0xff]  }
  0xa5   : > { %2873 = vmatpush1.bf16.msra.mxu1 %v7171_v45  ;;  %v8429_v45 = vld [vmem:[%s7868_s12 + $0x64] ss:$16 sps:$4 sm:$0xff]  }
  0xa6   : > { %2560 = vmatmul.mubr.bf16.gmra.mrb[12].mxu0 %v7077_v41  ;;  %2874 = vmatprep.subr.bf16.mxu1 %v7176_v46  ;;  %v7128_v46 = vld [vmem:[%s10847_s1 + $0x6f4] ss:$40 sps:$4 sm:$0xff]  }
  0xa7   : > { %2729 = vmatpush1.bf16.msra.mxu0 %v7078_v43  ;;  %2748 = vmatprep.mubr.bf16.mxu0 %v7877_v47  ;;  %v8422_v43 = vld [vmem:[%s7868_s12 + $0x40] ss:$16 sps:$4 sm:$0xff]  }
  0xa8   : > { %2706 = vmatmul.mubr.bf16.gmra.mrb[12].mxu1 %v7077_v41  ;;  %2730 = vmatprep.subr.bf16.mxu0 %v7083_v44  ;;  %v7230_v41 = vld [vmem:[%s10847_s1 + $0x65c] ss:$40 sps:$4 sm:$0xff]   ;;  %v7123_v44 = vld [vmem:[%s10847_s1 + $0x6a0] ss:$40 sps:$4 sm:$0xff]  }
  0xa9   : > { %2894 = vmatprep.mubr.bf16.mxu1 %v7877_v47  ;;  %2875 = vmatpush1.bf16.msra.mxu1 %v7174_v50  ;;  %v7177_v47 = vld [vmem:[%s10847_s1 + $0x248] ss:$40 sps:$4 sm:$0xff]  }
  0xaa   : > { %2876 = vmatprep.subr.bf16.mxu1 %v7179_v51  ;;  %v7126_v50 = vld [vmem:[%s10847_s1 + $0x6f0] ss:$40 sps:$4 sm:$0xff]   ;;  %v7131_v51 = vld [vmem:[%s10847_s1 + $0x744] ss:$40 sps:$4 sm:$0xff]  }
  0xab   : > { %2731 = vmatpush1.bf16.msra.mxu0 %v7081_v48  ;;  %v7228_v48 = vld [vmem:[%s10847_s1 + $0x658] ss:$40 sps:$4 sm:$0xff]  }
  0xac   : > { %2732 = vmatprep.subr.bf16.mxu0 %v7086_v49  ;;  %v7236_v49 = vld [vmem:[%s10847_s1 + $0x6ac] ss:$40 sps:$4 sm:$0xff]  }
  0xad   : > { %2877 = vmatpush1.bf16.msra.mxu1 %v7177_v47  ;;  %v7242_v47 = vld [vmem:[%s10847_s1 + $0x6fc] ss:$40 sps:$4 sm:$0xff]  }
  0xae   : > { %2878 = vmatprep.subr.bf16.mxu1 %v7182_v54  ;;  %v7129_v54 = vld [vmem:[%s10847_s1 + $0x740] ss:$40 sps:$4 sm:$0xff]  }
  0xaf   : > { %2733 = vmatpush1.bf16.msra.mxu0 %v7084_v52  ;;  %v7234_v52 = vld [vmem:[%s10847_s1 + $0x6a8] ss:$40 sps:$4 sm:$0xff]  }
  0xb0   : > { %2734 = vmatprep.subr.bf16.mxu0 %v7089_v53  ;;  %v8453_v53 = vld [vmem:[%s7868_s12 + $0x60] ss:$16 sps:$4 sm:$0xff]  }
  0xb1   : > { %2879 = vmatpush1.bf16.msra.mxu1 %v7180_v57  ;;  %v7240_v57 = vld [vmem:[%s10847_s1 + $0x6f8] ss:$40 sps:$4 sm:$0xff]  }
  0xb2   : > { %2880 = vmatprep.subr.bf16.mxu1 %v7185_v58  ;;  %v7248_v58 = vld [vmem:[%s10847_s1 + $0x74c] ss:$40 sps:$4 sm:$0xff]  }
  0xb3   : > { %2735 = vmatpush1.bf16.msra.mxu0 %v7087_v55  ;;  %v8463_v55 = vld [vmem:[%s7868_s12 + $0xc] ss:$16 sps:$4 sm:$0xff]  }
  0xb4   : > { %2736 = vmatprep.subr.bf16.mxu0 %v7092_v56  ;;  %v7134_v56 = vld [vmem:[%s10847_s1 + $0x794] ss:$40 sps:$4 sm:$0xff]  }
  0xb5   : > { %2881 = vmatpush1.bf16.msra.mxu1 %v7183_v61  ;;  %v7246_v61 = vld [vmem:[%s10847_s1 + $0x748] ss:$40 sps:$4 sm:$0xff]  }
  0xb6   : > { %2882 = vmatprep.subr.bf16.mxu1 %v7188_v62  ;;  %v7254_v62 = vld [vmem:[%s10847_s1 + $0x79c] ss:$40 sps:$4 sm:$0xff]  }
  0xb7   : > { %2737 = vmatpush1.bf16.msra.mxu0 %v7090_v59  ;;  %v7132_v59 = vld [vmem:[%s10847_s1 + $0x790] ss:$40 sps:$4 sm:$0xff]  }
  0xb8   : > { %2738 = vmatprep.subr.bf16.mxu0 %v7095_v60  ;;  %v7137_v60 = vld [vmem:[%s10847_s1 + $0x7e4] ss:$40 sps:$4 sm:$0xff]  }
  0xb9   : > { %2883 = vmatpush1.bf16.msra.mxu1 %v7186_v1  ;;  %v7138_v1 = vld [vmem:[%s10847_s1 + $0x830] ss:$40 sps:$4 sm:$0xff]  }
  0xba   : > { %2884 = vmatprep.subr.bf16.mxu1 %v7191_v2  ;;  %v7252_v2 = vld [vmem:[%s10847_s1 + $0x798] ss:$40 sps:$4 sm:$0xff]  }
  0xbb   : > { %2739 = vmatpush1.bf16.msra.mxu0 %v7093_v63  ;;  %v7135_v63 = vld [vmem:[%s10847_s1 + $0x7e0] ss:$40 sps:$4 sm:$0xff]  }
  0xbc   : > { %2740 = vmatprep.subr.bf16.mxu0 %v7098_v0  ;;  %v7140_v0 = vld [vmem:[%s10847_s1 + $0x834] ss:$40 sps:$4 sm:$0xff]  }
  0xbd   : > { %2885 = vmatpush1.bf16.msra.mxu1 %v7189_v5  ;;  %v7258_v5 = vld [vmem:[%s10847_s1 + $0x7e8] ss:$40 sps:$4 sm:$0xff]  }
  0xbe   : > { %2886 = vmatprep.subr.bf16.mxu1 %v7194_v6  ;;  %v7266_v6 = vld [vmem:[%s10847_s1 + $0x83c] ss:$40 sps:$4 sm:$0xff]  }
  0xbf   : > { %2741 = vmatpush1.bf16.msra.mxu0 %v7096_v3  ;;  %v7146_v3 = vld [vmem:[%s10847_s1 + $0x884] ss:$40 sps:$4 sm:$0xff]  }
  0xc0   : > { %2742 = vmatprep.subr.bf16.mxu0 %v7101_v4  ;;  %v7260_v4 = vld [vmem:[%s10847_s1 + $0x7ec] ss:$40 sps:$4 sm:$0xff]  }
  0xc1   : > { %2887 = vmatpush1.bf16.msra.mxu1 %v7192_v9  ;;  %v7264_v9 = vld [vmem:[%s10847_s1 + $0x838] ss:$40 sps:$4 sm:$0xff]  }
  0xc2   : > { %2888 = vmatprep.subr.bf16.mxu1 %v7197_v10  ;;  %v7272_v10 = vld [vmem:[%s10847_s1 + $0x88c] ss:$40 sps:$4 sm:$0xff]  }
  0xc3   : > { %2743 = vmatpush1.bf16.msra.mxu0 %v7099_v7  ;;  %v7144_v7 = vld [vmem:[%s10847_s1 + $0x880] ss:$40 sps:$4 sm:$0xff]  }
  0xc4   : > { %2744 = vmatprep.subr.bf16.mxu0 %v7104_v8  ;;  %v7152_v8 = vld [vmem:[%s10847_s1 + $0x8d4] ss:$40 sps:$4 sm:$0xff]  }
  0xc5   : > { %2889 = vmatpush1.bf16.msra.mxu1 %v7195_v14  ;;  %v7270_v14 = vld [vmem:[%s10847_s1 + $0x888] ss:$40 sps:$4 sm:$0xff]  }
  0xc6   : > { %2890 = vmatprep.subr.bf16.mxu1 %v7200_v16  ;;  %v7156_v16 = vld [vmem:[%s10847_s1 + $0x920] ss:$40 sps:$4 sm:$0xff]  }
  0xc7   : > { %2745 = vmatpush1.bf16.msra.mxu0 %v7102_v11  ;;  %v7150_v11 = vld [vmem:[%s10847_s1 + $0x8d0] ss:$40 sps:$4 sm:$0xff]  }
  0xc8   : > { %2746 = vmatprep.subr.bf16.mxu0 %v7107_v13  ;;  %v7158_v13 = vld [vmem:[%s10847_s1 + $0x924] ss:$40 sps:$4 sm:$0xff]  }
  0xc9   : > { %2891 = vmatpush1.bf16.msra.mxu1 %v7198_v18  ;;  %v7276_v18 = vld [vmem:[%s10847_s1 + $0x8d8] ss:$40 sps:$4 sm:$0xff]  }
  0xca   : > { %2892 = vmatprep.subr.bf16.mxu1 %v7203_v19  ;;  %v7284_v19 = vld [vmem:[%s10847_s1 + $0x92c] ss:$40 sps:$4 sm:$0xff]  }
  0xcb   : > { %2747 = vmatpush1.bf16.msra.mxu0 %v7105_v15  ;;  %v7278_v15 = vld [vmem:[%s10847_s1 + $0x8dc] ss:$40 sps:$4 sm:$0xff]  }
  0xcc   : > { %2789 = vmatprep.subr.bf16.mxu0 %v7110_v17  ;;  %v7164_v17 = vld [vmem:[%s10847_s1 + $0x974] ss:$40 sps:$4 sm:$0xff]  }
  0xcd   : > { %2893 = vmatpush1.bf16.msra.mxu1 %v7201_v23  ;;  %v7282_v23 = vld [vmem:[%s10847_s1 + $0x928] ss:$40 sps:$4 sm:$0xff]  }
  0xce   : > { %2749 = vmatmul.mubr.bf16.vlgmr.msra.gmra.mrb[16].mxu0 %v8357_v26  ;;  %2935 = vmatprep.subr.bf16.mxu1 %v7206_v24  ;;  %v7290_v24 = vld [vmem:[%s10847_s1 + $0x97c] ss:$40 sps:$4 sm:$0xff]  }
  0xcf   : > { %2790 = vmatpush1.bf16.msra.mxu0 %v7108_v21  ;;  %2758 = vmatprep.mubr.bf16.mxu0 %v7964_v12  ;;  %v7210_v12 = vld [vmem:[%s10847_s1 + $0x568] ss:$40 sps:$4 sm:$0xff]  }
  0xd0   : > { %2791 = vmatprep.subr.bf16.mxu0 %v7113_v22  ;;  %2895 = vmatmul.mubr.bf16.vlgmr.msra.gmra.mrb[16].mxu1 %v8357_v26  ;;  %v7162_v21 = vld [vmem:[%s10847_s1 + $0x970] ss:$40 sps:$4 sm:$0xff]   ;;  %v7170_v22 = vld [vmem:[%s10847_s1 + $0x9c4] ss:$40 sps:$4 sm:$0xff]  }
  0xd1   : > { %2936 = vmatpush1.bf16.msra.mxu1 %v7204_v28  ;;  %2904 = vmatprep.mubr.bf16.mxu1 %v8387_v34  ;;  %v7288_v28 = vld [vmem:[%s10847_s1 + $0x978] ss:$40 sps:$4 sm:$0xff]  }
  0xd2   : > { %2937 = vmatprep.subr.bf16.mxu1 %v7212_v29  ;;  %v7296_v29 = vld [vmem:[%s10847_s1 + $0x9cc] ss:$40 sps:$4 sm:$0xff]  }
  0xd3   : > { %2792 = vmatpush1.bf16.msra.mxu0 %v7111_v25  ;;  %v7168_v25 = vld [vmem:[%s10847_s1 + $0x9c0] ss:$40 sps:$4 sm:$0xff]  }
  0xd4   : > { %2793 = vmatprep.subr.bf16.mxu0 %v7116_v27  ;;  %v7209_v27 = vld [vmem:[%s10847_s1 + $0x24] ss:$40 sps:$4 sm:$0xff]  }
  0xd5   : > { %2938 = vmatpush1.bf16.msra.mxu1 %v7210_v12  ;;  %v7294_v12 = vld [vmem:[%s10847_s1 + $0x9c8] ss:$40 sps:$4 sm:$0xff]  }
  0xd6   : > { %2759 = vmatmul.mubr.bf16.gmra.mrb[20].mxu0 %v8394_v36  ;;  %2939 = vmatprep.subr.bf16.mxu1 %v7218_v32  ;;  %v7350_v32 = vld [vmem:[%s10848_s2 + $0x4] ss:$48 sps:$4 sm:$0xff]  }
  0xd7   : > { %2794 = vmatpush1.bf16.msra.mxu0 %v7114_v30  ;;  %2768 = vmatprep.mubr.bf16.mxu0 %v7988_v20  ;;  %v7125_v20 = vld [vmem:[%s10847_s1 + $0x6a4] ss:$40 sps:$4 sm:$0xff]   ;;  %v7207_v30 = vld [vmem:[%s10847_s1 + $0x20] ss:$40 sps:$4 sm:$0xff]  }
  0xd8   : > { %2795 = vmatprep.subr.bf16.mxu0 %v7119_v31  ;;  %2905 = vmatmul.mubr.bf16.gmra.mrb[20].mxu1 %v8394_v36  ;;  %v7215_v31 = vld [vmem:[%s10847_s1 + $0x74] ss:$40 sps:$4 sm:$0xff]  }
  0xd9   : > { %2940 = vmatpush1.bf16.msra.mxu1 %v7216_v37  ;;  %2914 = vmatprep.mubr.bf16.mxu1 %v8418_v42  ;;  %v7213_v37 = vld [vmem:[%s10847_s1 + $0x70] ss:$40 sps:$4 sm:$0xff]  }
  0xda   : > { %2941 = vmatprep.subr.bf16.mxu1 %v7224_v38  ;;  %v7221_v38 = vld [vmem:[%s10847_s1 + $0xc4] ss:$40 sps:$4 sm:$0xff]  }
  0xdb   : > { %2796 = vmatpush1.bf16.msra.mxu0 %v7117_v33  ;;  %v8586_v33 = vld [vmem:[%s7868_s12 + $0x8] ss:$16 sps:$4 sm:$0xff]  }
  0xdc   : > { %2797 = vmatprep.subr.bf16.mxu0 %v7122_v35  ;;  %v8590_v35 = vld [vmem:[%s7868_s12 + $0x2c] ss:$16 sps:$4 sm:$0xff]  }
  0xdd   : > { %2942 = vmatpush1.bf16.msra.mxu1 %v7222_v40  ;;  %v7219_v40 = vld [vmem:[%s10847_s1 + $0xc0] ss:$40 sps:$4 sm:$0xff]  }
  0xde   : > { %2769 = vmatmul.mubr.bf16.gmra.mrb[24].mxu0 %v8422_v43  ;;  %2943 = vmatprep.subr.bf16.mxu1 %v7230_v41  ;;  %v7227_v41 = vld [vmem:[%s10847_s1 + $0x114] ss:$40 sps:$4 sm:$0xff]  }
  0xdf   : > { %2798 = vmatpush1.bf16.msra.mxu0 %v7120_v39  ;;  %2778 = vmatprep.mubr.bf16.mxu0 %v8429_v45  ;;  %v7348_v39 = vld [vmem:[%s10848_s2] ss:$48 sps:$4 sm:$0xff]  }
  0xe0   : > { %2799 = vmatprep.subr.bf16.mxu0 %v7125_v20  ;;  %2915 = vmatmul.mubr.bf16.gmra.mrb[24].mxu1 %v8422_v43  ;;  %v7356_v20 = vld [vmem:[%s10848_s2 + $0x64] ss:$48 sps:$4 sm:$0xff]  }
  0xe1   : > { %2944 = vmatpush1.bf16.msra.mxu1 %v7228_v48  ;;  %2924 = vmatprep.mubr.bf16.mxu1 %v8429_v45  ;;  %v8620_v48 = vld [vmem:[%s7868_s12 + $0x28] ss:$16 sps:$4 sm:$0xff]  }
  0xe2   : > { %2945 = vmatprep.subr.bf16.mxu1 %v7236_v49  ;;  %v8624_v49 = vld [vmem:[%s7868_s12 + $0x4c] ss:$16 sps:$4 sm:$0xff]  }
  0xe3   : > { %2800 = vmatpush1.bf16.msra.mxu0 %v7123_v44  ;;  %v7354_v44 = vld [vmem:[%s10848_s2 + $0x60] ss:$48 sps:$4 sm:$0xff]  }
  0xe4   : > { %2801 = vmatprep.subr.bf16.mxu0 %v7128_v46  ;;  %v7362_v46 = vld [vmem:[%s10848_s2 + $0xc4] ss:$48 sps:$4 sm:$0xff]  }
  0xe5   : > { %2946 = vmatpush1.bf16.msra.mxu1 %v7234_v52  ;;  %v7360_v52 = vld [vmem:[%s10848_s2 + $0xc0] ss:$48 sps:$4 sm:$0xff]  }
  0xe6   : > { %2779 = vmatmul.mubr.bf16.gmra.mrb[28].mxu0 %v8453_v53  ;;  %2947 = vmatprep.subr.bf16.mxu1 %v7242_v47  ;;  %v7368_v47 = vld [vmem:[%s10848_s2 + $0x124] ss:$48 sps:$4 sm:$0xff]  }
  0xe7   : > { %2802 = vmatpush1.bf16.msra.mxu0 %v7126_v50  ;;  %2821 = vmatprep.mubr.bf16.mxu0 %v8463_v55  ;;  %v7225_v50 = vld [vmem:[%s10847_s1 + $0x110] ss:$40 sps:$4 sm:$0xff]  }
  0xe8   : > { %2803 = vmatprep.subr.bf16.mxu0 %v7131_v51  ;;  %2925 = vmatmul.mubr.bf16.gmra.mrb[28].mxu1 %v8453_v53  ;;  %v7233_v51 = vld [vmem:[%s10847_s1 + $0x164] ss:$40 sps:$4 sm:$0xff]  }
  0xe9   : > { %2948 = vmatpush1.bf16.msra.mxu1 %v7240_v57  ;;  %2967 = vmatprep.mubr.bf16.mxu1 %v8463_v55  ;;  %v7366_v57 = vld [vmem:[%s10848_s2 + $0x120] ss:$48 sps:$4 sm:$0xff]  }
  0xea   : > { %2949 = vmatprep.subr.bf16.mxu1 %v7248_v58  ;;  %v7374_v58 = vld [vmem:[%s10848_s2 + $0x184] ss:$48 sps:$4 sm:$0xff]  }
  0xeb   : > { %2804 = vmatpush1.bf16.msra.mxu0 %v7129_v54  ;;  %v7231_v54 = vld [vmem:[%s10847_s1 + $0x160] ss:$40 sps:$4 sm:$0xff]  }
  0xec   : > { %2805 = vmatprep.subr.bf16.mxu0 %v7134_v56  ;;  %v7239_v56 = vld [vmem:[%s10847_s1 + $0x1b4] ss:$40 sps:$4 sm:$0xff]  }
  0xed   : > { %2950 = vmatpush1.bf16.msra.mxu1 %v7246_v61  ;;  %v7237_v61 = vld [vmem:[%s10847_s1 + $0x1b0] ss:$40 sps:$4 sm:$0xff]  }
  0xee   : > { %2951 = vmatprep.subr.bf16.mxu1 %v7254_v62  ;;  %v7245_v62 = vld [vmem:[%s10847_s1 + $0x204] ss:$40 sps:$4 sm:$0xff]  }
  0xef   : > { %2806 = vmatpush1.bf16.msra.mxu0 %v7132_v59  ;;  %v8654_v59 = vld [vmem:[%s7868_s12 + $0x48] ss:$16 sps:$4 sm:$0xff]  }
  0xf0   : > { %2807 = vmatprep.subr.bf16.mxu0 %v7137_v60  ;;  %v8658_v60 = vld [vmem:[%s7868_s12 + $0x6c] ss:$16 sps:$4 sm:$0xff]  }
  0xf1   : > { %2952 = vmatpush1.bf16.msra.mxu1 %v7252_v2  ;;  %v7251_v2 = vld [vmem:[%s10847_s1 + $0x254] ss:$40 sps:$4 sm:$0xff]  }
  0xf2   : > { %2953 = vmatprep.subr.bf16.mxu1 %v7260_v4  ;;  %v7386_v4 = vld [vmem:[%s10848_s2 + $0x244] ss:$48 sps:$4 sm:$0xff]  }
  0xf3   : > { %2808 = vmatpush1.bf16.msra.mxu0 %v7135_v63  ;;  %v7372_v63 = vld [vmem:[%s10848_s2 + $0x180] ss:$48 sps:$4 sm:$0xff]  }
  0xf4   : > { %2809 = vmatprep.subr.bf16.mxu0 %v7140_v0  ;;  %v7380_v0 = vld [vmem:[%s10848_s2 + $0x1e4] ss:$48 sps:$4 sm:$0xff]  }
  0xf5   : > { %2954 = vmatpush1.bf16.msra.mxu1 %v7258_v5  ;;  %v8688_v5 = vld [vmem:[%s7868_s12 + $0x68] ss:$16 sps:$4 sm:$0xff]  }
  0xf6   : > { %2955 = vmatprep.subr.bf16.mxu1 %v7266_v6  ;;  %v7249_v6 = vld [vmem:[%s10847_s1 + $0x250] ss:$40 sps:$4 sm:$0xff]  }
  0xf7   : > { %2810 = vmatpush1.bf16.msra.mxu0 %v7138_v1  ;;  %v7243_v1 = vld [vmem:[%s10847_s1 + $0x200] ss:$40 sps:$4 sm:$0xff]  }
  0xf8   : > { %2811 = vmatprep.subr.bf16.mxu0 %v7146_v3  ;;  %v7378_v3 = vld [vmem:[%s10848_s2 + $0x1e0] ss:$48 sps:$4 sm:$0xff]  }
  0xf9   : > { %2956 = vmatpush1.bf16.msra.mxu1 %v7264_v9  ;;  %v7384_v9 = vld [vmem:[%s10848_s2 + $0x240] ss:$48 sps:$4 sm:$0xff]  }
  0xfa   : > { %2957 = vmatprep.subr.bf16.mxu1 %v7272_v10  ;;  %v7392_v10 = vld [vmem:[%s10848_s2 + $0x2a4] ss:$48 sps:$4 sm:$0xff]  }
  0xfb   : > { %2812 = vmatpush1.bf16.msra.mxu0 %v7144_v7  ;;  %v7257_v7 = vld [vmem:[%s10847_s1 + $0x2a4] ss:$40 sps:$4 sm:$0xff]  }
  0xfc   : > { %2813 = vmatprep.subr.bf16.mxu0 %v7152_v8  ;;  %v7667_v8 = vld [vmem:[%s7868_s12 + $0x4] ss:$16 sps:$4 sm:$0xff]  }
  0xfd   : > { %2958 = vmatpush1.bf16.msra.mxu1 %v7270_v14  ;;  %v7390_v14 = vld [vmem:[%s10848_s2 + $0x2a0] ss:$48 sps:$4 sm:$0xff]  }
  0xfe   : > { %2959 = vmatprep.subr.bf16.mxu1 %v7278_v15  ;;  %v7398_v15 = vld [vmem:[%s10848_s2 + $0x304] ss:$48 sps:$4 sm:$0xff]  }
  0xff   : > { %2814 = vmatpush1.bf16.msra.mxu0 %v7150_v11  ;;  %v7255_v11 = vld [vmem:[%s10847_s1 + $0x2a0] ss:$40 sps:$4 sm:$0xff]  }
 0x100   : > { %2815 = vmatprep.subr.bf16.mxu0 %v7158_v13  ;;  %v7263_v13 = vld [vmem:[%s10847_s1 + $0x2f4] ss:$40 sps:$4 sm:$0xff]  }
 0x101   : > { %2960 = vmatpush1.bf16.msra.mxu1 %v7276_v18  ;;  %v7396_v18 = vld [vmem:[%s10848_s2 + $0x300] ss:$48 sps:$4 sm:$0xff]  }
 0x102   : > { %2961 = vmatprep.subr.bf16.mxu1 %v7284_v19  ;;  %v7404_v19 = vld [vmem:[%s10848_s2 + $0x364] ss:$48 sps:$4 sm:$0xff]  }
 0x103   : > { %2816 = vmatpush1.bf16.msra.mxu0 %v7156_v16  ;;  %v7261_v16 = vld [vmem:[%s10847_s1 + $0x2f0] ss:$40 sps:$4 sm:$0xff]  }
 0x104   : > { %2817 = vmatprep.subr.bf16.mxu0 %v7164_v17  ;;  %v7269_v17 = vld [vmem:[%s10847_s1 + $0x344] ss:$40 sps:$4 sm:$0xff]  }
 0x105   : > { %2962 = vmatpush1.bf16.msra.mxu1 %v7282_v23  ;;  %v7402_v23 = vld [vmem:[%s10848_s2 + $0x360] ss:$48 sps:$4 sm:$0xff]  }
 0x106   : > { %2963 = vmatprep.subr.bf16.mxu1 %v7290_v24  ;;  %v7273_v24 = vld [vmem:[%s10847_s1 + $0x390] ss:$40 sps:$4 sm:$0xff]  }
 0x107   : > { %2818 = vmatpush1.bf16.msra.mxu0 %v7162_v21  ;;  %v7267_v21 = vld [vmem:[%s10847_s1 + $0x340] ss:$40 sps:$4 sm:$0xff]  }
 0x108   : > { %2819 = vmatprep.subr.bf16.mxu0 %v7170_v22  ;;  %v7275_v22 = vld [vmem:[%s10847_s1 + $0x394] ss:$40 sps:$4 sm:$0xff]  }
 0x109   : > { %2964 = vmatpush1.bf16.msra.mxu1 %v7288_v28  ;;  %v7287_v28 = vld [vmem:[%s10847_s1 + $0x434] ss:$40 sps:$4 sm:$0xff]  }
 0x10a   : > { %2965 = vmatprep.subr.bf16.mxu1 %v7296_v29  ;;  %v7285_v29 = vld [vmem:[%s10847_s1 + $0x430] ss:$40 sps:$4 sm:$0xff]  }
 0x10b   : > { %2820 = vmatpush1.bf16.msra.mxu0 %v7168_v25  ;;  %v7281_v25 = vld [vmem:[%s10847_s1 + $0x3e4] ss:$40 sps:$4 sm:$0xff]  }
 0x10c   : > { %3008 = vmatprep.subr.bf16.mxu0 %v7209_v27  ;;  %v7279_v27 = vld [vmem:[%s10847_s1 + $0x3e0] ss:$40 sps:$4 sm:$0xff]  }
 0x10d   : > { %2966 = vmatpush1.bf16.msra.mxu1 %v7294_v12  ;;  %v7299_v12 = vld [vmem:[%s10847_s1 + $0x4d4] ss:$40 sps:$4 sm:$0xff]  }
 0x10e   : > { %2822 = vmatmul.mubr.bf16.vlgmr.msra.gmra.mrb[16].mxu0 %v8586_v33  ;;  %4562 = vmatprep.subr.bf16.mxu1 %v7350_v32  ;;  %v7297_v32 = vld [vmem:[%s10847_s1 + $0x4d0] ss:$40 sps:$4 sm:$0xff]  }
 0x10f   : > { %2831 = vmatprep.mubr.bf16.mxu0 %v8590_v35  ;;  %3009 = vmatpush1.bf16.msra.mxu0 %v7207_v30  ;;  %v7293_v30 = vld [vmem:[%s10847_s1 + $0x484] ss:$40 sps:$4 sm:$0xff]  }
 0x110   : > { %3010 = vmatprep.subr.bf16.mxu0 %v7215_v31  ;;  %2968 = vmatmul.mubr.bf16.vlgmr.msra.gmra.mrb[16].mxu1 %v8586_v33  ;;  %v7291_v31 = vld [vmem:[%s10847_s1 + $0x480] ss:$40 sps:$4 sm:$0xff]  }
 0x111   : > { %2977 = vmatprep.mubr.bf16.mxu1 %v8590_v35  ;;  %4563 = vmatpush1.bf16.msra.mxu1 %v7348_v39  ;;  %v7305_v39 = vld [vmem:[%s10847_s1 + $0x574] ss:$40 sps:$4 sm:$0xff]  }
 0x112   : > { %4564 = vmatprep.subr.bf16.mxu1 %v7356_v20  ;;  %v7303_v20 = vld [vmem:[%s10847_s1 + $0x570] ss:$40 sps:$4 sm:$0xff]  }
 0x113   : > { %3011 = vmatpush1.bf16.msra.mxu0 %v7213_v37  ;;  %v7302_v37 = vld [vmem:[%s10847_s1 + $0x524] ss:$40 sps:$4 sm:$0xff]  }
 0x114   : > { %3012 = vmatprep.subr.bf16.mxu0 %v7221_v38  ;;  %v7300_v38 = vld [vmem:[%s10847_s1 + $0x520] ss:$40 sps:$4 sm:$0xff]  }
 0x115   : > { %4565 = vmatpush1.bf16.msra.mxu1 %v7354_v44  ;;  %v7314_v44 = vld [vmem:[%s10847_s1 + $0x664] ss:$40 sps:$4 sm:$0xff]  }
 0x116   : > { %2832 = vmatmul.mubr.bf16.gmra.mrb[20].mxu0 %v8620_v48  ;;  %4566 = vmatprep.subr.bf16.mxu1 %v7362_v46  ;;  %v303_v46 = vlaneseq }
 0x117   : > { %2841 = vmatprep.mubr.bf16.mxu0 %v8624_v49  ;;  %3013 = vmatpush1.bf16.msra.mxu0 %v7219_v40  ;;  %v7308_v40 = vld [vmem:[%s10847_s1 + $0x5c4] ss:$40 sps:$4 sm:$0xff]  }
 0x118   : > { %3014 = vmatprep.subr.bf16.mxu0 %v7227_v41  ;;  %2978 = vmatmul.mubr.bf16.gmra.mrb[20].mxu1 %v8620_v48  ;;  %v7306_v41 = vld [vmem:[%s10847_s1 + $0x5c0] ss:$40 sps:$4 sm:$0xff]  }
 0x119   : > { %2987 = vmatprep.mubr.bf16.mxu1 %v8624_v49  ;;  %4567 = vmatpush1.bf16.msra.mxu1 %v7360_v52  ;;  %v7320_v52 = vld [vmem:[%s10847_s1 + $0x704] ss:$40 sps:$4 sm:$0xff]  }
 0x11a   : > { %4568 = vmatprep.subr.bf16.mxu1 %v7368_v47  ;;  %v7410_v47 = vld [vmem:[%s10848_s2 + $0x3c4] ss:$48 sps:$4 sm:$0xff]  }
 0x11b   : > { %3015 = vmatpush1.bf16.msra.mxu0 %v7225_v50  ;;  %v7312_v50 = vld [vmem:[%s10847_s1 + $0x660] ss:$40 sps:$4 sm:$0xff]  }
 0x11c   : > { %3016 = vmatprep.subr.bf16.mxu0 %v7233_v51  ;;  %v8803_v51 = vshrl.u32 %v303_v46, 7 }
 0x11d   : > { %4569 = vmatpush1.bf16.msra.mxu1 %v7366_v57 }
 0x11e   : > { %2842 = vmatmul.mubr.bf16.gmra.mrb[24].mxu0 %v8654_v59  ;;  %4570 = vmatprep.subr.bf16.mxu1 %v7374_v58  ;;  %v306_v57 = vadd.s32 16, %v8803_v51  ;;  %vm3170_vm0 = vcmp.lt.s32.totalorder %v8803_v51, 1  ;;  %vm3235_vm5 = vcmp.lt.s32.totalorder %v8803_v51, 7 }
 0x11f   : > { %2851 = vmatprep.mubr.bf16.mxu0 %v8658_v60  ;;  %3017 = vmatpush1.bf16.msra.mxu0 %v7231_v54 }
 0x120   : > { %3018 = vmatprep.subr.bf16.mxu0 %v7239_v56  ;;  %2988 = vmatmul.mubr.bf16.gmra.mrb[24].mxu1 %v8654_v59 }
 0x121   : > { %2997 = vmatprep.mubr.bf16.mxu1 %v8658_v60  ;;  %4571 = vmatpush1.bf16.msra.mxu1 %v7372_v63 }
 0x122   : > { %4572 = vmatprep.subr.bf16.mxu1 %v7380_v0 }
 0x123   : > { %3019 = vmatpush1.bf16.msra.mxu0 %v7237_v61  ;;  %v7318_v61 = vld [vmem:[%s10847_s1 + $0x700] ss:$40 sps:$4 sm:$0xff]  }
 0x124   : > { %3020 = vmatprep.subr.bf16.mxu0 %v7245_v62 }
 0x125   : > { %4573 = vmatpush1.bf16.msra.mxu1 %v7378_v3 }
 0x126   : > { %2852 = vmatmul.mubr.bf16.gmra.mrb[28].mxu0 %v8688_v5  ;;  %4574 = vmatprep.subr.bf16.mxu1 %v7386_v4 }
 0x127   : > { %3021 = vmatpush1.bf16.msra.mxu0 %v7243_v1  ;;  %3040 = vmatprep.mubr.bf16.mxu0 %v7667_v8 }
 0x128   : > { %3022 = vmatprep.subr.bf16.mxu0 %v7251_v2  ;;  %2998 = vmatmul.mubr.bf16.gmra.mrb[28].mxu1 %v8688_v5  ;;  %v7323_v2 = vld [vmem:[%s10847_s1 + $0x754] ss:$40 sps:$4 sm:$0xff]  }
 0x129   : > { %4575 = vmatpush1.bf16.msra.mxu1 %v7384_v9  ;;  %v330_v9 = vand.u32 15, %v306_v57  ;;  %v7332_v57 = vld [vmem:[%s10847_s1 + $0x844] ss:$40 sps:$4 sm:$0xff]  }
 0x12a   : > { %4576 = vmatprep.subr.bf16.mxu1 %v7392_v10  ;;  %v7414_v10 = vld [vmem:[%s10848_s2 + $0x420] ss:$48 sps:$4 sm:$0xff]  }
 0x12b   : > { %3023 = vmatpush1.bf16.msra.mxu0 %v7249_v6  ;;  %vm8868_vm1 = vcmp.ne.s32.totalorder %v330_v9, 0 }
 0x12c   : > { %3024 = vmatprep.subr.bf16.mxu0 %v7257_v7 }
 0x12d   : > { %4577 = vmatpush1.bf16.msra.mxu1 %v7390_v14 }
 0x12e   : > { %4578 = vmatprep.subr.bf16.mxu1 %v7398_v15 }
 0x12f   : > { %3025 = vmatpush1.bf16.msra.mxu0 %v7255_v11  ;;  %v7416_v11 = vld [vmem:[%s10848_s2 + $0x424] ss:$48 sps:$4 sm:$0xff]  }
 0x130   : > { %3026 = vmatprep.subr.bf16.mxu0 %v7263_v13 }
 0x131   : > { %4579 = vmatpush1.bf16.msra.mxu1 %v7396_v18 }
 0x132   : > { %4580 = vmatprep.subr.bf16.mxu1 %v7404_v19  ;;  %v7420_v19 = vld [vmem:[%s10848_s2 + $0x480] ss:$48 sps:$4 sm:$0xff]  }
 0x133   : > { %3027 = vmatpush1.bf16.msra.mxu0 %v7261_v16  ;;  %v7326_v16 = vld [vmem:[%s10847_s1 + $0x7a4] ss:$40 sps:$4 sm:$0xff]  }
 0x134   : > { %3028 = vmatprep.subr.bf16.mxu0 %v7269_v17  ;;  %v7422_v17 = vld [vmem:[%s10848_s2 + $0x484] ss:$48 sps:$4 sm:$0xff]  }
 0x135   : > { %4581 = vmatpush1.bf16.msra.mxu1 %v7402_v23  ;;  %v308_v23 = vadd.s32 32, %v8803_v51 }
 0x136   : > { %4582 = vmatprep.subr.bf16.mxu1 %v7410_v47  ;;  %v7327_v47 = vld [vmem:[%s10847_s1 + $0x7f0] ss:$40 sps:$4 sm:$0xff]  }
 0x137   : > { %3029 = vmatpush1.bf16.msra.mxu0 %v7267_v21 }
 0x138   : > { %3030 = vmatprep.subr.bf16.mxu0 %v7275_v22 }
 0x13b   : > { %3031 = vmatpush1.bf16.msra.mxu0 %v7273_v24  ;;  %v7324_v24 = vld [vmem:[%s10847_s1 + $0x7a0] ss:$40 sps:$4 sm:$0xff]  }
 0x13c   : > { %3032 = vmatprep.subr.bf16.mxu0 %v7281_v25 }
 0x13f   : > { %3033 = vmatpush1.bf16.msra.mxu0 %v7279_v27 }
 0x140   : > { %3034 = vmatprep.subr.bf16.mxu0 %v7287_v28 }
 0x143   : > { %3035 = vmatpush1.bf16.msra.mxu0 %v7285_v29  ;;  %v7329_v29 = vld [vmem:[%s10847_s1 + $0x7f4] ss:$40 sps:$4 sm:$0xff]  }
 0x144   : > { %3036 = vmatprep.subr.bf16.mxu0 %v7293_v30 }
 0x147   : > { %3037 = vmatpush1.bf16.msra.mxu0 %v7291_v31 }
 0x148   : > { %3038 = vmatprep.subr.bf16.mxu0 %v7299_v12 }
 0x14b   : > { %3039 = vmatpush1.bf16.msra.mxu0 %v7297_v32 }
 0x14c   : > { %3081 = vmatprep.subr.bf16.mxu0 %v7302_v37  ;;  %v7428_v37 = vld [vmem:[%s10848_s2 + $0x4e4] ss:$48 sps:$4 sm:$0xff]  }
 0x14e   : > { %3041 = vmatmul.mubr.bf16.vlgmr.msra.gmra.mrb[32].mxu0 %v8357_v26  ;;  %v7311_v26 = vld [vmem:[%s10847_s1 + $0x614] ss:$40 sps:$4 sm:$0xff]  }
 0x14f   : > { %3082 = vmatpush1.bf16.msra.mxu0 %v7300_v38  ;;  %3050 = vmatprep.mubr.bf16.mxu0 %v8387_v34  ;;  %v7309_v34 = vld [vmem:[%s10847_s1 + $0x610] ss:$40 sps:$4 sm:$0xff]  }
 0x150   : > { %3083 = vmatprep.subr.bf16.mxu0 %v7305_v39 }
 0x153   : > { %3084 = vmatpush1.bf16.msra.mxu0 %v7303_v20 }
 0x154   : > { %3085 = vmatprep.subr.bf16.mxu0 %v7308_v40 }
 0x156   : > { %3051 = vmatmul.mubr.bf16.gmra.mrb[36].mxu0 %v8394_v36  ;;  %v7317_v36 = vld [vmem:[%s10847_s1 + $0x6b4] ss:$40 sps:$4 sm:$0xff]  }
 0x157   : > { %3086 = vmatpush1.bf16.msra.mxu0 %v7306_v41  ;;  %3060 = vmatprep.mubr.bf16.mxu0 %v8418_v42  ;;  %v7315_v42 = vld [vmem:[%s10847_s1 + $0x6b0] ss:$40 sps:$4 sm:$0xff]  }
 0x158   : > { %3087 = vmatprep.subr.bf16.mxu0 %v7311_v26  ;;  %v7426_v41 = vld [vmem:[%s10848_s2 + $0x4e0] ss:$48 sps:$4 sm:$0xff]  }
 0x15b   : > { %3088 = vmatpush1.bf16.msra.mxu0 %v7309_v34 }
 0x15c   : > { %3089 = vmatprep.subr.bf16.mxu0 %v7314_v44 }
 0x15e   : > { %3061 = vmatmul.mubr.bf16.gmra.mrb[40].mxu0 %v8422_v43  ;;  %v7408_v43 = vld [vmem:[%s10848_s2 + $0x3c0] ss:$48 sps:$4 sm:$0xff]  }
 0x15f   : > { %3090 = vmatpush1.bf16.msra.mxu0 %v7312_v50  ;;  %3070 = vmatprep.mubr.bf16.mxu0 %v8429_v45  ;;  %v344_v50 = vand.u32 15, %v308_v23  ;;  %v7440_v23 = vld [vmem:[%s10848_s2 + $0x5a4] ss:$48 sps:$4 sm:$0xff]  }
 0x160   : > { %3091 = vmatprep.subr.bf16.mxu0 %v7317_v36  ;;  %4583 = vmatpush1.bf16.msra.mxu1 %v7408_v43 }
 0x161   : > { %v8815_v54 = vpop.f32.mrb[0].mxu0  ;;  %4584 = vmatprep.subr.bf16.mxu1 %v7416_v11  ;;  %vm8917_vm2 = vcmp.ne.s32.totalorder %v344_v50, 0 }
 0x162   : > { %v8820_v56 = vpop.f32.mrb[1].mxu0  ;;  %v3154_v62 = vrot.slane %v8815_v54, 7 }
 0x163   : > { %v2535_v45 = vpop.f32.mrb[2].mxu0  ;;  %v8823_v58 = vpop.f32.mrb[0].mxu1  ;;  %3092 = vmatpush1.bf16.msra.mxu0 %v7315_v42  ;;  %v3155_v3 = vrot.slane %v8820_v56, 7 }
 0x164   : > { %v3156_v63 = vrot.slane %v2535_v45, 7  ;;  %v2537_v0 = vpop.f32.mrb[3].mxu0  ;;  %v8830_v1 = vpop.f32.mrb[1].mxu1  ;;  %3093 = vmatprep.subr.bf16.mxu0 %v7320_v52  ;;  %4585 = vmatpush1.bf16.msra.mxu1 %v7414_v10  ;;  %v7434_v45 = vld [vmem:[%s10848_s2 + $0x544] ss:$48 sps:$4 sm:$0xff]  }
 0x165   : > { %v3157_v4 = vrot.slane %v2537_v0, 7  ;;  %v2681_v6 = vpop.f32.mrb[2].mxu1  ;;  %4586 = vmatprep.subr.bf16.mxu1 %v7422_v17  ;;  %v7330_v10 = vld [vmem:[%s10847_s1 + $0x840] ss:$40 sps:$4 sm:$0xff]   ;;  %v7335_v17 = vld [vmem:[%s10847_s1 + $0x894] ss:$40 sps:$4 sm:$0xff]  }
 0x166   : > { %v3183_v7 = vsel %vm3170_vm0, %v3154_v62, %v3156_v63  ;;  %v2683_v8 = vpop.f32.mrb[3].mxu1  ;;  %3071 = vmatmul.mubr.bf16.gmra.mrb[44].mxu0 %v8453_v53  ;;  %v7321_v53 = vld [vmem:[%s10847_s1 + $0x750] ss:$40 sps:$4 sm:$0xff]  }
 0x167   : > { %v8847_v13 = vadd.f32 %v3183_v7, %v2681_v6  ;;  %v3184_v14 = vsel %vm3170_vm0, %v3155_v3, %v3157_v4  ;;  %3094 = vmatpush1.bf16.msra.mxu0 %v7318_v61  ;;  %3113 = vmatprep.mubr.bf16.mxu0 %v8463_v55  ;;  %v310_v6 = vadd.s32 48, %v8803_v51 }
 0x168   : > { %v8857_v15 = vadd.f32 %v3184_v14, %v2683_v8  ;;  %3095 = vmatprep.subr.bf16.mxu0 %v7323_v2  ;;  %4587 = vmatpush1.bf16.msra.mxu1 %v7420_v19 }
 0x169   : > { %v2541_v18 = vpop.f32.mrb[4].mxu0  ;;  %4588 = vmatprep.subr.bf16.mxu1 %v7428_v37  ;;  %v7333_v37 = vld [vmem:[%s10847_s1 + $0x890] ss:$40 sps:$4 sm:$0xff]  }
 0x16a   : > { %v3158_v21 = vrot.slane %v2541_v18, 7  ;;  %v2543_v55 = vpop.f32.mrb[5].mxu0 }
 0x16b   : > { %v3159_v25 = vrot.slane %v2543_v55, 7  ;;  %v2545_v27 = vpop.f32.mrb[6].mxu0  ;;  %v2687_v28 = vpop.f32.mrb[4].mxu1  ;;  %3096 = vmatpush1.bf16.msra.mxu0 %v7321_v53 }
 0x16c   : > { %v3160_v30 = vrot.slane %v2545_v27, 7  ;;  %v2547_v31 = vpop.f32.mrb[7].mxu0  ;;  %v3181_v12 = vsel %vm3170_vm0, %v3156_v63, %v3158_v21  ;;  %v2689_v32 = vpop.f32.mrb[5].mxu1  ;;  %3097 = vmatprep.subr.bf16.mxu0 %v7326_v16  ;;  %4589 = vmatpush1.bf16.msra.mxu1 %v7426_v41  ;;  %v7432_v63 = vld [vmem:[%s10848_s2 + $0x540] ss:$48 sps:$4 sm:$0xff]  }
 0x16d   : > { %v3161_v38 = vrot.slane %v2547_v31, 7  ;;  %v3207_v39 = vsel %vm8868_vm1, %v3181_v12, 0.0  ;;  %v3182_v20 = vsel %vm3170_vm0, %v3157_v4, %v3159_v25  ;;  %v2691_v40 = vpop.f32.mrb[6].mxu1  ;;  %4590 = vmatprep.subr.bf16.mxu1 %v7434_v45  ;;  %v7446_v41 = vld [vmem:[%s10848_s2 + $0xc] ss:$48 sps:$4 sm:$0xff]  }
 0x16e   : > { %v8891_v26 = vadd.f32 %v3207_v39, %v2687_v28  ;;  %v3208_v34 = vsel %vm8868_vm1, %v3182_v20, 0.0  ;;  %v3179_v44 = vsel %vm3170_vm0, %v3158_v21, %v3160_v30  ;;  %v2693_v46 = vpop.f32.mrb[7].mxu1  ;;  %v316_v39 = vand.u32 15, %v8803_v51  ;;  %v7338_v20 = vld [vmem:[%s10847_s1 + $0x8e4] ss:$40 sps:$4 sm:$0xff]  }
 0x16f   : > { %v8897_v36 = vadd.f32 %v3208_v34, %v2689_v32  ;;  %v8899_v42 = vadd.f32 %v3179_v44, %v2691_v40  ;;  %v3180_v52 = vsel %vm3170_vm0, %v3159_v25, %v3161_v38  ;;  %3098 = vmatpush1.bf16.msra.mxu0 %v7324_v24 }
 0x170   : > { %v8906_v43 = vadd.f32 %v3180_v52, %v2693_v46  ;;  %3099 = vmatprep.subr.bf16.mxu0 %v7329_v29  ;;  %4591 = vmatpush1.bf16.msra.mxu1 %v7432_v63  ;;  %v358_v29 = vand.u32 15, %v310_v6  ;;  %vm8971_vm4 = vcmp.ne.s32.totalorder %v316_v39, 0  ;;  %v7341_v6 = vld [vmem:[%s10847_s1 + $0x934] ss:$40 sps:$4 sm:$0xff]  }
 0x171   : > { %v2551_v61 = vpop.f32.mrb[8].mxu0  ;;  %4592 = vmatprep.subr.bf16.mxu1 %v7440_v23  ;;  %v7365_v39 = vld [vmem:[%s10848_s2 + $0xd4] ss:$48 sps:$4 sm:$0xff]  }
 0x172   : > { %v3162_v0 = vrot.slane %v2551_v61, 7  ;;  %v2553_v2 = vpop.f32.mrb[9].mxu0  ;;  %vm8964_vm3 = vcmp.ne.s32.totalorder %v358_v29, 0  ;;  %v7345_v29 = vld [vmem:[%s10847_s1 + $0x9d0] ss:$40 sps:$4 sm:$0xff]  }
 0x173   : > { %v3163_v7 = vrot.slane %v2553_v2, 7  ;;  %v2555_v8 = vpop.f32.mrb[10].mxu0  ;;  %v2697_v9 = vpop.f32.mrb[8].mxu1  ;;  %3100 = vmatpush1.bf16.msra.mxu0 %v7327_v47 }
 0x174   : > { %v3164_v11 = vrot.slane %v2555_v8, 7  ;;  %v2557_v14 = vpop.f32.mrb[11].mxu0  ;;  %v3177_v53 = vsel %vm3170_vm0, %v3160_v30, %v3162_v0  ;;  %v2699_v16 = vpop.f32.mrb[9].mxu1  ;;  %3101 = vmatprep.subr.bf16.mxu0 %v7332_v57  ;;  %v7438_v30 = vld [vmem:[%s10848_s2 + $0x5a0] ss:$48 sps:$4 sm:$0xff]  }
 0x175   : > { %v3165_v18 = vrot.slane %v2557_v14, 7  ;;  %v3211_v19 = vsel %vm8917_vm2, %v3177_v53, 0.0  ;;  %v3178_v21 = vsel %vm3170_vm0, %v3161_v38, %v3163_v7  ;;  %v2701_v55 = vpop.f32.mrb[10].mxu1  ;;  %4593 = vmatpush1.bf16.msra.mxu1 %v7438_v30  ;;  %v7336_v57 = vld [vmem:[%s10847_s1 + $0x8e0] ss:$40 sps:$4 sm:$0xff]  }
 0x176   : > { %v8937_v24 = vadd.f32 %v3211_v19, %v2697_v9  ;;  %v3212_v25 = vsel %vm8917_vm2, %v3178_v21, 0.0  ;;  %v3175_v27 = vsel %vm3170_vm0, %v3162_v0, %v3164_v11  ;;  %v2703_v28 = vpop.f32.mrb[11].mxu1  ;;  %4635 = vmatprep.subr.bf16.mxu1 %v7446_v41  ;;  %v7339_v21 = vld [vmem:[%s10847_s1 + $0x930] ss:$40 sps:$4 sm:$0xff]  }
 0x177   : > { %v8946_v31 = vadd.f32 %v3212_v25, %v2699_v16  ;;  %v8948_v12 = vadd.f32 %v3175_v27, %v2701_v55  ;;  %v3176_v32 = vsel %vm3170_vm0, %v3163_v7, %v3165_v18  ;;  %3102 = vmatpush1.bf16.msra.mxu0 %v7330_v10  ;;  %v7351_v30 = vld [vmem:[%s10848_s2 + $0x10] ss:$48 sps:$4 sm:$0xff]  }
 0x178   : > { %v8955_v38 = vadd.f32 %v3176_v32, %v2703_v28  ;;  %3103 = vmatprep.subr.bf16.mxu0 %v7335_v17  ;;  %v7347_v28 = vld [vmem:[%s10847_s1 + $0x9d4] ss:$40 sps:$4 sm:$0xff]   ;;  %v7375_v41 = vld [vmem:[%s10848_s2 + $0x190] ss:$48 sps:$4 sm:$0xff]  }
 0x179   : > { %v2561_v40 = vpop.f32.mrb[12].mxu0  ;;  %v7359_v32 = vld [vmem:[%s10848_s2 + $0x74] ss:$48 sps:$4 sm:$0xff]  }
 0x17a   : > { %v3166_v34 = vrot.slane %v2561_v40, 7  ;;  %v2563_v44 = vpop.f32.mrb[13].mxu0  ;;  %v7377_v40 = vld [vmem:[%s10848_s2 + $0x194] ss:$48 sps:$4 sm:$0xff]  }
 0x17b   : > { %v3167_v50 = vrot.slane %v2563_v44, 7  ;;  %v2565_v52 = vpop.f32.mrb[14].mxu0  ;;  %v2707_v47 = vpop.f32.mrb[12].mxu1  ;;  %3104 = vmatpush1.bf16.msra.mxu0 %v7333_v37  ;;  %v7357_v37 = vld [vmem:[%s10848_s2 + $0x70] ss:$48 sps:$4 sm:$0xff]  }
 0x17c   : > { %v3168_v61 = vrot.slane %v2565_v52, 7  ;;  %v2567_v63 = vpop.f32.mrb[15].mxu0  ;;  %v3173_v0 = vsel %vm3170_vm0, %v3164_v11, %v3166_v34  ;;  %v2709_v2 = vpop.f32.mrb[13].mxu1  ;;  %3105 = vmatprep.subr.bf16.mxu0 %v7338_v20  ;;  %v7363_v20 = vld [vmem:[%s10848_s2 + $0xd0] ss:$48 sps:$4 sm:$0xff]  }
 0x17d   : > { %v3169_v7 = vrot.slane %v2567_v63, 7  ;;  %v3215_v8 = vsel %vm8964_vm3, %v3173_v0, 0.0  ;;  %v3174_v9 = vsel %vm3170_vm0, %v3165_v18, %v3167_v50  ;;  %v2711_v10 = vpop.f32.mrb[14].mxu1  ;;  %v7387_v44 = vld [vmem:[%s10848_s2 + $0x250] ss:$48 sps:$4 sm:$0xff]  }
 0x17e   : > { %v3185_v14 = vsel %vm3170_vm0, %v3168_v61, %v3154_v62  ;;  %v8988_v11 = vadd.f32 %v3215_v8, %v2707_v47  ;;  %v3216_v53 = vsel %vm8964_vm3, %v3174_v9, 0.0  ;;  %v3171_v16 = vsel %vm3170_vm0, %v3166_v34, %v3168_v61  ;;  %v2713_v17 = vpop.f32.mrb[15].mxu1  ;;  %v7389_v34 = vld [vmem:[%s10848_s2 + $0x254] ss:$48 sps:$4 sm:$0xff]   ;;  %v7399_v52 = vld [vmem:[%s10848_s2 + $0x310] ss:$48 sps:$4 sm:$0xff]  }
 0x17f   : > { %v3203_v19 = vsel %vm8971_vm4, %v3185_v14, 0.0  ;;  %v3186_v54 = vsel %vm3170_vm0, %v3169_v7, %v3155_v3  ;;  %v9000_v18 = vadd.f32 %v3216_v53, %v2709_v2  ;;  %v9002_v62 = vadd.f32 %v3171_v16, %v2711_v10  ;;  %3106 = vmatpush1.bf16.msra.mxu0 %v7336_v57  ;;  %v7344_v3 = vld [vmem:[%s10847_s1 + $0x984] ss:$40 sps:$4 sm:$0xff]   ;;  %v7405_v47 = vld [vmem:[%s10848_s2 + $0x370] ss:$48 sps:$4 sm:$0xff]  }
 0x180   : > { %v9008_v55 = vadd.f32 %v3203_v19, %v8823_v58  ;;  %v3204_v23 = vsel %vm8971_vm4, %v3186_v54, 0.0  ;;  %v3172_v56 = vsel %vm3170_vm0, %v3167_v50, %v3169_v7  ;;  %3107 = vmatprep.subr.bf16.mxu0 %v7341_v6  ;;  %v7342_v58 = vld [vmem:[%s10847_s1 + $0x980] ss:$40 sps:$4 sm:$0xff]   ;;  %v7401_v50 = vld [vmem:[%s10848_s2 + $0x314] ss:$48 sps:$4 sm:$0xff]  }
 0x181   : > { %v9018_v25 = vadd.f32 %v3204_v23, %v8830_v1  ;;  %v9020_v27 = vadd.f32 %v3172_v56, %v2713_v17  ;;  %v7353_v1 = vld [vmem:[%s10848_s2 + $0x14] ss:$48 sps:$4 sm:$0xff]   ;;  %v7411_v61 = vld [vmem:[%s10848_s2 + $0x3d0] ss:$48 sps:$4 sm:$0xff]   ;;  %v9138_v17 = vsub.s32 0, %v8803_v51 }
 0x182   : > { %v7413_v57 = vld [vmem:[%s10848_s2 + $0x3d4] ss:$48 sps:$4 sm:$0xff]   ;;  %v7417_v0 = vld [vmem:[%s10848_s2 + $0x430] ss:$48 sps:$4 sm:$0xff]  }
 0x183   : > { %3108 = vmatpush1.bf16.msra.mxu0 %v7339_v21  ;;  %v7419_v63 = vld [vmem:[%s10848_s2 + $0x434] ss:$48 sps:$4 sm:$0xff]   ;;  %v7423_v6 = vld [vmem:[%s10848_s2 + $0x490] ss:$48 sps:$4 sm:$0xff]   ;;  %v9146_v21 = vsub.s32 2, %v8803_v51 }
 0x184   : > { %3109 = vmatprep.subr.bf16.mxu0 %v7344_v3  ;;  %v7425_v2 = vld [vmem:[%s10848_s2 + $0x494] ss:$48 sps:$4 sm:$0xff]   ;;  %v7429_v8 = vld [vmem:[%s10848_s2 + $0x4f0] ss:$48 sps:$4 sm:$0xff]   ;;  %v305_v3 = vadd.s32 8, %v8803_v51 }
 0x185   : > { %v7431_v7 = vld [vmem:[%s10848_s2 + $0x4f4] ss:$48 sps:$4 sm:$0xff]   ;;  %v7435_v10 = vld [vmem:[%s10848_s2 + $0x550] ss:$48 sps:$4 sm:$0xff]   ;;  %10898 = vst [vmem:[#allocation2_spill] sm:$0xff] %v9146_v21 }
 0x186   : > { %v7437_v9 = vld [vmem:[%s10848_s2 + $0x554] ss:$48 sps:$4 sm:$0xff]   ;;  %v7441_v53 = vld [vmem:[%s10848_s2 + $0x5b0] ss:$48 sps:$4 sm:$0xff]  }
 0x187   : > { %3110 = vmatpush1.bf16.msra.mxu0 %v7342_v58  ;;  %v7443_v14 = vld [vmem:[%s10848_s2 + $0x5b4] ss:$48 sps:$4 sm:$0xff]   ;;  %v3316_v19 = vld [vmem:[%s10849_s3] sm:$0xf] }
 0x188   : > { %3111 = vmatprep.subr.bf16.mxu0 %v7347_v28  ;;  %v7449_v16 = vld [vmem:[%s10848_s2 + $0x24] ss:$48 sps:$4 sm:$0xff]   ;;  %v3321_v56 = vrot.slane %v3316_v19, %v9138_v17  ;;  %v9154_v28 = vsub.s32 1, %v8803_v51 }
 0x18b   : > { %3112 = vmatpush1.bf16.msra.mxu0 %v7345_v29  ;;  %v9157_v29 = vsub.s32 3, %v8803_v51 }
 0x18c   : > { %4708 = vmatprep.subr.bf16.mxu0 %v7353_v1 }
 0x18d   : > { %10899 = vst [vmem:[#allocation3_spill] sm:$0xff] %v9157_v29 }
 0x18e   : > { %3114 = vmatmul.mubr.bf16.vlgmr.msra.gmra.mrb[32].mxu0 %v8586_v33  ;;  %v7371_v33 = vld [vmem:[%s10848_s2 + $0x134] ss:$48 sps:$4 sm:$0xff]  }
 0x18f   : > { %4709 = vmatpush1.bf16.msra.mxu0 %v7351_v30  ;;  %3123 = vmatprep.mubr.bf16.mxu0 %v8590_v35  ;;  %v7369_v35 = vld [vmem:[%s10848_s2 + $0x130] ss:$48 sps:$4 sm:$0xff]  }
 0x190   : > { %4710 = vmatprep.subr.bf16.mxu0 %v7359_v32 }
 0x193   : > { %4711 = vmatpush1.bf16.msra.mxu0 %v7357_v37 }
 0x194   : > { %4712 = vmatprep.subr.bf16.mxu0 %v7365_v39 }
 0x196   : > { %3124 = vmatmul.mubr.bf16.gmra.mrb[36].mxu0 %v8620_v48  ;;  %v7383_v48 = vld [vmem:[%s10848_s2 + $0x1f4] ss:$48 sps:$4 sm:$0xff]  }
 0x197   : > { %4713 = vmatpush1.bf16.msra.mxu0 %v7363_v20  ;;  %3133 = vmatprep.mubr.bf16.mxu0 %v8624_v49  ;;  %v7381_v49 = vld [vmem:[%s10848_s2 + $0x1f0] ss:$48 sps:$4 sm:$0xff]   ;;  %v3325_v20 = vrot.slane %v3316_v19, %v9146_v21 }
 0x198   : > { %4714 = vmatprep.subr.bf16.mxu0 %v7371_v33 }
 0x19b   : > { %4715 = vmatpush1.bf16.msra.mxu0 %v7369_v35  ;;  %v9167_v35 = vrot.slane %v3321_v56, %v9138_v17 }
 0x19c   : > { %4716 = vmatprep.subr.bf16.mxu0 %v7377_v40  ;;  %v323_v40 = vand.u32 15, %v305_v3 }
 0x19e   : > { %3134 = vmatmul.mubr.bf16.gmra.mrb[40].mxu0 %v8654_v59  ;;  %v7395_v59 = vld [vmem:[%s10848_s2 + $0x2b4] ss:$48 sps:$4 sm:$0xff]   ;;  %vm9187_vm6 = vcmp.ne.s32.totalorder %v323_v40, 15 }
 0x19f   : > { %4717 = vmatpush1.bf16.msra.mxu0 %v7375_v41  ;;  %3143 = vmatprep.mubr.bf16.mxu0 %v8658_v60  ;;  %v7393_v60 = vld [vmem:[%s10848_s2 + $0x2b0] ss:$48 sps:$4 sm:$0xff]  }
 0x1a0   : > { %4718 = vmatprep.subr.bf16.mxu0 %v7383_v48  ;;  %v3355_v48 = vrot.slane %v3316_v19, %v9154_v28 }
 0x1a3   : > { %4719 = vmatpush1.bf16.msra.mxu0 %v7381_v49 }
 0x1a4   : > { %4720 = vmatprep.subr.bf16.mxu0 %v7389_v34  ;;  %v3359_v34 = vrot.slane %v3316_v19, %v9157_v29 }
 0x1a6   : > { %3144 = vmatmul.mubr.bf16.gmra.mrb[44].mxu0 %v8688_v5  ;;  %v7407_v5 = vld [vmem:[%s10848_s2 + $0x374] ss:$48 sps:$4 sm:$0xff]  }
 0x1a7   : > { %4721 = vmatpush1.bf16.msra.mxu0 %v7387_v44 }
 0x1a8   : > { %4722 = vmatprep.subr.bf16.mxu0 %v7395_v59 }
 0x1ab   : > { %4723 = vmatpush1.bf16.msra.mxu0 %v7393_v60  ;;  %v307_v60 = vadd.s32 24, %v8803_v51 }
 0x1ac   : > { %4724 = vmatprep.subr.bf16.mxu0 %v7401_v50 }
 0x1af   : > { %4725 = vmatpush1.bf16.msra.mxu0 %v7399_v52  ;;  %v9183_v52 = vrot.slane %v3325_v20, %v9138_v17  ;;  %v311_v20 = vadd.s32 56, %v8803_v51 }
 0x1b0   : > { %4726 = vmatprep.subr.bf16.mxu0 %v7407_v5 }
 0x1b3   : > { %4727 = vmatpush1.bf16.msra.mxu0 %v7405_v47 }
 0x1b4   : > { %4728 = vmatprep.subr.bf16.mxu0 %v7413_v57 }
 0x1b7   : > { %4729 = vmatpush1.bf16.msra.mxu0 %v7411_v61 }
 0x1b8   : > { %4730 = vmatprep.subr.bf16.mxu0 %v7419_v63 }
 0x1bb   : > { %4731 = vmatpush1.bf16.msra.mxu0 %v7417_v0  ;;  %v9195_v0 = vrot.slane %v3355_v48, %v9154_v28 }
 0x1bc   : > { %4732 = vmatprep.subr.bf16.mxu0 %v7425_v2  ;;  %v9198_v2 = vrot.slane %v3359_v34, %v9154_v28 }
 0x1bf   : > { %4733 = vmatpush1.bf16.msra.mxu0 %v7423_v6 }
 0x1c0   : > { %4734 = vmatprep.subr.bf16.mxu0 %v7431_v7 }
 0x1c3   : > { %4735 = vmatpush1.bf16.msra.mxu0 %v7429_v8 }
 0x1c4   : > { %4736 = vmatprep.subr.bf16.mxu0 %v7437_v9 }
 0x1c7   : > { %4737 = vmatpush1.bf16.msra.mxu0 %v7435_v10 }
 0x1c8   : > { %4738 = vmatprep.subr.bf16.mxu0 %v7443_v14  ;;  %v337_v14 = vand.u32 15, %v307_v60 }
 0x1ca   : > { %vm9223_vm7 = vcmp.ne.s32.totalorder %v337_v14, 15 }
 0x1cb   : > { %4739 = vmatpush1.bf16.msra.mxu0 %v7441_v53  ;;  %v309_v53 = vadd.s32 40, %v8803_v51 }
 0x1cc   : > { %4854 = vmatprep.subr.bf16.mxu0 %v7449_v16 }
 0x1e1   : > { %v9143_v54 = vpop.f32.mrb[16].mxu0 }
 0x1e2   : > { %v9148_v23 = vpop.f32.mrb[17].mxu0  ;;  %v3219_v1 = vrot.slane %v9143_v54, 1  ;;  %v7459_v54 = vld [vmem:[%s10848_s2 + $0xe0] ss:$48 sps:$4 sm:$0xff]  }
 0x1e3   : > { %v2827_v58 = vpop.f32.mrb[18].mxu0  ;;  %v10854_v37 = vrot.slane %v9148_v23, 1  ;;  %v9176_v44 = vpop.f32.mrb[16].mxu1 }
 0x1e4   : > { %v3221_v30 = vrot.slane %v2827_v58, 1  ;;  %v2829_v32 = vpop.f32.mrb[19].mxu0  ;;  %10900 = vst [vmem:[#allocation4_spill] sm:$0xff] %v9176_v44  ;;  %v9180_v50 = vpop.f32.mrb[17].mxu1 }
 0x1e5   : > { %v3222_v39 = vrot.slane %v2829_v32, 1  ;;  %10901 = vst [vmem:[#allocation5_spill] sm:$0xff] %v9180_v50  ;;  %v9185_v5 = vpop.f32.mrb[18].mxu1 }
 0x1e6   : > { %v3248_v33 = vsel %vm3235_vm5, %v3219_v1, %v3221_v30  ;;  %10902 = vst [vmem:[#allocation6_spill] sm:$0xff] %v9185_v5  ;;  %v9191_v63 = vpop.f32.mrb[19].mxu1 }
 0x1e7   : > { %v3300_v41 = vadd.f32 %v9008_v55, %v3248_v33  ;;  %v3249_v49 = vsel %vm3235_vm5, %v10854_v37, %v3222_v39  ;;  %10905 = vst [vmem:[#allocation7_spill] sm:$0xff] %v9191_v63 }
 0x1e8   : > { %v3301_v59 = vadd.f32 %v9018_v25, %v3249_v49 }
 0x1e9   : > { %v2833_v55 = vpop.f32.mrb[20].mxu0  ;;  %v3336_v25 = vmul.f32 %v9167_v35, %v3300_v41 }
 0x1ea   : > { %v3223_v57 = vrot.slane %v2833_v55, 1  ;;  %v2835_v61 = vpop.f32.mrb[21].mxu0  ;;  %v3337_v16 = vmul.f32 %v9183_v52, %v3301_v59 }
 0x1eb   : > { %v3224_v6 = vrot.slane %v2835_v61, 1  ;;  %v2837_v7 = vpop.f32.mrb[22].mxu0  ;;  %v3370_v33 = vadd.f32 %v9195_v0, %v3336_v25  ;;  %v9227_v55 = vpop.f32.mrb[20].mxu1  ;;  %v351_v61 = vand.u32 15, %v309_v53  ;;  %v365_v25 = vand.u32 15, %v311_v20 }
 0x1ec   : > { %v3246_v8 = vsel %vm3235_vm5, %v3221_v30, %v3223_v57  ;;  %v3225_v9 = vrot.slane %v2837_v7, 1  ;;  %v2839_v10 = vpop.f32.mrb[23].mxu0  ;;  %v3371_v49 = vadd.f32 %v9198_v2, %v3337_v16  ;;  %10908 = vst [vmem:[#allocation8_spill] sm:$0xff] %v9227_v55 }
 0x1ed   : > { %v3270_v19 = vsel %vm9187_vm6, %v3246_v8, 0.0  ;;  %v3247_v56 = vsel %vm3235_vm5, %v3222_v39, %v3224_v6  ;;  %v3226_v3 = vrot.slane %v2839_v10, 1  ;;  %vm9274_vm8 = vcmp.ne.s32.totalorder %v351_v61, 15 }
 0x1ee   : > { %v3302_v58 = vadd.f32 %v8847_v13, %v3270_v19  ;;  %v3271_v32 = vsel %vm9187_vm6, %v3247_v56, 0.0  ;;  %v3244_v30 = vsel %vm3235_vm5, %v3223_v57, %v3225_v9  ;;  %vm9280_vm9 = vcmp.ne.s32.totalorder %v365_v25, 15  ;;  %v7453_v25 = vld [vmem:[%s10848_s2 + $0x80] ss:$48 sps:$4 sm:$0xff]  }
 0x1ef   : > { %v3303_v40 = vadd.f32 %v8857_v15, %v3271_v32  ;;  %v3304_v41 = vadd.f32 %v8891_v26, %v3244_v30  ;;  %v3245_v39 = vsel %vm3235_vm5, %v3224_v6, %v3226_v3  ;;  %v3386_v6 = vmax.f32 %v3370_v33, 0.0  ;;  %v9235_v32 = vpop.f32.mrb[21].mxu1 }
 0x1f0   : > { %v3338_v48 = vmul.f32 %v9167_v35, %v3302_v58  ;;  %v3305_v13 = vadd.f32 %v8897_v36, %v3245_v39  ;;  %10909 = vst [vmem:[#allocation9_spill] sm:$0xff] %v9235_v32  ;;  %v3387_v30 = vmax.f32 %v3371_v49, 0.0 }
 0x1f1   : > { %v3339_v34 = vmul.f32 %v9183_v52, %v3303_v40  ;;  %v2843_v60 = vpop.f32.mrb[24].mxu0  ;;  %v3340_v7 = vmul.f32 %v9167_v35, %v3304_v41  ;;  %v9241_v40 = vpop.f32.mrb[22].mxu1 }
 0x1f2   : > { %v3372_v15 = vadd.f32 %v9195_v0, %v3338_v48  ;;  %v3227_v26 = vrot.slane %v2843_v60, 1  ;;  %v2845_v57 = vpop.f32.mrb[25].mxu0  ;;  %v3341_v16 = vmul.f32 %v9183_v52, %v3305_v13  ;;  %10910 = vst [vmem:[#allocation10_spill] sm:$0xff] %v9241_v40  ;;  %v9248_v48 = vpop.f32.mrb[23].mxu1 }
 0x1f3   : > { %v3373_v36 = vadd.f32 %v9198_v2, %v3339_v34  ;;  %v3228_v8 = vrot.slane %v2845_v57, 1  ;;  %v2847_v10 = vpop.f32.mrb[26].mxu0  ;;  %10911 = vst [vmem:[#allocation11_spill] sm:$0xff] %v9248_v48 }
 0x1f4   : > { %v3388_v14 = vmax.f32 %v3372_v15, 0.0  ;;  %v3242_v19 = vsel %vm3235_vm5, %v3225_v9, %v3227_v26  ;;  %v3229_v56 = vrot.slane %v2847_v10, 1  ;;  %v2849_v58 = vpop.f32.mrb[27].mxu0  ;;  %v3374_v15 = vadd.f32 %v9195_v0, %v3340_v7 }
 0x1f5   : > { %v3389_v53 = vmax.f32 %v3373_v36, 0.0  ;;  %v3274_v20 = vsel %vm9223_vm7, %v3242_v19, 0.0  ;;  %v3243_v33 = vsel %vm3235_vm5, %v3226_v3, %v3228_v8  ;;  %v3230_v60 = vrot.slane %v2849_v58, 1  ;;  %v7444_v3 = vld [vmem:[%s10848_s2 + $0x8] ss:$48 sps:$4 sm:$0xff]  }
 0x1f6   : > { %v9243_v41 = vpack.c.bf16 %v3388_v14, %v3386_v6  ;;  %v3306_v39 = vadd.f32 %v8899_v42, %v3274_v20  ;;  %v3275_v9 = vsel %vm9223_vm7, %v3243_v33, 0.0  ;;  %v3240_v34 = vsel %vm3235_vm5, %v3227_v26, %v3229_v56  ;;  %v7447_v42 = vld [vmem:[%s10848_s2 + $0x20] ss:$48 sps:$4 sm:$0xff]   ;;  %v7452_v26 = vld [vmem:[%s10848_s2 + $0x6c] ss:$48 sps:$4 sm:$0xff]  }
 0x1f7   : > { %v9250_v13 = vpack.c.bf16 %v3389_v53, %v3387_v30  ;;  %v3307_v49 = vadd.f32 %v8906_v43, %v3275_v9  ;;  %v3375_v57 = vadd.f32 %v9198_v2, %v3341_v16  ;;  %v3308_v43 = vadd.f32 %v8937_v24, %v3240_v34  ;;  %v7455_v36 = vld [vmem:[%s10848_s2 + $0x84] ss:$48 sps:$4 sm:$0xff]   ;;  %v7450_v53 = vld [vmem:[%s10848_s2 + $0x68] ss:$48 sps:$4 sm:$0xff]  }
 0x1f8   : > { %v3342_v6 = vmul.f32 %v9167_v35, %v3306_v39  ;;  %v3241_v14 = vsel %vm3235_vm5, %v3228_v8, %v3230_v60  ;;  %v7458_v39 = vld [vmem:[%s10848_s2 + $0xcc] ss:$48 sps:$4 sm:$0xff]   ;;  %v7461_v9 = vld [vmem:[%s10848_s2 + $0xe4] ss:$48 sps:$4 sm:$0xff]  }
 0x1f9   : > { %v3343_v10 = vmul.f32 %v9183_v52, %v3307_v49  ;;  %v2853_v16 = vpop.f32.mrb[28].mxu0  ;;  %4594 = vmatprep.mubr.bf16.mxu1 %v9250_v13  ;;  %4740 = vmatprep.mubr.bf16.mxu0 %v9250_v13  ;;  %v3344_v58 = vmul.f32 %v9167_v35, %v3308_v43  ;;  %v3309_v30 = vadd.f32 %v8946_v31, %v3241_v14  ;;  %v3390_v49 = vmax.f32 %v3374_v15, 0.0 }
 0x1fa   : > { %v3376_v19 = vadd.f32 %v9195_v0, %v3342_v6  ;;  %v3231_v8 = vrot.slane %v2853_v16, 1  ;;  %v2855_v61 = vpop.f32.mrb[29].mxu0  ;;  %4595 = vmatmul.mubr.bf16.vlgmr.msra.gmra.mrb[32].mxu1 %v9243_v41  ;;  %4741 = vmatmul.mubr.bf16.vlgmr.msra.gmra.mrb[48].mxu0 %v9243_v41  ;;  %v3391_v34 = vmax.f32 %v3375_v57, 0.0 }
 0x1fb   : > { %v3377_v20 = vadd.f32 %v9198_v2, %v3343_v10  ;;  %v3232_v33 = vrot.slane %v2855_v61, 1  ;;  %4636 = vmatpush1.bf16.msra.mxu1 %v7444_v3  ;;  %4855 = vmatpush1.bf16.msra.mxu0 %v7447_v42  ;;  %v2857_v31 = vpop.f32.mrb[30].mxu0  ;;  %v9304_v3 = vpop.f32.mrb[24].mxu1  ;;  %v3378_v57 = vadd.f32 %v9195_v0, %v3344_v58 }
 0x1fc   : > { %v3392_v6 = vmax.f32 %v3376_v19, 0.0  ;;  %v3238_v43 = vsel %vm3235_vm5, %v3229_v56, %v3231_v8  ;;  %v2859_v14 = vpop.f32.mrb[31].mxu0  ;;  %4637 = vmatprep.subr.bf16.mxu1 %v7452_v26  ;;  %4856 = vmatprep.subr.bf16.mxu0 %v7455_v36  ;;  %10916 = vst [vmem:[#allocation12_spill] sm:$0xff] %v9304_v3  ;;  %v3233_v61 = vrot.slane %v2857_v31, 1  ;;  %v9310_v37 = vpop.f32.mrb[25].mxu1  ;;  %v3345_v56 = vmul.f32 %v9183_v52, %v3309_v30 }
 0x1fd   : > { %v3393_v42 = vmax.f32 %v3377_v20, 0.0  ;;  %v3278_v10 = vsel %vm9274_vm8, %v3238_v43, 0.0  ;;  %v3239_v16 = vsel %vm3235_vm5, %v3230_v60, %v3232_v33  ;;  %10917 = vst [vmem:[#allocation13_spill] sm:$0xff] %v9310_v37  ;;  %v9317_v36 = vpop.f32.mrb[26].mxu1 }
 0x1fe   : > { %v9312_v15 = vpack.c.bf16 %v3392_v6, %v3390_v49  ;;  %v3310_v26 = vadd.f32 %v8948_v12, %v3278_v10  ;;  %10918 = vst [vmem:[#allocation14_spill] sm:$0xff] %v9317_v36  ;;  %v3279_v20 = vsel %vm9274_vm8, %v3239_v16, 0.0  ;;  %v3236_v60 = vsel %vm3235_vm5, %v3231_v8, %v3233_v61  ;;  %v7456_v12 = vld [vmem:[%s10848_s2 + $0xc8] ss:$48 sps:$4 sm:$0xff]   ;;  %v9332_v58 = vpop.f32.mrb[27].mxu1 }
 0x1ff   : > { %v9319_v19 = vpack.c.bf16 %v3393_v42, %v3391_v34  ;;  %v3250_v31 = vsel %vm3235_vm5, %v3233_v61, %v3219_v1  ;;  %4638 = vmatpush1.bf16.msra.mxu1 %v7450_v53  ;;  %4857 = vmatpush1.bf16.msra.mxu0 %v7453_v25  ;;  %10919 = vst [vmem:[#allocation15_spill] sm:$0xff] %v9332_v58  ;;  %v7464_v1 = vld [vmem:[%s10848_s2 + $0x12c] ss:$48 sps:$4 sm:$0xff]   ;;  %v3234_v34 = vrot.slane %v2859_v14, 1  ;;  %v10920_v42 = vrot.slane %v9148_v23, 1 }
 0x200   : > { %v3346_v30 = vmul.f32 %v9167_v35, %v3310_v26  ;;  %v3311_v49 = vadd.f32 %v8955_v38, %v3279_v20  ;;  %v3282_v8 = vsel %vm9280_vm9, %v3250_v31, 0.0  ;;  %4639 = vmatprep.subr.bf16.mxu1 %v7458_v39  ;;  %4858 = vmatprep.subr.bf16.mxu0 %v7461_v9  ;;  %v3312_v53 = vadd.f32 %v8988_v11, %v3236_v60  ;;  %v7467_v38 = vld [vmem:[%s10848_s2 + $0x144] ss:$48 sps:$4 sm:$0xff]   ;;  %v7462_v16 = vld [vmem:[%s10848_s2 + $0x128] ss:$48 sps:$4 sm:$0xff]  }
 0x201   : > { %v3314_v25 = vadd.f32 %v9002_v62, %v3282_v8  ;;  %4604 = vmatprep.mubr.bf16.mxu1 %v9319_v19  ;;  %4750 = vmatprep.mubr.bf16.mxu0 %v9319_v19  ;;  %v3394_v39 = vmax.f32 %v3378_v57, 0.0  ;;  %v3379_v9 = vadd.f32 %v9198_v2, %v3345_v56  ;;  %v3237_v14 = vsel %vm3235_vm5, %v3232_v33, %v3234_v34  ;;  %v7465_v61 = vld [vmem:[%s10848_s2 + $0x140] ss:$48 sps:$4 sm:$0xff]   ;;  %v9370_v57 = vpop.f32.mrb[28].mxu1  ;;  %v7470_v26 = vld [vmem:[%s10848_s2 + $0x18c] ss:$48 sps:$4 sm:$0xff]  }
 0x202   : > { %v3380_v6 = vadd.f32 %v9195_v0, %v3346_v30  ;;  %v3347_v43 = vmul.f32 %v9183_v52, %v3311_v49  ;;  %4605 = vmatmul.mubr.bf16.gmra.mrb[36].mxu1 %v9312_v15  ;;  %4751 = vmatmul.mubr.bf16.gmra.mrb[52].mxu0 %v9312_v15  ;;  %v3348_v11 = vmul.f32 %v9167_v35, %v3312_v53  ;;  %v9379_v20 = vpop.f32.mrb[29].mxu1  ;;  %v7473_v30 = vld [vmem:[%s10848_s2 + $0x1a4] ss:$48 sps:$4 sm:$0xff]  }
 0x203   : > { %v3350_v62 = vmul.f32 %v9167_v35, %v3314_v25  ;;  %v3251_v10 = vsel %vm3235_vm5, %v3234_v34, %v10920_v42  ;;  %4640 = vmatpush1.bf16.msra.mxu1 %v7456_v12  ;;  %10921 = vst [vmem:[#allocation16_spill] sm:$0xff] %v9370_v57  ;;  %v3313_v33 = vadd.f32 %v9000_v18, %v3237_v14  ;;  %10922 = vst [vmem:[#allocation17_spill] sm:$0xff] %v9379_v20  ;;  %v9387_v18 = vpop.f32.mrb[30].mxu1  ;;  %v7477_v42 = vld [vmem:[%s10848_s2 + $0x200] ss:$48 sps:$4 sm:$0xff]  }
 0x204   : > { %v3396_v35 = vmax.f32 %v3380_v6, 0.0  ;;  %v3381_v56 = vadd.f32 %v9198_v2, %v3347_v43  ;;  %v3283_v23 = vsel %vm9280_vm9, %v3251_v10, 0.0  ;;  %4859 = vmatpush1.bf16.msra.mxu0 %v7459_v54  ;;  %4641 = vmatprep.subr.bf16.mxu1 %v7464_v1  ;;  %v3382_v60 = vadd.f32 %v9195_v0, %v3348_v11  ;;  %10923 = vst [vmem:[#allocation18_spill] sm:$0xff] %v9387_v18  ;;  %v9392_v53 = vpop.f32.mrb[31].mxu1  ;;  %v7479_v11 = vld [vmem:[%s10848_s2 + $0x204] ss:$48 sps:$4 sm:$0xff]  }
 0x205   : > { %v3384_v31 = vadd.f32 %v9195_v0, %v3350_v62  ;;  %v3315_v12 = vadd.f32 %v9020_v27, %v3283_v23  ;;  %4860 = vmatprep.subr.bf16.mxu0 %v7467_v38  ;;  %v3395_v49 = vmax.f32 %v3379_v9, 0.0  ;;  %v3349_v1 = vmul.f32 %v9183_v52, %v3313_v33  ;;  %10924 = vst [vmem:[#allocation19_spill] sm:$0xff] %v9392_v53  ;;  %v7471_v9 = vld [vmem:[%s10848_s2 + $0x1a0] ss:$48 sps:$4 sm:$0xff]   ;;  %v7488_v23 = vld [vmem:[%s10848_s2 + $0x2ac] ss:$48 sps:$4 sm:$0xff]  }
 0x206   : > { %v9389_v8 = vpack.c.bf16 %v3396_v35, %v3394_v39  ;;  %v3397_v54 = vmax.f32 %v3381_v56, 0.0  ;;  %v3398_v25 = vmax.f32 %v3382_v60, 0.0  ;;  %v7468_v39 = vld [vmem:[%s10848_s2 + $0x188] ss:$48 sps:$4 sm:$0xff]   ;;  %v7483_v56 = vld [vmem:[%s10848_s2 + $0x260] ss:$48 sps:$4 sm:$0xff]  }
 0x207   : > { %v3400_v34 = vmax.f32 %v3384_v31, 0.0  ;;  %v3351_v0 = vmul.f32 %v9183_v52, %v3315_v12  ;;  %4642 = vmatpush1.bf16.msra.mxu1 %v7462_v16  ;;  %v3383_v38 = vadd.f32 %v9198_v2, %v3349_v1  ;;  %v7476_v52 = vld [vmem:[%s10848_s2 + $0x1ec] ss:$48 sps:$4 sm:$0xff]   ;;  %v7480_v35 = vld [vmem:[%s10848_s2 + $0x248] ss:$48 sps:$4 sm:$0xff]  }
 0x208   : > { %v9395_v27 = vpack.c.bf16 %v3397_v54, %v3395_v49  ;;  %4861 = vmatpush1.bf16.msra.mxu0 %v7465_v61  ;;  %4643 = vmatprep.subr.bf16.mxu1 %v7470_v26  ;;  %v7482_v16 = vld [vmem:[%s10848_s2 + $0x24c] ss:$48 sps:$4 sm:$0xff]   ;;  %v7485_v61 = vld [vmem:[%s10848_s2 + $0x264] ss:$48 sps:$4 sm:$0xff]   ;;  %v7486_v26 = vld [vmem:[%s10848_s2 + $0x2a8] ss:$48 sps:$4 sm:$0xff]  }
 0x209   : > { %v9404_v6 = vpack.c.bf16 %v3400_v34, %v3398_v25  ;;  %v3385_v43 = vadd.f32 %v9198_v2, %v3351_v0  ;;  %4862 = vmatprep.subr.bf16.mxu0 %v7473_v30  ;;  %v3399_v62 = vmax.f32 %v3383_v38, 0.0  ;;  %v7474_v2 = vld [vmem:[%s10848_s2 + $0x1e8] ss:$48 sps:$4 sm:$0xff]   ;;  %v7491_v33 = vld [vmem:[%s10848_s2 + $0x2c4] ss:$48 sps:$4 sm:$0xff]  }
 0x20a   : > { %4614 = vmatprep.mubr.bf16.mxu1 %v9395_v27  ;;  %4760 = vmatprep.mubr.bf16.mxu0 %v9395_v27  ;;  %v7489_v60 = vld [vmem:[%s10848_s2 + $0x2c0] ss:$48 sps:$4 sm:$0xff]   ;;  %v7494_v31 = vld [vmem:[%s10848_s2 + $0x30c] ss:$48 sps:$4 sm:$0xff]   ;;  %v7497_v12 = vld [vmem:[%s10848_s2 + $0x324] ss:$48 sps:$4 sm:$0xff]  }
 0x20b   : > { %v3401_v14 = vmax.f32 %v3385_v43, 0.0  ;;  %4615 = vmatmul.mubr.bf16.gmra.mrb[40].mxu1 %v9389_v8  ;;  %4761 = vmatmul.mubr.bf16.gmra.mrb[56].mxu0 %v9389_v8  ;;  %v7492_v30 = vld [vmem:[%s10848_s2 + $0x308] ss:$48 sps:$4 sm:$0xff]   ;;  %v7495_v49 = vld [vmem:[%s10848_s2 + $0x320] ss:$48 sps:$4 sm:$0xff]  }
 0x20c   : > { %4644 = vmatpush1.bf16.msra.mxu1 %v7468_v39  ;;  %4863 = vmatpush1.bf16.msra.mxu0 %v7471_v9  ;;  %v7500_v54 = vld [vmem:[%s10848_s2 + $0x36c] ss:$48 sps:$4 sm:$0xff]   ;;  %v7503_v1 = vld [vmem:[%s10848_s2 + $0x384] ss:$48 sps:$4 sm:$0xff]   ;;  %v7498_v25 = vld [vmem:[%s10848_s2 + $0x368] ss:$48 sps:$4 sm:$0xff]  }
 0x20d   : > { %v9423_v10 = vpack.c.bf16 %v3401_v14, %v3399_v62  ;;  %4645 = vmatprep.subr.bf16.mxu1 %v7476_v52  ;;  %4864 = vmatprep.subr.bf16.mxu0 %v7479_v11  ;;  %v7501_v34 = vld [vmem:[%s10848_s2 + $0x380] ss:$48 sps:$4 sm:$0xff]   ;;  %v7506_v0 = vld [vmem:[%s10848_s2 + $0x3cc] ss:$48 sps:$4 sm:$0xff]   ;;  %v7509_v38 = vld [vmem:[%s10848_s2 + $0x3e4] ss:$48 sps:$4 sm:$0xff]  }
 0x20e   : > { %v7504_v39 = vld [vmem:[%s10848_s2 + $0x3c8] ss:$48 sps:$4 sm:$0xff]   ;;  %v7507_v9 = vld [vmem:[%s10848_s2 + $0x3e0] ss:$48 sps:$4 sm:$0xff]   ;;  %v7512_v43 = vld [vmem:[%s10848_s2 + $0x42c] ss:$48 sps:$4 sm:$0xff]  }
 0x20f   : > { %4624 = vmatprep.mubr.bf16.mxu1 %v9423_v10  ;;  %4770 = vmatprep.mubr.bf16.mxu0 %v9423_v10  ;;  %v7515_v52 = vld [vmem:[%s10848_s2 + $0x444] ss:$48 sps:$4 sm:$0xff]   ;;  %v7510_v11 = vld [vmem:[%s10848_s2 + $0x428] ss:$48 sps:$4 sm:$0xff]   ;;  %v7513_v62 = vld [vmem:[%s10848_s2 + $0x440] ss:$48 sps:$4 sm:$0xff]  }
 0x210   : > { %4646 = vmatpush1.bf16.msra.mxu1 %v7474_v2  ;;  %4865 = vmatpush1.bf16.msra.mxu0 %v7477_v42  ;;  %v7518_v14 = vld [vmem:[%s10848_s2 + $0x48c] ss:$48 sps:$4 sm:$0xff]   ;;  %v7521_v2 = vld [vmem:[%s10848_s2 + $0x4a4] ss:$48 sps:$4 sm:$0xff]   ;;  %v7516_v42 = vld [vmem:[%s10848_s2 + $0x488] ss:$48 sps:$4 sm:$0xff]  }
 0x211   : > { %4647 = vmatprep.subr.bf16.mxu1 %v7482_v16  ;;  %4866 = vmatprep.subr.bf16.mxu0 %v7485_v61  ;;  %v7519_v16 = vld [vmem:[%s10848_s2 + $0x4a0] ss:$48 sps:$4 sm:$0xff]   ;;  %v7524_v61 = vld [vmem:[%s10848_s2 + $0x4ec] ss:$48 sps:$4 sm:$0xff]  }
 0x213   : > { %4625 = vmatmul.mubr.bf16.gmra.mrb[44].mxu1 %v9404_v6  ;;  %4771 = vmatmul.mubr.bf16.gmra.mrb[60].mxu0 %v9404_v6 }
 0x214   : > { %4648 = vmatpush1.bf16.msra.mxu1 %v7480_v35  ;;  %4867 = vmatpush1.bf16.msra.mxu0 %v7483_v56  ;;  %v7527_v35 = vld [vmem:[%s10848_s2 + $0x504] ss:$48 sps:$4 sm:$0xff]   ;;  %v7522_v56 = vld [vmem:[%s10848_s2 + $0x4e8] ss:$48 sps:$4 sm:$0xff]  }
 0x215   : > { %4667 = vmatprep.mubr.bf16.mxu1 %v9250_v13  ;;  %4886 = vmatprep.mubr.bf16.mxu0 %v9250_v13 }
 0x216   : > { %4649 = vmatprep.subr.bf16.mxu1 %v7488_v23  ;;  %4868 = vmatprep.subr.bf16.mxu0 %v7491_v33  ;;  %v7525_v23 = vld [vmem:[%s10848_s2 + $0x500] ss:$48 sps:$4 sm:$0xff]   ;;  %v7530_v33 = vld [vmem:[%s10848_s2 + $0x54c] ss:$48 sps:$4 sm:$0xff]  }
 0x218   : > { %4650 = vmatpush1.bf16.msra.mxu1 %v7486_v26  ;;  %4869 = vmatpush1.bf16.msra.mxu0 %v7489_v60  ;;  %v7533_v26 = vld [vmem:[%s10848_s2 + $0x564] ss:$48 sps:$4 sm:$0xff]   ;;  %v7528_v60 = vld [vmem:[%s10848_s2 + $0x548] ss:$48 sps:$4 sm:$0xff]  }
 0x219   : > { %4651 = vmatprep.subr.bf16.mxu1 %v7494_v31  ;;  %4870 = vmatprep.subr.bf16.mxu0 %v7497_v12  ;;  %v7531_v31 = vld [vmem:[%s10848_s2 + $0x560] ss:$48 sps:$4 sm:$0xff]   ;;  %v7536_v12 = vld [vmem:[%s10848_s2 + $0x5ac] ss:$48 sps:$4 sm:$0xff]  }
 0x21c   : > { %4652 = vmatpush1.bf16.msra.mxu1 %v7492_v30  ;;  %4871 = vmatpush1.bf16.msra.mxu0 %v7495_v49  ;;  %v7539_v30 = vld [vmem:[%s10848_s2 + $0x5c4] ss:$48 sps:$4 sm:$0xff]   ;;  %v7534_v49 = vld [vmem:[%s10848_s2 + $0x5a8] ss:$48 sps:$4 sm:$0xff]  }
 0x21d   : > { %4653 = vmatprep.subr.bf16.mxu1 %v7500_v54  ;;  %4872 = vmatprep.subr.bf16.mxu0 %v7503_v1  ;;  %v7537_v54 = vld [vmem:[%s10848_s2 + $0x5c0] ss:$48 sps:$4 sm:$0xff]   ;;  %v7542_v1 = vld [vmem:[%s10848_s2 + $0x1c] ss:$48 sps:$4 sm:$0xff]  }
 0x220   : > { %4654 = vmatpush1.bf16.msra.mxu1 %v7498_v25  ;;  %4873 = vmatpush1.bf16.msra.mxu0 %v7501_v34  ;;  %v7540_v25 = vld [vmem:[%s10848_s2 + $0x18] ss:$48 sps:$4 sm:$0xff]   ;;  %v7545_v34 = vld [vmem:[%s10848_s2 + $0x7c] ss:$48 sps:$4 sm:$0xff]  }
 0x221   : > { %4655 = vmatprep.subr.bf16.mxu1 %v7506_v0  ;;  %4874 = vmatprep.subr.bf16.mxu0 %v7509_v38  ;;  %v7543_v0 = vld [vmem:[%s10848_s2 + $0x78] ss:$48 sps:$4 sm:$0xff]   ;;  %v7548_v38 = vld [vmem:[%s10848_s2 + $0xdc] ss:$48 sps:$4 sm:$0xff]  }
 0x224   : > { %4656 = vmatpush1.bf16.msra.mxu1 %v7504_v39  ;;  %4875 = vmatpush1.bf16.msra.mxu0 %v7507_v9  ;;  %v7546_v39 = vld [vmem:[%s10848_s2 + $0xd8] ss:$48 sps:$4 sm:$0xff]   ;;  %v7551_v9 = vld [vmem:[%s10848_s2 + $0x13c] ss:$48 sps:$4 sm:$0xff]  }
 0x225   : > { %4657 = vmatprep.subr.bf16.mxu1 %v7512_v43  ;;  %4876 = vmatprep.subr.bf16.mxu0 %v7515_v52  ;;  %v7549_v43 = vld [vmem:[%s10848_s2 + $0x138] ss:$48 sps:$4 sm:$0xff]   ;;  %v7554_v52 = vld [vmem:[%s10848_s2 + $0x19c] ss:$48 sps:$4 sm:$0xff]  }
 0x228   : > { %4658 = vmatpush1.bf16.msra.mxu1 %v7510_v11  ;;  %4877 = vmatpush1.bf16.msra.mxu0 %v7513_v62  ;;  %v7552_v11 = vld [vmem:[%s10848_s2 + $0x198] ss:$48 sps:$4 sm:$0xff]   ;;  %v7557_v62 = vld [vmem:[%s10848_s2 + $0x1fc] ss:$48 sps:$4 sm:$0xff]  }
 0x229   : > { %4659 = vmatprep.subr.bf16.mxu1 %v7518_v14  ;;  %4878 = vmatprep.subr.bf16.mxu0 %v7521_v2  ;;  %v7555_v14 = vld [vmem:[%s10848_s2 + $0x1f8] ss:$48 sps:$4 sm:$0xff]   ;;  %v7560_v2 = vld [vmem:[%s10848_s2 + $0x25c] ss:$48 sps:$4 sm:$0xff]  }
 0x22c   : > { %4660 = vmatpush1.bf16.msra.mxu1 %v7516_v42  ;;  %4879 = vmatpush1.bf16.msra.mxu0 %v7519_v16  ;;  %v7558_v42 = vld [vmem:[%s10848_s2 + $0x258] ss:$48 sps:$4 sm:$0xff]   ;;  %v7563_v16 = vld [vmem:[%s10848_s2 + $0x2bc] ss:$48 sps:$4 sm:$0xff]  }
 0x22d   : > { %4661 = vmatprep.subr.bf16.mxu1 %v7524_v61  ;;  %4880 = vmatprep.subr.bf16.mxu0 %v7527_v35  ;;  %v7561_v61 = vld [vmem:[%s10848_s2 + $0x2b8] ss:$48 sps:$4 sm:$0xff]   ;;  %v7566_v35 = vld [vmem:[%s10848_s2 + $0x31c] ss:$48 sps:$4 sm:$0xff]  }
 0x230   : > { %4662 = vmatpush1.bf16.msra.mxu1 %v7522_v56  ;;  %4881 = vmatpush1.bf16.msra.mxu0 %v7525_v23  ;;  %v7564_v56 = vld [vmem:[%s10848_s2 + $0x318] ss:$48 sps:$4 sm:$0xff]   ;;  %v7569_v23 = vld [vmem:[%s10848_s2 + $0x37c] ss:$48 sps:$4 sm:$0xff]  }
 0x231   : > { %4663 = vmatprep.subr.bf16.mxu1 %v7530_v33  ;;  %4882 = vmatprep.subr.bf16.mxu0 %v7533_v26  ;;  %v7567_v33 = vld [vmem:[%s10848_s2 + $0x378] ss:$48 sps:$4 sm:$0xff]   ;;  %v7572_v26 = vld [vmem:[%s10848_s2 + $0x3dc] ss:$48 sps:$4 sm:$0xff]  }
 0x234   : > { %4664 = vmatpush1.bf16.msra.mxu1 %v7528_v60  ;;  %4883 = vmatpush1.bf16.msra.mxu0 %v7531_v31  ;;  %v7570_v60 = vld [vmem:[%s10848_s2 + $0x3d8] ss:$48 sps:$4 sm:$0xff]   ;;  %v7575_v31 = vld [vmem:[%s10848_s2 + $0x43c] ss:$48 sps:$4 sm:$0xff]  }
 0x235   : > { %4665 = vmatprep.subr.bf16.mxu1 %v7536_v12  ;;  %4884 = vmatprep.subr.bf16.mxu0 %v7539_v30 }
 0x238   : > { %4666 = vmatpush1.bf16.msra.mxu1 %v7534_v49  ;;  %4885 = vmatpush1.bf16.msra.mxu0 %v7537_v54  ;;  %v7573_v54 = vld [vmem:[%s10848_s2 + $0x438] ss:$48 sps:$4 sm:$0xff]  }
 0x239   : > { %4781 = vmatprep.subr.bf16.mxu1 %v7542_v1 }
 0x23b   : > { %4668 = vmatmul.mubr.bf16.vlgmr.msra.gmra.mrb[48].mxu1 %v9243_v41  ;;  %4887 = vmatmul.mubr.bf16.vlgmr.msra.gmra.mrb[64].mxu0 %v9243_v41 }
 0x23c   : > { %4677 = vmatprep.mubr.bf16.mxu1 %v9319_v19  ;;  %4782 = vmatpush1.bf16.msra.mxu1 %v7540_v25  ;;  %v7578_v25 = vld [vmem:[%s10848_s2 + $0x49c] ss:$48 sps:$4 sm:$0xff]  }
 0x23d   : > { %4896 = vmatprep.mubr.bf16.mxu0 %v9319_v19  ;;  %4783 = vmatprep.subr.bf16.mxu1 %v7545_v34  ;;  %v7576_v34 = vld [vmem:[%s10848_s2 + $0x498] ss:$48 sps:$4 sm:$0xff]  }
 0x240   : > { %4784 = vmatpush1.bf16.msra.mxu1 %v7543_v0  ;;  %v7581_v0 = vld [vmem:[%s10848_s2 + $0x4fc] ss:$48 sps:$4 sm:$0xff]  }
 0x241   : > { %4785 = vmatprep.subr.bf16.mxu1 %v7548_v38 }
 0x243   : > { %4678 = vmatmul.mubr.bf16.gmra.mrb[52].mxu1 %v9312_v15  ;;  %4897 = vmatmul.mubr.bf16.gmra.mrb[68].mxu0 %v9312_v15 }
 0x244   : > { %4687 = vmatprep.mubr.bf16.mxu1 %v9395_v27  ;;  %4786 = vmatpush1.bf16.msra.mxu1 %v7546_v39 }
 0x245   : > { %4906 = vmatprep.mubr.bf16.mxu0 %v9395_v27  ;;  %4787 = vmatprep.subr.bf16.mxu1 %v7551_v9 }
 0x248   : > { %4788 = vmatpush1.bf16.msra.mxu1 %v7549_v43  ;;  %v7579_v43 = vld [vmem:[%s10848_s2 + $0x4f8] ss:$48 sps:$4 sm:$0xff]  }
 0x249   : > { %4789 = vmatprep.subr.bf16.mxu1 %v7554_v52 }
 0x24b   : > { %4688 = vmatmul.mubr.bf16.gmra.mrb[56].mxu1 %v9389_v8  ;;  %4907 = vmatmul.mubr.bf16.gmra.mrb[72].mxu0 %v9389_v8 }
 0x24c   : > { %4697 = vmatprep.mubr.bf16.mxu1 %v9423_v10  ;;  %4790 = vmatpush1.bf16.msra.mxu1 %v7552_v11  ;;  %v7584_v11 = vld [vmem:[%s10848_s2 + $0x55c] ss:$48 sps:$4 sm:$0xff]  }
 0x24d   : > { %4916 = vmatprep.mubr.bf16.mxu0 %v9423_v10  ;;  %4791 = vmatprep.subr.bf16.mxu1 %v7557_v62  ;;  %v7582_v62 = vld [vmem:[%s10848_s2 + $0x558] ss:$48 sps:$4 sm:$0xff]  }
 0x250   : > { %4792 = vmatpush1.bf16.msra.mxu1 %v7555_v14  ;;  %v7587_v14 = vld [vmem:[%s10848_s2 + $0x5bc] ss:$48 sps:$4 sm:$0xff]  }
 0x251   : > { %4793 = vmatprep.subr.bf16.mxu1 %v7560_v2 }
 0x253   : > { %4698 = vmatmul.mubr.bf16.gmra.mrb[60].mxu1 %v9404_v6  ;;  %4917 = vmatmul.mubr.bf16.gmra.mrb[76].mxu0 %v9404_v6 }
 0x254   : > { %4794 = vmatpush1.bf16.msra.mxu1 %v7558_v42  ;;  %4813 = vmatprep.mubr.bf16.mxu1 %v9250_v13 }
 0x255   : > { %4795 = vmatprep.subr.bf16.mxu1 %v7563_v16 }
 0x258   : > { %4796 = vmatpush1.bf16.msra.mxu1 %v7561_v61  ;;  %v7585_v61 = vld [vmem:[%s10848_s2 + $0x5b8] ss:$48 sps:$4 sm:$0xff]  }
 0x259   : > { %4797 = vmatprep.subr.bf16.mxu1 %v7566_v35 }
 0x25c   : > { %4798 = vmatpush1.bf16.msra.mxu1 %v7564_v56  ;;  %v7590_v56 = vld [vmem:[%s10848_s2 + $0x2c] ss:$48 sps:$4 sm:$0xff]  }
 0x25d   : > { %4799 = vmatprep.subr.bf16.mxu1 %v7569_v23  ;;  %v7588_v23 = vld [vmem:[%s10848_s2 + $0x28] ss:$48 sps:$4 sm:$0xff]  }
 0x260   : > { %4800 = vmatpush1.bf16.msra.mxu1 %v7567_v33  ;;  %v7593_v33 = vld [vmem:[%s10848_s2 + $0x8c] ss:$48 sps:$4 sm:$0xff]  }
 0x261   : > { %4801 = vmatprep.subr.bf16.mxu1 %v7572_v26  ;;  %v9635_v12 = vpop.f32.mrb[32].mxu0 }
 0x262   : > { %10925 = vst [vmem:[#allocation20_spill] sm:$0xff] %v9635_v12  ;;  %v9637_v30 = vpop.f32.mrb[33].mxu0 }
 0x263   : > { %10926 = vst [vmem:[#allocation21_spill] sm:$0xff] %v9637_v30  ;;  %v9639_v49 = vpop.f32.mrb[34].mxu0 }
 0x264   : > { %10927 = vst [vmem:[#allocation22_spill] sm:$0xff] %v9639_v49  ;;  %4802 = vmatpush1.bf16.msra.mxu1 %v7570_v60  ;;  %v9644_v1 = vpop.f32.mrb[35].mxu0 }
 0x265   : > { %10928 = vst [vmem:[#allocation23_spill] sm:$0xff] %v9644_v1  ;;  %4803 = vmatprep.subr.bf16.mxu1 %v7575_v31 }
 0x268   : > { %4804 = vmatpush1.bf16.msra.mxu1 %v7573_v54  ;;  %v7591_v54 = vld [vmem:[%s10848_s2 + $0x88] ss:$48 sps:$4 sm:$0xff]  }
 0x269   : > { %4805 = vmatprep.subr.bf16.mxu1 %v7578_v25  ;;  %v9655_v38 = vpop.f32.mrb[36].mxu0 }
 0x26a   : > { %10929 = vst [vmem:[#allocation24_spill] sm:$0xff] %v9655_v38  ;;  %v9657_v39 = vpop.f32.mrb[37].mxu0 }
 0x26b   : > { %10930 = vst [vmem:[#allocation25_spill] sm:$0xff] %v9657_v39  ;;  %v9659_v9 = vpop.f32.mrb[38].mxu0 }
 0x26c   : > { %10931 = vst [vmem:[#allocation26_spill] sm:$0xff] %v9659_v9  ;;  %4806 = vmatpush1.bf16.msra.mxu1 %v7576_v34  ;;  %v9664_v52 = vpop.f32.mrb[39].mxu0  ;;  %v7596_v34 = vld [vmem:[%s10848_s2 + $0xec] ss:$48 sps:$4 sm:$0xff]  }
 0x26d   : > { %10932 = vst [vmem:[#allocation27_spill] sm:$0xff] %v9664_v52  ;;  %4807 = vmatprep.subr.bf16.mxu1 %v7581_v0  ;;  %v7594_v0 = vld [vmem:[%s10848_s2 + $0xe8] ss:$48 sps:$4 sm:$0xff]  }
 0x270   : > { %4808 = vmatpush1.bf16.msra.mxu1 %v7579_v43  ;;  %v7599_v43 = vld [vmem:[%s10848_s2 + $0x14c] ss:$48 sps:$4 sm:$0xff]  }
 0x271   : > { %4809 = vmatprep.subr.bf16.mxu1 %v7584_v11  ;;  %v9675_v2 = vpop.f32.mrb[40].mxu0  ;;  %v7597_v11 = vld [vmem:[%s10848_s2 + $0x148] ss:$48 sps:$4 sm:$0xff]  }
 0x272   : > { %10933 = vst [vmem:[#allocation28_spill] sm:$0xff] %v9675_v2  ;;  %v9677_v42 = vpop.f32.mrb[41].mxu0 }
 0x273   : > { %10934 = vst [vmem:[#allocation29_spill] sm:$0xff] %v9677_v42  ;;  %v9679_v16 = vpop.f32.mrb[42].mxu0 }
 0x274   : > { %10935 = vst [vmem:[#allocation30_spill] sm:$0xff] %v9679_v16  ;;  %4810 = vmatpush1.bf16.msra.mxu1 %v7582_v62  ;;  %v9684_v35 = vpop.f32.mrb[43].mxu0  ;;  %v7602_v62 = vld [vmem:[%s10848_s2 + $0x1ac] ss:$48 sps:$4 sm:$0xff]  }
 0x275   : > { %10936 = vst [vmem:[#allocation31_spill] sm:$0xff] %v9684_v35  ;;  %4811 = vmatprep.subr.bf16.mxu1 %v7587_v14  ;;  %v7600_v14 = vld [vmem:[%s10848_s2 + $0x1a8] ss:$48 sps:$4 sm:$0xff]  }
 0x278   : > { %4812 = vmatpush1.bf16.msra.mxu1 %v7585_v61  ;;  %v7605_v61 = vld [vmem:[%s10848_s2 + $0x20c] ss:$48 sps:$4 sm:$0xff]  }
 0x279   : > { %4927 = vmatprep.subr.bf16.mxu1 %v7590_v56  ;;  %v9695_v26 = vpop.f32.mrb[44].mxu0  ;;  %v7603_v56 = vld [vmem:[%s10848_s2 + $0x208] ss:$48 sps:$4 sm:$0xff]  }
 0x27a   : > { %10937 = vst [vmem:[#allocation32_spill] sm:$0xff] %v9695_v26  ;;  %v9697_v60 = vpop.f32.mrb[45].mxu0 }
 0x27b   : > { %10938 = vst [vmem:[#allocation33_spill] sm:$0xff] %v9697_v60  ;;  %4814 = vmatmul.mubr.bf16.vlgmr.msra.gmra.mrb[64].mxu1 %v9243_v41  ;;  %v9700_v31 = vpop.f32.mrb[46].mxu0 }
 0x27c   : > { %10939 = vst [vmem:[#allocation34_spill] sm:$0xff] %v9700_v31  ;;  %4823 = vmatprep.mubr.bf16.mxu1 %v9319_v19  ;;  %4928 = vmatpush1.bf16.msra.mxu1 %v7588_v23  ;;  %v9706_v25 = vpop.f32.mrb[47].mxu0  ;;  %v7608_v23 = vld [vmem:[%s10848_s2 + $0x26c] ss:$48 sps:$4 sm:$0xff]  }
 0x27d   : > { %10940 = vst [vmem:[#allocation35_spill] sm:$0xff] %v9706_v25  ;;  %4929 = vmatprep.subr.bf16.mxu1 %v7593_v33  ;;  %v7606_v33 = vld [vmem:[%s10848_s2 + $0x268] ss:$48 sps:$4 sm:$0xff]  }
 0x280   : > { %4930 = vmatpush1.bf16.msra.mxu1 %v7591_v54  ;;  %v7611_v54 = vld [vmem:[%s10848_s2 + $0x2cc] ss:$48 sps:$4 sm:$0xff]  }
 0x281   : > { %4931 = vmatprep.subr.bf16.mxu1 %v7596_v34  ;;  %v7609_v34 = vld [vmem:[%s10848_s2 + $0x2c8] ss:$48 sps:$4 sm:$0xff]  }
 0x283   : > { %4824 = vmatmul.mubr.bf16.gmra.mrb[68].mxu1 %v9312_v15 }
 0x284   : > { %4833 = vmatprep.mubr.bf16.mxu1 %v9395_v27  ;;  %4932 = vmatpush1.bf16.msra.mxu1 %v7594_v0  ;;  %v7614_v0 = vld [vmem:[%s10848_s2 + $0x32c] ss:$48 sps:$4 sm:$0xff]  }
 0x285   : > { %4933 = vmatprep.subr.bf16.mxu1 %v7599_v43  ;;  %v7612_v43 = vld [vmem:[%s10848_s2 + $0x328] ss:$48 sps:$4 sm:$0xff]  }
 0x288   : > { %4934 = vmatpush1.bf16.msra.mxu1 %v7597_v11  ;;  %v7617_v11 = vld [vmem:[%s10848_s2 + $0x38c] ss:$48 sps:$4 sm:$0xff]  }
 0x289   : > { %4935 = vmatprep.subr.bf16.mxu1 %v7602_v62  ;;  %v7620_v62 = vld [vmem:[%s10848_s2 + $0x3ec] ss:$48 sps:$4 sm:$0xff]  }
 0x28b   : > { %4834 = vmatmul.mubr.bf16.gmra.mrb[72].mxu1 %v9389_v8 }
 0x28c   : > { %4843 = vmatprep.mubr.bf16.mxu1 %v9423_v10  ;;  %4936 = vmatpush1.bf16.msra.mxu1 %v7600_v14  ;;  %v7618_v14 = vld [vmem:[%s10848_s2 + $0x3e8] ss:$48 sps:$4 sm:$0xff]  }
 0x28d   : > { %4937 = vmatprep.subr.bf16.mxu1 %v7605_v61  ;;  %v7623_v61 = vld [vmem:[%s10848_s2 + $0x44c] ss:$48 sps:$4 sm:$0xff]  }
 0x290   : > { %4938 = vmatpush1.bf16.msra.mxu1 %v7603_v56  ;;  %v7621_v56 = vld [vmem:[%s10848_s2 + $0x448] ss:$48 sps:$4 sm:$0xff]  }
 0x291   : > { %4939 = vmatprep.subr.bf16.mxu1 %v7608_v23  ;;  %v7626_v23 = vld [vmem:[%s10848_s2 + $0x4ac] ss:$48 sps:$4 sm:$0xff]  }
 0x293   : > { %4844 = vmatmul.mubr.bf16.gmra.mrb[76].mxu1 %v9404_v6 }
 0x294   : > { %4940 = vmatpush1.bf16.msra.mxu1 %v7606_v33  ;;  %4959 = vmatprep.mubr.bf16.mxu1 %v9250_v13  ;;  %v7615_v13 = vld [vmem:[%s10848_s2 + $0x388] ss:$48 sps:$4 sm:$0xff]  }
 0x295   : > { %4941 = vmatprep.subr.bf16.mxu1 %v7611_v54  ;;  %v7624_v33 = vld [vmem:[%s10848_s2 + $0x4a8] ss:$48 sps:$4 sm:$0xff]   ;;  %v7629_v54 = vld [vmem:[%s10848_s2 + $0x50c] ss:$48 sps:$4 sm:$0xff]  }
 0x298   : > { %4942 = vmatpush1.bf16.msra.mxu1 %v7609_v34  ;;  %v7627_v34 = vld [vmem:[%s10848_s2 + $0x508] ss:$48 sps:$4 sm:$0xff]  }
 0x299   : > { %4943 = vmatprep.subr.bf16.mxu1 %v7614_v0  ;;  %v7632_v0 = vld [vmem:[%s10848_s2 + $0x56c] ss:$48 sps:$4 sm:$0xff]  }
 0x29c   : > { %4944 = vmatpush1.bf16.msra.mxu1 %v7612_v43  ;;  %v7630_v43 = vld [vmem:[%s10848_s2 + $0x568] ss:$48 sps:$4 sm:$0xff]  }
 0x29d   : > { %4945 = vmatprep.subr.bf16.mxu1 %v7617_v11  ;;  %v7635_v11 = vld [vmem:[%s10848_s2 + $0x5cc] ss:$48 sps:$4 sm:$0xff]  }
 0x2a0   : > { %4946 = vmatpush1.bf16.msra.mxu1 %v7615_v13  ;;  %v7633_v13 = vld [vmem:[%s10848_s2 + $0x5c8] ss:$48 sps:$4 sm:$0xff]  }
 0x2a1   : > { %4947 = vmatprep.subr.bf16.mxu1 %v7620_v62 }
 0x2a4   : > { %4948 = vmatpush1.bf16.msra.mxu1 %v7618_v14 }
 0x2a5   : > { %4949 = vmatprep.subr.bf16.mxu1 %v7623_v61 }
 0x2a8   : > { %4950 = vmatpush1.bf16.msra.mxu1 %v7621_v56 }
 0x2a9   : > { %4951 = vmatprep.subr.bf16.mxu1 %v7626_v23 }
 0x2ac   : > { %4952 = vmatpush1.bf16.msra.mxu1 %v7624_v33 }
 0x2ad   : > { %4953 = vmatprep.subr.bf16.mxu1 %v7629_v54 }
 0x2b0   : > { %4954 = vmatpush1.bf16.msra.mxu1 %v7627_v34 }
 0x2b1   : > { %4955 = vmatprep.subr.bf16.mxu1 %v7632_v0 }
 0x2b4   : > { %4956 = vmatpush1.bf16.msra.mxu1 %v7630_v43 }
 0x2b5   : > { %4957 = vmatprep.subr.bf16.mxu1 %v7635_v11 }
 0x2b8   : > { %4958 = vmatpush1.bf16.msra.mxu1 %v7633_v13 }
 0x2bb   : > { %4960 = vmatmul.mubr.bf16.vlgmr.msra.gmra.mrb[80].mxu1 %v9243_v41 }
 0x2bc   : > { %4969 = vmatprep.mubr.bf16.mxu1 %v9319_v19 }
 0x2c3   : > { %4970 = vmatmul.mubr.bf16.gmra.mrb[84].mxu1 %v9312_v15 }
 0x2c4   : > { %4979 = vmatprep.mubr.bf16.mxu1 %v9395_v27 }
 0x2cb   : > { %4980 = vmatmul.mubr.bf16.gmra.mrb[88].mxu1 %v9389_v8 }
 0x2cc   : > { %4989 = vmatprep.mubr.bf16.mxu1 %v9423_v10 }
 0x2cd   : > { %v9804_v62 = vpop.f32.mrb[32].mxu1  ;;  %v9806_v14 = vpop.f32.mrb[48].mxu0 }
 0x2ce   : > { %v9808_v61 = vpop.f32.mrb[33].mxu1  ;;  %v9810_v56 = vpop.f32.mrb[49].mxu0  ;;  %v10855_v19 = vrot.slane %v9804_v62, 7 }
 0x2cf   : > { %v4600_v23 = vpop.f32.mrb[34].mxu1  ;;  %v4746_v41 = vpop.f32.mrb[50].mxu0  ;;  %v10856_v27 = vrot.slane %v9808_v61, 7 }
 0x2d0   : > { %v5004_v33 = vrot.slane %v4600_v23, 7  ;;  %v4602_v15 = vpop.f32.mrb[35].mxu1  ;;  %v4748_v54 = vpop.f32.mrb[51].mxu0 }
 0x2d1   : > { %v5005_v8 = vrot.slane %v4602_v15, 7 }
 0x2d2   : > { %v5056_v10 = vsel %vm3170_vm0, %v10855_v19, %v5004_v33 }
 0x2d3   : > { %v9818_v34 = vadd.f32 %v5056_v10, %v4746_v41  ;;  %v5057_v0 = vsel %vm3170_vm0, %v10856_v27, %v5005_v8  ;;  %4990 = vmatmul.mubr.bf16.gmra.mrb[92].mxu1 %v9404_v6 }
 0x2d4   : > { %v9825_v43 = vadd.f32 %v5057_v0, %v4748_v54 }
 0x2d5   : > { %v4606_v11 = vpop.f32.mrb[36].mxu1  ;;  %v4752_v13 = vpop.f32.mrb[52].mxu0 }
 0x2d6   : > { %v5008_v23 = vrot.slane %v4606_v11, 7  ;;  %v4608_v15 = vpop.f32.mrb[37].mxu1  ;;  %v4754_v25 = vpop.f32.mrb[53].mxu0 }
 0x2d7   : > { %v5009_v31 = vrot.slane %v4608_v15, 7  ;;  %v4610_v60 = vpop.f32.mrb[38].mxu1  ;;  %v4756_v26 = vpop.f32.mrb[54].mxu0 }
 0x2d8   : > { %v5052_v41 = vsel %vm3170_vm0, %v5004_v33, %v5008_v23  ;;  %v5012_v10 = vrot.slane %v4610_v60, 7  ;;  %v4612_v19 = vpop.f32.mrb[39].mxu1  ;;  %v4758_v35 = vpop.f32.mrb[55].mxu0 }
 0x2d9   : > { %v5072_v27 = vsel %vm8868_vm1, %v5052_v41, 0.0  ;;  %v5053_v6 = vsel %vm3170_vm0, %v5005_v8, %v5009_v31  ;;  %v5013_v54 = vrot.slane %v4612_v19, 7 }
 0x2da   : > { %v9833_v0 = vadd.f32 %v5072_v27, %v4752_v13  ;;  %v5073_v11 = vsel %vm8868_vm1, %v5053_v6, 0.0  ;;  %v5048_v15 = vsel %vm3170_vm0, %v5008_v23, %v5012_v10 }
 0x2db   : > { %v9839_v16 = vadd.f32 %v5073_v11, %v4754_v25  ;;  %v9841_v60 = vadd.f32 %v5048_v15, %v4756_v26  ;;  %v5049_v33 = vsel %vm3170_vm0, %v5009_v31, %v5013_v54 }
 0x2dc   : > { %v9845_v41 = vadd.f32 %v5049_v33, %v4758_v35 }
 0x2de   : > { %v4616_v42 = vpop.f32.mrb[40].mxu1  ;;  %v4762_v8 = vpop.f32.mrb[56].mxu0 }
 0x2df   : > { %v5016_v19 = vrot.slane %v4616_v42, 7  ;;  %v4618_v27 = vpop.f32.mrb[41].mxu1  ;;  %v4764_v13 = vpop.f32.mrb[57].mxu0 }
 0x2e0   : > { %v5017_v2 = vrot.slane %v4618_v27, 7  ;;  %v4620_v52 = vpop.f32.mrb[42].mxu1  ;;  %v4766_v6 = vpop.f32.mrb[58].mxu0 }
 0x2e1   : > { %v5044_v23 = vsel %vm3170_vm0, %v5012_v10, %v5016_v19  ;;  %v5020_v25 = vrot.slane %v4620_v52, 7  ;;  %v4622_v11 = vpop.f32.mrb[43].mxu1  ;;  %v4768_v26 = vpop.f32.mrb[59].mxu0 }
 0x2e2   : > { %v5080_v15 = vsel %vm8917_vm2, %v5044_v23, 0.0  ;;  %v5045_v35 = vsel %vm3170_vm0, %v5013_v54, %v5017_v2  ;;  %v5021_v31 = vrot.slane %v4622_v11, 7 }
 0x2e3   : > { %v9853_v33 = vadd.f32 %v5080_v15, %v4762_v8  ;;  %v5081_v42 = vsel %vm8917_vm2, %v5045_v35, 0.0  ;;  %v5040_v27 = vsel %vm3170_vm0, %v5016_v19, %v5020_v25 }
 0x2e4   : > { %v9859_v9 = vadd.f32 %v5081_v42, %v4764_v13  ;;  %v9861_v52 = vadd.f32 %v5040_v27, %v4766_v6  ;;  %v5041_v10 = vsel %vm3170_vm0, %v5017_v2, %v5021_v31 }
 0x2e5   : > { %v9865_v23 = vadd.f32 %v5041_v10, %v4768_v26 }
 0x2e6   : > { %v4626_v39 = vpop.f32.mrb[44].mxu1  ;;  %v4772_v54 = vpop.f32.mrb[60].mxu0 }
 0x2e7   : > { %v5024_v11 = vrot.slane %v4626_v39, 7  ;;  %v4628_v8 = vpop.f32.mrb[45].mxu1  ;;  %v4774_v15 = vpop.f32.mrb[61].mxu0 }
 0x2e8   : > { %v5025_v38 = vrot.slane %v4628_v8, 7  ;;  %v4630_v1 = vpop.f32.mrb[46].mxu1  ;;  %v4776_v35 = vpop.f32.mrb[62].mxu0  ;;  %v10941_v8 = vrot.slane %v9804_v62, 7 }
 0x2e9   : > { %v5036_v19 = vsel %vm3170_vm0, %v5020_v25, %v5024_v11  ;;  %v5028_v13 = vrot.slane %v4630_v1, 7  ;;  %v4632_v42 = vpop.f32.mrb[47].mxu1  ;;  %v4778_v6 = vpop.f32.mrb[63].mxu0 }
 0x2ea   : > { %v5088_v27 = vsel %vm8964_vm3, %v5036_v19, 0.0  ;;  %v5037_v2 = vsel %vm3170_vm0, %v5021_v31, %v5025_v38  ;;  %v5029_v26 = vrot.slane %v4632_v42, 7 }
 0x2eb   : > { %v9873_v10 = vadd.f32 %v5088_v27, %v4772_v54  ;;  %v5089_v39 = vsel %vm8964_vm3, %v5037_v2, 0.0  ;;  %v5060_v25 = vsel %vm3170_vm0, %v5028_v13, %v10941_v8  ;;  %v5032_v1 = vsel %vm3170_vm0, %v5024_v11, %v5028_v13 }
 0x2ec   : > { %v9883_v49 = vadd.f32 %v5089_v39, %v4774_v15  ;;  %v5064_v19 = vsel %vm8971_vm4, %v5060_v25, 0.0  ;;  %v9887_v31 = vadd.f32 %v5032_v1, %v4776_v35  ;;  %v10942_v54 = vrot.slane %v9808_v61, 7 }
 0x2ed   : > { %v5192_v62 = vadd.f32 %v5064_v19, %v9806_v14  ;;  %v5033_v11 = vsel %vm3170_vm0, %v5025_v38, %v5029_v26 }
 0x2ee   : > { %v5061_v42 = vsel %vm3170_vm0, %v5029_v26, %v10942_v54  ;;  %v9899_v13 = vadd.f32 %v5033_v11, %v4778_v6 }
 0x2ef   : > { %v5065_v27 = vsel %vm8971_vm4, %v5061_v42, 0.0 }
 0x2f0   : > { %v5193_v15 = vadd.f32 %v5065_v27, %v9810_v56 }
 0x30e   : > { %v9901_v2 = vpop.f32.mrb[48].mxu1  ;;  %v9903_v35 = vpop.f32.mrb[64].mxu0 }
 0x30f   : > { %v9905_v61 = vpop.f32.mrb[49].mxu1  ;;  %v9907_v39 = vpop.f32.mrb[65].mxu0  ;;  %v10858_v25 = vrot.slane %v9901_v2, 7  ;;  %v10857_v1 = vrot.slane %v9903_v35, 1 }
 0x310   : > { %v4673_v8 = vpop.f32.mrb[50].mxu1  ;;  %v4892_v14 = vpop.f32.mrb[66].mxu0  ;;  %v10860_v6 = vrot.slane %v9905_v61, 7  ;;  %v10859_v54 = vrot.slane %v9907_v39, 1 }
 0x311   : > { %v5006_v19 = vrot.slane %v4673_v8, 7  ;;  %v5100_v38 = vrot.slane %v4892_v14, 1  ;;  %v4675_v26 = vpop.f32.mrb[51].mxu1  ;;  %v4894_v56 = vpop.f32.mrb[67].mxu0 }
 0x312   : > { %v5007_v42 = vrot.slane %v4675_v26, 7  ;;  %v5101_v27 = vrot.slane %v4894_v56, 1 }
 0x313   : > { %v5152_v11 = vsel %vm3235_vm5, %v10857_v1, %v5100_v38  ;;  %v9921_v30 = vsel %vm3170_vm0, %v10858_v25, %v5006_v19 }
 0x314   : > { %v9923_v8 = vadd.f32 %v5192_v62, %v5152_v11  ;;  %v5153_v14 = vsel %vm3235_vm5, %v10859_v54, %v5101_v27  ;;  %v9933_v26 = vsel %vm3170_vm0, %v10860_v6, %v5007_v42 }
 0x315   : > { %v9935_v56 = vadd.f32 %v5193_v15, %v5153_v14 }
 0x316   : > { %v4679_v1 = vpop.f32.mrb[52].mxu1  ;;  %v4898_v12 = vpop.f32.mrb[68].mxu0 }
 0x317   : > { %v5010_v53 = vrot.slane %v4679_v1, 7  ;;  %v5104_v25 = vrot.slane %v4898_v12, 1  ;;  %v4681_v18 = vpop.f32.mrb[53].mxu1  ;;  %v4900_v62 = vpop.f32.mrb[69].mxu0 }
 0x318   : > { %v5105_v11 = vrot.slane %v4900_v62, 1  ;;  %v4683_v20 = vpop.f32.mrb[54].mxu1  ;;  %v4902_v57 = vpop.f32.mrb[70].mxu0  ;;  %v5011_v58 = vrot.slane %v4681_v18, 7 }
 0x319   : > { %v5148_v54 = vsel %vm3235_vm5, %v5100_v38, %v5104_v25  ;;  %v5014_v36 = vrot.slane %v4683_v20, 7  ;;  %v5108_v37 = vrot.slane %v4902_v57, 1  ;;  %v9939_v3 = vpop.f32.mrb[55].mxu1  ;;  %v4904_v6 = vpop.f32.mrb[71].mxu0  ;;  %v9955_v20 = vsel %vm3170_vm0, %v5006_v19, %v5010_v53 }
 0x31a   : > { %v5164_v15 = vsel %vm9187_vm6, %v5148_v54, 0.0  ;;  %v5149_v12 = vsel %vm3235_vm5, %v5101_v27, %v5105_v11  ;;  %v10861_v1 = vrot.slane %v9939_v3, 7  ;;  %v5109_v14 = vrot.slane %v4904_v6, 1 }
 0x31b   : > { %v9947_v62 = vadd.f32 %v9818_v34, %v5164_v15  ;;  %v5165_v18 = vsel %vm9187_vm6, %v5149_v12, 0.0  ;;  %v5144_v57 = vsel %vm3235_vm5, %v5104_v25, %v5108_v37  ;;  %v9970_v27 = vsel %vm3170_vm0, %v5007_v42, %v5011_v58 }
 0x31c   : > { %v9958_v38 = vadd.f32 %v9825_v43, %v5165_v18  ;;  %v9961_v54 = vadd.f32 %v9833_v0, %v5144_v57  ;;  %v5145_v34 = vsel %vm3235_vm5, %v5105_v11, %v5109_v14  ;;  %v9974_v25 = vsel %vm3170_vm0, %v5010_v53, %v5014_v36 }
 0x31d   : > { %v9966_v6 = vadd.f32 %v9839_v16, %v5145_v34  ;;  %v9982_v0 = vsel %vm3170_vm0, %v5011_v58, %v10861_v1  ;;  %v5075_v45 = vsel %vm8868_vm1, %v9970_v27, 0.0 }
 0x31e   : > { %v9976_v19 = vpop.f32.mrb[56].mxu1  ;;  %v4908_v43 = vpop.f32.mrb[72].mxu0 }
 0x31f   : > { %v5112_v11 = vrot.slane %v4908_v43, 1  ;;  %v4691_v16 = vpop.f32.mrb[57].mxu1  ;;  %v4910_v15 = vpop.f32.mrb[73].mxu0  ;;  %v5018_v57 = vrot.slane %v9976_v19, 7 }
 0x320   : > { %v5113_v12 = vrot.slane %v4910_v15, 1  ;;  %v4693_v18 = vpop.f32.mrb[58].mxu1  ;;  %v4912_v42 = vpop.f32.mrb[74].mxu0 }
 0x321   : > { %v5140_v53 = vsel %vm3235_vm5, %v5108_v37, %v5112_v11  ;;  %v4695_v34 = vpop.f32.mrb[59].mxu1  ;;  %v4914_v48 = vpop.f32.mrb[75].mxu0  ;;  %v5116_v1 = vrot.slane %v4912_v42, 1 }
 0x322   : > { %v5172_v40 = vsel %vm9223_vm7, %v5140_v53, 0.0  ;;  %v5141_v58 = vsel %vm3235_vm5, %v5109_v14, %v5113_v12  ;;  %v5117_v32 = vrot.slane %v4914_v48, 1  ;;  %v10006_v14 = vsel %vm3170_vm0, %v5014_v36, %v5018_v57 }
 0x323   : > { %v9992_v43 = vadd.f32 %v9841_v60, %v5172_v40  ;;  %v5173_v15 = vsel %vm9223_vm7, %v5141_v58, 0.0  ;;  %v5136_v37 = vsel %vm3235_vm5, %v5112_v11, %v5116_v1  ;;  %v5082_v27 = vsel %vm8917_vm2, %v10006_v14, 0.0 }
 0x324   : > { %v9997_v19 = vadd.f32 %v9845_v41, %v5173_v15  ;;  %v10002_v55 = vadd.f32 %v9853_v33, %v5136_v37  ;;  %v5137_v40 = vsel %vm3235_vm5, %v5113_v12, %v5117_v32 }
 0x325   : > { %v10011_v53 = vadd.f32 %v9859_v9, %v5137_v40 }
 0x326   : > { %v4699_v60 = vpop.f32.mrb[60].mxu1  ;;  %v4918_v42 = vpop.f32.mrb[76].mxu0 }
 0x327   : > { %v4701_v41 = vpop.f32.mrb[61].mxu1  ;;  %v4920_v58 = vpop.f32.mrb[77].mxu0  ;;  %v5120_v15 = vrot.slane %v4918_v42, 1 }
 0x328   : > { %v4703_v11 = vpop.f32.mrb[62].mxu1  ;;  %v4922_v48 = vpop.f32.mrb[78].mxu0  ;;  %v5121_v5 = vrot.slane %v4920_v58, 1 }
 0x329   : > { %v4705_v63 = vpop.f32.mrb[63].mxu1  ;;  %v4924_v33 = vpop.f32.mrb[79].mxu0  ;;  %v5132_v37 = vsel %vm3235_vm5, %v5116_v1, %v5120_v15  ;;  %v5124_v50 = vrot.slane %v4922_v48, 1 }
 0x32a   : > { %v5180_v36 = vsel %vm9274_vm8, %v5132_v37, 0.0  ;;  %v5133_v9 = vsel %vm3235_vm5, %v5117_v32, %v5121_v5  ;;  %v5125_v40 = vrot.slane %v4924_v33, 1  ;;  %v10943_v37 = vrot.slane %v9903_v35, 1 }
 0x32b   : > { %v10018_v12 = vadd.f32 %v9861_v52, %v5180_v36  ;;  %v5181_v42 = vsel %vm9274_vm8, %v5133_v9, 0.0  ;;  %v5128_v44 = vsel %vm3235_vm5, %v5120_v15, %v5124_v50  ;;  %v5030_v33 = vrot.slane %v4703_v11, 7 }
 0x32c   : > { %v10027_v1 = vadd.f32 %v9865_v23, %v5181_v42  ;;  %v5156_v52 = vsel %vm3235_vm5, %v5124_v50, %v10943_v37  ;;  %v10034_v58 = vadd.f32 %v9873_v10, %v5128_v44  ;;  %v5129_v48 = vsel %vm3235_vm5, %v5121_v5, %v5125_v40 }
 0x32d   : > { %v5188_v32 = vsel %vm9280_vm9, %v5156_v52, 0.0  ;;  %v5031_v23 = vrot.slane %v4705_v63, 7  ;;  %v10944_v36 = vrot.slane %v9907_v39, 1  ;;  %v10048_v50 = vadd.f32 %v9883_v49, %v5129_v48 }
 0x32e   : > { %v10041_v15 = vadd.f32 %v9887_v31, %v5188_v32  ;;  %v5019_v44 = vrot.slane %v4691_v16, 7  ;;  %v5022_v10 = vrot.slane %v4693_v18, 7  ;;  %v5023_v9 = vrot.slane %v4695_v34, 7 }
 0x32f   : > { %v5157_v35 = vsel %vm3235_vm5, %v5125_v40, %v10944_v36  ;;  %v10945_v31 = vrot.slane %v9901_v2, 7  ;;  %v5026_v39 = vrot.slane %v4699_v60, 7  ;;  %v5027_v11 = vrot.slane %v4701_v41, 7 }
 0x330   : > { %v5189_v42 = vsel %vm9280_vm9, %v5157_v35, 0.0  ;;  %v10946_v40 = vrot.slane %v9905_v61, 7  ;;  %v10947_v16 = vrot.slane %v9939_v3, 7  ;;  %v5043_v2 = vsel %vm3170_vm0, %v5019_v44, %v5023_v9 }
 0x331   : > { %v10053_v5 = vadd.f32 %v9899_v13, %v5189_v42  ;;  %v5062_v63 = vsel %vm3170_vm0, %v5030_v33, %v10945_v31  ;;  %v5042_v13 = vsel %vm3170_vm0, %v5018_v57, %v5022_v10  ;;  %v5038_v34 = vsel %vm3170_vm0, %v5022_v10, %v5026_v39 }
 0x332   : > { %v5063_v49 = vsel %vm3170_vm0, %v5031_v23, %v10946_v40  ;;  %v5047_v18 = vsel %vm3170_vm0, %v10947_v16, %v5019_v44  ;;  %v5039_v61 = vsel %vm3170_vm0, %v5023_v9, %v5027_v11  ;;  %v5034_v60 = vsel %vm3170_vm0, %v5026_v39, %v5030_v33 }
 0x333   : > { %v5035_v3 = vsel %vm3170_vm0, %v5027_v11, %v5031_v23  ;;  %v5066_v37 = vsel %vm8971_vm4, %v5062_v63, 0.0  ;;  %v5067_v32 = vsel %vm8971_vm4, %v5063_v49, 0.0  ;;  %v5074_v10 = vsel %vm8868_vm1, %v9955_v20, 0.0  ;;  %v10112_v20 = vld [vmem:[%s10850_s4] sm:$0x77] }
 0x334   : > { %10948 = vst [vmem:[#allocation36_spill] sm:$0xff] %v10112_v20  ;;  %v10115_v11 = vsub.s32 4, %v8803_v51  ;;  %v5083_v49 = vsel %vm8917_vm2, %v5047_v18, 0.0  ;;  %v10127_v16 = vsub.s32 5, %v8803_v51  ;;  %v5331_v4 = vrot.slane %v10112_v20, %v9154_v28 }
 0x336   : > { %10949 = vst [vmem:[#allocation37_spill] sm:$0xff] %v10115_v11  ;;  %10950 = vst [vmem:[#allocation38_spill] sm:$0xff] %v10127_v16  ;;  %v5267_v14 = vrot.slane %v10112_v20, %v10115_v11  ;;  %v5335_v18 = vrot.slane %v10112_v20, %v10127_v16 }
 0x34e   : > { %v4815_v41 = vpop.f32.mrb[64].mxu1 }
 0x34f   : > { %v10081_v57 = vadd.f32 %v5066_v37, %v4815_v41  ;;  %v4817_v52 = vpop.f32.mrb[65].mxu1 }
 0x350   : > { %v10085_v48 = vadd.f32 %v5067_v32, %v4817_v52  ;;  %v4819_v36 = vpop.f32.mrb[66].mxu1 }
 0x351   : > { %v10088_v35 = vadd.f32 %v9921_v30, %v4819_v36  ;;  %v4821_v33 = vpop.f32.mrb[67].mxu1 }
 0x352   : > { %v10091_v44 = vadd.f32 %v9933_v26, %v4821_v33 }
 0x356   : > { %v4825_v23 = vpop.f32.mrb[68].mxu1 }
 0x357   : > { %v10096_v9 = vadd.f32 %v5074_v10, %v4825_v23  ;;  %v4827_v42 = vpop.f32.mrb[69].mxu1  ;;  %v5287_v10 = vrot.slane %v5267_v14, %v9138_v17 }
 0x358   : > { %v10101_v31 = vadd.f32 %v5075_v45, %v4827_v42  ;;  %v4829_v30 = vpop.f32.mrb[70].mxu1  ;;  %v5090_v45 = vsel %vm8964_vm3, %v5038_v34, 0.0 }
 0x359   : > { %v10104_v63 = vadd.f32 %v9974_v25, %v4829_v30  ;;  %v4831_v26 = vpop.f32.mrb[71].mxu1  ;;  %v5263_v25 = vrot.slane %v10112_v20, %v9138_v17  ;;  %v5305_v46 = vmul.f32 %v5287_v10, %v9966_v6 }
 0x35a   : > { %v10107_v39 = vadd.f32 %v9982_v0, %v4831_v26 }
 0x35b   : > { %v5283_v33 = vrot.slane %v5263_v25, %v9138_v17  ;;  %v5309_v25 = vmul.f32 %v5287_v10, %v9997_v19  ;;  %v5317_v19 = vmul.f32 %v5287_v10, %v10027_v1 }
 0x35d   : > { %v5308_v23 = vmul.f32 %v5283_v33, %v9992_v43  ;;  %v5304_v30 = vmul.f32 %v5283_v33, %v9961_v54  ;;  %v5355_v43 = vrot.slane %v5335_v18, %v9154_v28  ;;  %v5324_v54 = vmul.f32 %v5283_v33, %v10041_v15 }
 0x35e   : > { %v4835_v22 = vpop.f32.mrb[72].mxu1  ;;  %v5296_v6 = vmul.f32 %v5283_v33, %v9923_v8  ;;  %v5321_v8 = vmul.f32 %v5287_v10, %v10048_v50 }
 0x35f   : > { %v10122_v40 = vadd.f32 %v5082_v27, %v4835_v22  ;;  %v4837_v0 = vpop.f32.mrb[73].mxu1  ;;  %v5091_v27 = vsel %vm8964_vm3, %v5039_v61, 0.0 }
 0x360   : > { %v10129_v41 = vadd.f32 %v5083_v49, %v4837_v0  ;;  %v4839_v37 = vpop.f32.mrb[74].mxu1 }
 0x361   : > { %v10131_v52 = vadd.f32 %v5042_v13, %v4839_v37  ;;  %v4841_v32 = vpop.f32.mrb[75].mxu1  ;;  %v5316_v13 = vmul.f32 %v5283_v33, %v10018_v12  ;;  %v5312_v12 = vmul.f32 %v5283_v33, %v10002_v55  ;;  %v5320_v37 = vmul.f32 %v5283_v33, %v10034_v58 }
 0x362   : > { %v10135_v36 = vadd.f32 %v5043_v2, %v4841_v32  ;;  %v5351_v2 = vrot.slane %v5331_v4, %v9154_v28  ;;  %v5300_v55 = vmul.f32 %v5283_v33, %v9947_v62  ;;  %v10174_v58 = vadd.f32 %v5355_v43, %v5309_v25 }
 0x363   : > { %v5297_v62 = vmul.f32 %v5287_v10, %v9935_v56 }
 0x364   : > { %v10158_v34 = vadd.f32 %v5351_v2, %v5308_v23  ;;  %v10165_v61 = vadd.f32 %v5351_v2, %v5316_v13  ;;  %v10171_v18 = vadd.f32 %v5351_v2, %v5304_v30  ;;  %v5301_v23 = vmul.f32 %v5287_v10, %v9958_v38  ;;  %10954 = vst [vmem:[#allocation42_spill] sm:$0xff] %v10174_v58 }
 0x365   : > { %v10176_v15 = vadd.f32 %v5351_v2, %v5312_v12  ;;  %v10182_v1 = vadd.f32 %v5351_v2, %v5320_v37  ;;  %v10193_v30 = vadd.f32 %v5351_v2, %v5300_v55  ;;  %v10203_v56 = vadd.f32 %v5351_v2, %v5296_v6 }
 0x366   : > { %v4845_v42 = vpop.f32.mrb[76].mxu1  ;;  %10951 = vst [vmem:[#allocation39_spill] sm:$0xff] %v10158_v34  ;;  %10952 = vst [vmem:[#allocation40_spill] sm:$0xff] %v10165_v61  ;;  %v5424_v13 = vadd.f32 %v10158_v34, %v10171_v18  ;;  %v10197_v33 = vadd.f32 %v5355_v43, %v5301_v23 }
 0x367   : > { %v10149_v26 = vadd.f32 %v5090_v45, %v4845_v42  ;;  %v4847_v22 = vpop.f32.mrb[77].mxu1  ;;  %10953 = vst [vmem:[#allocation41_spill] sm:$0xff] %v10171_v18  ;;  %10955 = vst [vmem:[#allocation43_spill] sm:$0xff] %v10176_v15  ;;  %v10187_v42 = vadd.f32 %v5355_v43, %v5305_v46  ;;  %v5452_v38 = vadd.f32 %v10165_v61, %v10176_v15 }
 0x368   : > { %v10156_v0 = vadd.f32 %v5091_v27, %v4847_v22  ;;  %v4849_v49 = vpop.f32.mrb[78].mxu1  ;;  %10956 = vst [vmem:[#allocation44_spill] sm:$0xff] %v10182_v1  ;;  %v10191_v45 = vadd.f32 %v5355_v43, %v5317_v19  ;;  %10960 = vst [vmem:[#allocation48_spill] sm:$0xff] %v10193_v30  ;;  %v5425_v25 = vrot.slane %v5424_v13, 4 }
 0x369   : > { %v10162_v32 = vadd.f32 %v5034_v60, %v4849_v49  ;;  %v4851_v14 = vpop.f32.mrb[79].mxu1  ;;  %v5313_v60 = vmul.f32 %v5287_v10, %v10011_v53  ;;  %10958 = vst [vmem:[#allocation46_spill] sm:$0xff] %v10187_v42  ;;  %v5325_v53 = vmul.f32 %v5287_v10, %v10053_v5  ;;  %10961 = vst [vmem:[#allocation49_spill] sm:$0xff] %v10197_v33  ;;  %v5453_v37 = vrot.slane %v5452_v38, 4 }
 0x36a   : > { %v10168_v4 = vadd.f32 %v5035_v3, %v4851_v14  ;;  %v10184_v3 = vadd.f32 %v5351_v2, %v5324_v54  ;;  %10959 = vst [vmem:[#allocation47_spill] sm:$0xff] %v10191_v45  ;;  %v5431_v22 = vadd.f32 %v10174_v58, %v10187_v42  ;;  %10963 = vst [vmem:[#allocation51_spill] sm:$0xff] %v10203_v56 }
 0x36b   : > { %v10201_v27 = vadd.f32 %v5355_v43, %v5313_v60  ;;  %v10207_v49 = vadd.f32 %v5355_v43, %v5297_v62  ;;  %v5396_v5 = vadd.f32 %v10193_v30, %v10203_v56  ;;  %v10213_v10 = vadd.f32 %v5355_v43, %v5321_v8 }
 0x36c   : > { %10957 = vst [vmem:[#allocation45_spill] sm:$0xff] %v10184_v3  ;;  %v5480_v12 = vadd.f32 %v10184_v3, %v10182_v1  ;;  %v10215_v54 = vadd.f32 %v5355_v43, %v5325_v53  ;;  %v5432_v14 = vrot.slane %v5431_v22, 4  ;;  %v5426_v46 = vadd.f32 %v5425_v25, %v5424_v13 }
 0x36d   : > { %10962 = vst [vmem:[#allocation50_spill] sm:$0xff] %v10201_v27  ;;  %10964 = vst [vmem:[#allocation52_spill] sm:$0xff] %v10207_v49  ;;  %v5459_v50 = vadd.f32 %v10191_v45, %v10201_v27  ;;  %v5403_v2 = vadd.f32 %v10197_v33, %v10207_v49  ;;  %v5454_v55 = vadd.f32 %v5453_v37, %v5452_v38  ;;  %v5397_v60 = vrot.slane %v5396_v5, 4 }
 0x36e   : > { %10965 = vst [vmem:[#allocation53_spill] sm:$0xff] %v10213_v10  ;;  %10966 = vst [vmem:[#allocation54_spill] sm:$0xff] %v10215_v54  ;;  %v5481_v19 = vrot.slane %v5480_v12, 4  ;;  %v5487_v6 = vadd.f32 %v10215_v54, %v10213_v10  ;;  %v5433_v3 = vadd.f32 %v5432_v14, %v5431_v22  ;;  %v5427_v1 = vrot.slane %v5426_v46, 2  ;;  %v10224_v22 = vld [vmem:[%s10851_s5] sm:$0xff] }
 0x36f   : > { %v5460_v23 = vrot.slane %v5459_v50, 4  ;;  %v5404_v62 = vrot.slane %v5403_v2, 4  ;;  %v5455_v8 = vrot.slane %v5454_v55, 2  ;;  %v5398_v43 = vadd.f32 %v5397_v60, %v5396_v5 }
 0x370   : > { %v5482_v45 = vadd.f32 %v5481_v19, %v5480_v12  ;;  %v5488_v53 = vrot.slane %v5487_v6, 4  ;;  %v5434_v15 = vrot.slane %v5433_v3, 2  ;;  %v5428_v58 = vadd.f32 %v5427_v1, %v5426_v46 }
 0x371   : > { %v5461_v61 = vadd.f32 %v5460_v23, %v5459_v50  ;;  %v5405_v27 = vadd.f32 %v5404_v62, %v5403_v2  ;;  %v5456_v13 = vadd.f32 %v5455_v8, %v5454_v55  ;;  %v5399_v38 = vrot.slane %v5398_v43, 2 }
 0x372   : > { %v5483_v34 = vrot.slane %v5482_v45, 2  ;;  %v5489_v37 = vadd.f32 %v5488_v53, %v5487_v6  ;;  %v5435_v18 = vadd.f32 %v5434_v15, %v5433_v3  ;;  %v5429_v12 = vrot.slane %v5428_v58, 1 }
 0x373   : > { %v5462_v25 = vrot.slane %v5461_v61, 2  ;;  %v5406_v42 = vrot.slane %v5405_v27, 2  ;;  %v5457_v5 = vrot.slane %v5456_v13, 1  ;;  %v5400_v19 = vadd.f32 %v5399_v38, %v5398_v43  ;;  %v10248_v43 = vld [vmem:[%s10850_s4 + $0x8] sm:$0x77] }
 0x374   : > { %v5484_v14 = vadd.f32 %v5483_v34, %v5482_v45  ;;  %v5490_v2 = vrot.slane %v5489_v37, 2  ;;  %v5514_v1 = vrot.slane %v10224_v22, %v9138_v17  ;;  %v5665_v46 = vrot.slane %v10224_v22, %v9154_v28  ;;  %10968 = vst [vmem:[#allocation56_spill] sm:$0xff] %v10248_v43 }
 0x375   : > { %v5463_v50 = vadd.f32 %v5462_v25, %v5461_v61  ;;  %v5407_v55 = vadd.f32 %v5406_v42, %v5405_v27  ;;  %v5436_v23 = vrot.slane %v5435_v18, 1  ;;  %v5518_v15 = vrot.slane %v10224_v22, %v9146_v21 }
 0x376   : > { %v5669_v3 = vrot.slane %v10224_v22, %v9157_v29  ;;  %v10234_v60 = vadd.f32 %v5429_v12, %v5428_v58  ;;  %v5485_v34 = vrot.slane %v5484_v14, 1  ;;  %v10237_v61 = vsub.s32 6, %v8803_v51 }
 0x377   : > { %v10239_v45 = vadd.f32 %v5457_v5, %v5456_v13  ;;  %v5464_v6 = vrot.slane %v5463_v50, 1  ;;  %v5401_v62 = vrot.slane %v5400_v19, 1  ;;  %v5491_v8 = vadd.f32 %v5490_v2, %v5489_v37 }
 0x378   : > { %10967 = vst [vmem:[#allocation55_spill] sm:$0xff] %v10237_v61  ;;  %v5534_v42 = vrot.slane %v5514_v1, %v9138_v17  ;;  %v10243_v27 = vrot.slane %v5665_v46, %v9154_v28  ;;  %v5408_v58 = vrot.slane %v5407_v55, 1  ;;  %v10250_v53 = vadd.f32 %v5436_v23, %v5435_v18 }
 0x379   : > { %v5538_v25 = vrot.slane %v5518_v15, %v9138_v17  ;;  %v10254_v13 = vrot.slane %v5669_v3, %v9154_v28  ;;  %v5271_v38 = vrot.slane %v10248_v43, %v9138_v17  ;;  %v5339_v37 = vrot.slane %v10248_v43, %v9154_v28 }
 0x37a   : > { %v10260_v12 = vadd.f32 %v5485_v34, %v5484_v14  ;;  %v5551_v5 = vmul.f32 %v5534_v42, %v10234_v60  ;;  %v5275_v2 = vrot.slane %v10248_v43, %v10115_v11  ;;  %v5343_v18 = vrot.slane %v10248_v43, %v10127_v16 }
 0x37b   : > { %v5465_v1 = vadd.f32 %v5464_v6, %v5463_v50  ;;  %v5555_v46 = vmul.f32 %v5534_v42, %v10239_v45  ;;  %v5402_v23 = vadd.f32 %v5401_v62, %v5400_v19  ;;  %v5492_v15 = vrot.slane %v5491_v8, 1 }
 0x37c   : > { %v5409_v3 = vadd.f32 %v5408_v58, %v5407_v55  ;;  %v5522_v14 = vrot.slane %v10224_v22, %v10115_v11  ;;  %v5552_v34 = vmul.f32 %v5538_v25, %v10250_v53  ;;  %v10272_v54 = vrot.slane %v5271_v38, %v9138_v17 }
 0x37d   : > { %v10275_v10 = vrot.slane %v5339_v37, %v9154_v28  ;;  %v5559_v50 = vmul.f32 %v5534_v42, %v10260_v12  ;;  %v5579_v6 = vrot.slane %v5551_v5, 7  ;;  %v10281_v55 = vrot.slane %v5275_v2, %v9138_v17 }
 0x37e   : > { %v10284_v62 = vrot.slane %v5343_v18, %v9154_v28  ;;  %v5556_v58 = vmul.f32 %v5538_v25, %v5465_v1  ;;  %v5582_v33 = vrot.slane %v5555_v46, 6  ;;  %v5493_v38 = vadd.f32 %v5492_v15, %v5491_v8 }
 0x37f   : > { %v5526_v37 = vrot.slane %v10224_v22, %v10237_v61  ;;  %v5547_v49 = vmul.f32 %v5534_v42, %v5402_v23  ;;  %v10292_v43 = vrot.slane %v5522_v14, %v9138_v17  ;;  %v5548_v2 = vmul.f32 %v5538_v25, %v5409_v3 }
 0x380   : > { %v5588_v20 = vrot.slane %v5552_v34, 7  ;;  %v5673_v18 = vrot.slane %v10224_v22, %v10127_v16  ;;  %v5585_v15 = vrot.slane %v5559_v50, 5  ;;  %v5590_v21 = vrot.slane %v5556_v58, 6 }
 0x381   : > { %v5581_v8 = vsel %vm5580_vm10, %v5579_v6, %v5547_v49  ;;  %v10305_v34 = vrot.slane %v5526_v37, %v9138_v17  ;;  %v5560_v16 = vmul.f32 %v5538_v25, %v5493_v38  ;;  %v5702_v37 = vmul.f32 %v10243_v27, %v10234_v60 }
 0x382   : > { %v5584_v5 = vsel %vm5583_vm11, %v5582_v33, %v5581_v8  ;;  %v5589_v33 = vsel %vm5580_vm10, %v5588_v20, %v5548_v2  ;;  %v10317_v6 = vrot.slane %v5673_v18, %v9154_v28  ;;  %v10328_v20 = vmul.f32 %v10254_v13, %v5409_v3 }
 0x383   : > { %v5587_v25 = vsel %vm5586_vm12, %v5585_v15, %v5584_v5  ;;  %v5591_v8 = vsel %vm5583_vm11, %v5590_v21, %v5589_v33  ;;  %v10332_v2 = vmul.f32 %v10254_v13, %v10250_v53  ;;  %v5592_v18 = vrot.slane %v5560_v16, 5 }
 0x384   : > { %v10345_v3 = vmul.f32 %v10243_v27, %v10260_v12  ;;  %v10348_v53 = vmul.f32 %v10254_v13, %v5493_v38 }
 0x38e   : > { %v10278_v19 = vpop.f32.mrb[80].mxu1 }
 0x38f   : > { %v10286_v30 = vpop.f32.mrb[81].mxu1  ;;  %v5098_v46 = vrot.slane %v10278_v19, 1 }
 0x390   : > { %v4965_v56 = vpop.f32.mrb[82].mxu1  ;;  %v5099_v42 = vrot.slane %v10286_v30, 1 }
 0x391   : > { %v5102_v29 = vrot.slane %v4965_v56, 1  ;;  %v4967_v11 = vpop.f32.mrb[83].mxu1  ;;  %v10969_v56 = vsub.s32 7, %v8803_v51 }
 0x392   : > { %v5103_v61 = vrot.slane %v4967_v11, 1 }
 0x393   : > { %v5154_v14 = vsel %vm3235_vm5, %v5098_v46, %v5102_v29  ;;  %v5677_v49 = vrot.slane %v10224_v22, %v10969_v56 }
 0x394   : > { %v5226_v50 = vadd.f32 %v10081_v57, %v5154_v14  ;;  %v5155_v11 = vsel %vm3235_vm5, %v5099_v42, %v5103_v61  ;;  %v5706_v57 = vmul.f32 %v10243_v27, %v10239_v45  ;;  %v5698_v14 = vmul.f32 %v10243_v27, %v5402_v23 }
 0x395   : > { %v5227_v58 = vadd.f32 %v10085_v48, %v5155_v11  ;;  %v10335_v60 = vrot.slane %v5677_v49, %v9154_v28  ;;  %v10338_v45 = vmul.f32 %v10254_v13, %v5465_v1  ;;  %v10341_v23 = vsel %vm5610_vm13, %v5587_v25, 0.0 }
 0x396   : > { %v4971_v22 = vpop.f32.mrb[84].mxu1  ;;  %v5730_v11 = vrot.slane %v5702_v37, 7  ;;  %v5732_v1 = vrot.slane %v5706_v57, 6  ;;  %v5736_v27 = vrot.slane %v10332_v2, 7  ;;  %v5298_v12 = vmul.f32 %v10272_v54, %v5226_v50 }
 0x397   : > { %v5106_v48 = vrot.slane %v4971_v22, 1  ;;  %v4973_v5 = vpop.f32.mrb[85].mxu1  ;;  %v5299_v37 = vmul.f32 %v10281_v55, %v5227_v58 }
 0x398   : > { %v5107_v15 = vrot.slane %v4973_v5, 1  ;;  %v4975_v21 = vpop.f32.mrb[86].mxu1  ;;  %v5731_v58 = vsel %vm5580_vm10, %v5730_v11, %v5698_v14 }
 0x399   : > { %v5150_v16 = vsel %vm3235_vm5, %v5102_v29, %v5106_v48  ;;  %v5110_v56 = vrot.slane %v4975_v21, 1  ;;  %v4977_v49 = vpop.f32.mrb[87].mxu1 }
 0x39a   : > { %v5166_v33 = vsel %vm9187_vm6, %v5150_v16, 0.0  ;;  %v5151_v25 = vsel %vm3235_vm5, %v5103_v61, %v5107_v15  ;;  %v5111_v22 = vrot.slane %v4977_v49, 1 }
 0x39b   : > { %v5230_v13 = vadd.f32 %v10088_v35, %v5166_v33  ;;  %v5167_v29 = vsel %vm9187_vm6, %v5151_v25, 0.0  ;;  %v5146_v38 = vsel %vm3235_vm5, %v5106_v48, %v5110_v56  ;;  %v10371_v35 = vsel %vm5586_vm12, %v5592_v18, %v5591_v8 }
 0x39c   : > { %v5231_v57 = vadd.f32 %v10091_v44, %v5167_v29  ;;  %v5234_v5 = vadd.f32 %v10096_v9, %v5146_v38  ;;  %v5147_v61 = vsel %vm3235_vm5, %v5107_v15, %v5111_v22  ;;  %v10379_v15 = vadd.f32 %v10275_v10, %v5298_v12 }
 0x39d   : > { %v5302_v21 = vmul.f32 %v10272_v54, %v5230_v13  ;;  %v5235_v50 = vadd.f32 %v10101_v31, %v5147_v61  ;;  %v10385_v18 = vsel %vm5583_vm11, %v5732_v1, %v5731_v58  ;;  %v10388_v33 = vadd.f32 %v10284_v62, %v5299_v37 }
 0x39e   : > { %v5303_v48 = vmul.f32 %v10281_v55, %v5231_v57  ;;  %v4981_v16 = vpop.f32.mrb[88].mxu1  ;;  %v5306_v11 = vmul.f32 %v10272_v54, %v5234_v5 }
 0x39f   : > { %v10382_v49 = vadd.f32 %v10275_v10, %v5302_v21  ;;  %v5114_v31 = vrot.slane %v4981_v16, 1  ;;  %v4983_v8 = vpop.f32.mrb[89].mxu1  ;;  %v5307_v29 = vmul.f32 %v10281_v55, %v5235_v50 }
 0x3a0   : > { %v10391_v14 = vadd.f32 %v10284_v62, %v5303_v48  ;;  %v5115_v25 = vrot.slane %v4983_v8, 1  ;;  %v4985_v13 = vpop.f32.mrb[90].mxu1 }
 0x3a1   : > { %v5410_v12 = vadd.f32 %v10382_v49, %v10379_v15  ;;  %v5142_v38 = vsel %vm3235_vm5, %v5110_v56, %v5114_v31  ;;  %v5118_v1 = vrot.slane %v4985_v13, 1  ;;  %v4987_v57 = vpop.f32.mrb[91].mxu1 }
 0x3a2   : > { %v5417_v37 = vadd.f32 %v10391_v14, %v10388_v33  ;;  %v5174_v61 = vsel %vm9223_vm7, %v5142_v38, 0.0  ;;  %v5143_v5 = vsel %vm3235_vm5, %v5111_v22, %v5115_v25  ;;  %v5119_v21 = vrot.slane %v4987_v57, 1 }
 0x3a3   : > { %v5411_v48 = vrot.slane %v5410_v12, 4  ;;  %v5238_v16 = vadd.f32 %v10104_v63, %v5174_v61  ;;  %v5175_v50 = vsel %vm9223_vm7, %v5143_v5, 0.0  ;;  %v5138_v56 = vsel %vm3235_vm5, %v5114_v31, %v5118_v1 }
 0x3a4   : > { %v5418_v58 = vrot.slane %v5417_v37, 4  ;;  %v5239_v8 = vadd.f32 %v10107_v39, %v5175_v50  ;;  %v5242_v13 = vadd.f32 %v10122_v40, %v5138_v56  ;;  %v5139_v38 = vsel %vm3235_vm5, %v5115_v25, %v5119_v21 }
 0x3a5   : > { %v5412_v9 = vadd.f32 %v5411_v48, %v5410_v12  ;;  %v10415_v22 = vadd.f32 %v10275_v10, %v5306_v11  ;;  %v5310_v63 = vmul.f32 %v10272_v54, %v5238_v16  ;;  %v5243_v59 = vadd.f32 %v10129_v41, %v5139_v38 }
 0x3a6   : > { %v5419_v57 = vadd.f32 %v5418_v58, %v5417_v37  ;;  %v10420_v61 = vadd.f32 %v10284_v62, %v5307_v29  ;;  %v5311_v31 = vmul.f32 %v10281_v55, %v5239_v8  ;;  %v5314_v39 = vmul.f32 %v10272_v54, %v5242_v13  ;;  %v4991_v40 = vpop.f32.mrb[92].mxu1 }
 0x3a7   : > { %v5413_v5 = vrot.slane %v5412_v9, 2  ;;  %v10425_v25 = vadd.f32 %v10275_v10, %v5310_v63  ;;  %v5315_v11 = vmul.f32 %v10281_v55, %v5243_v59  ;;  %v5122_v12 = vrot.slane %v4991_v40, 1  ;;  %v4993_v48 = vpop.f32.mrb[93].mxu1 }
 0x3a8   : > { %v10429_v16 = vadd.f32 %v10284_v62, %v5311_v31  ;;  %v10432_v41 = vadd.f32 %v10275_v10, %v5314_v39  ;;  %v5123_v29 = vrot.slane %v4993_v48, 1  ;;  %v4995_v37 = vpop.f32.mrb[94].mxu1  ;;  %v5420_v50 = vrot.slane %v5419_v57, 2 }
 0x3a9   : > { %v5438_v56 = vadd.f32 %v10425_v25, %v10415_v22  ;;  %v10437_v58 = vadd.f32 %v10284_v62, %v5315_v11  ;;  %v5134_v8 = vsel %vm3235_vm5, %v5118_v1, %v5122_v12  ;;  %v5126_v13 = vrot.slane %v4995_v37, 1  ;;  %v4997_v38 = vpop.f32.mrb[95].mxu1 }
 0x3aa   : > { %v5445_v63 = vadd.f32 %v10429_v16, %v10420_v61  ;;  %v5182_v59 = vsel %vm9274_vm8, %v5134_v8, 0.0  ;;  %v5135_v31 = vsel %vm3235_vm5, %v5119_v21, %v5123_v29  ;;  %v5127_v39 = vrot.slane %v4997_v38, 1 }
 0x3ab   : > { %v5439_v40 = vrot.slane %v5438_v56, 4  ;;  %v5246_v48 = vadd.f32 %v10131_v52, %v5182_v59  ;;  %v5183_v11 = vsel %vm9274_vm8, %v5135_v31, 0.0  ;;  %v5130_v1 = vsel %vm3235_vm5, %v5122_v12, %v5126_v13 }
 0x3ac   : > { %v5446_v37 = vrot.slane %v5445_v63, 4  ;;  %v5247_v44 = vadd.f32 %v10135_v36, %v5183_v11  ;;  %v5158_v8 = vsel %vm3235_vm5, %v5126_v13, %v5098_v46  ;;  %v5250_v21 = vadd.f32 %v10149_v26, %v5130_v1 }
 0x3ad   : > { %v5440_v38 = vadd.f32 %v5439_v40, %v5438_v56  ;;  %v5318_v47 = vmul.f32 %v10272_v54, %v5246_v48  ;;  %v5190_v7 = vsel %vm9280_vm9, %v5158_v8, 0.0  ;;  %v5131_v52 = vsel %vm3235_vm5, %v5123_v29, %v5127_v39 }
 0x3ae   : > { %v5447_v12 = vadd.f32 %v5446_v37, %v5445_v63  ;;  %v5319_v59 = vmul.f32 %v10281_v55, %v5247_v44  ;;  %v5254_v36 = vadd.f32 %v10162_v32, %v5190_v7  ;;  %v5322_v19 = vmul.f32 %v10272_v54, %v5250_v21 }
 0x3af   : > { %v5441_v31 = vrot.slane %v5440_v38, 2  ;;  %v10467_v46 = vadd.f32 %v10275_v10, %v5318_v47  ;;  %v5159_v26 = vsel %vm3235_vm5, %v5127_v39, %v5099_v42  ;;  %v5251_v56 = vadd.f32 %v10156_v0, %v5131_v52 }
 0x3b0   : > { %v5448_v13 = vrot.slane %v5447_v12, 2  ;;  %v10475_v29 = vadd.f32 %v10284_v62, %v5319_v59  ;;  %v5326_v44 = vmul.f32 %v10272_v54, %v5254_v36  ;;  %v10479_v32 = vadd.f32 %v10275_v10, %v5322_v19 }
 0x3b1   : > { %v5442_v63 = vadd.f32 %v5441_v31, %v5440_v38  ;;  %v5466_v47 = vadd.f32 %v10467_v46, %v10432_v41  ;;  %v5191_v30 = vsel %vm9280_vm9, %v5159_v26, 0.0  ;;  %v5323_v42 = vmul.f32 %v10281_v55, %v5251_v56 }
 0x3b2   : > { %v5473_v0 = vadd.f32 %v10475_v29, %v10437_v58  ;;  %v10489_v39 = vadd.f32 %v10275_v10, %v5326_v44  ;;  %v5255_v54 = vadd.f32 %v10168_v4, %v5191_v30  ;;  %v5414_v40 = vadd.f32 %v5413_v5, %v5412_v9 }
 0x3b3   : > { %v5467_v48 = vrot.slane %v5466_v47, 4  ;;  %v10493_v11 = vadd.f32 %v10284_v62, %v5323_v42  ;;  %v5421_v1 = vadd.f32 %v5420_v50, %v5419_v57  ;;  %v5443_v37 = vrot.slane %v5442_v63, 1 }
 0x3b4   : > { %v5474_v8 = vrot.slane %v5473_v0, 4  ;;  %v5494_v24 = vadd.f32 %v10489_v39, %v10479_v32  ;;  %v5327_v21 = vmul.f32 %v10281_v55, %v5255_v54  ;;  %v5415_v38 = vrot.slane %v5414_v40, 1 }
 0x3b5   : > { %v5468_v7 = vadd.f32 %v5467_v48, %v5466_v47  ;;  %v5422_v52 = vrot.slane %v5421_v1, 1  ;;  %v5444_v10 = vadd.f32 %v5443_v37, %v5442_v63  ;;  %v5449_v59 = vadd.f32 %v5448_v13, %v5447_v12 }
 0x3b6   : > { %v5475_v36 = vadd.f32 %v5474_v8, %v5473_v0  ;;  %v5495_v4 = vrot.slane %v5494_v24, 4  ;;  %v10499_v9 = vadd.f32 %v10284_v62, %v5327_v21  ;;  %v5416_v5 = vadd.f32 %v5415_v38, %v5414_v40 }
 0x3b7   : > { %v5469_v19 = vrot.slane %v5468_v7, 2  ;;  %v5423_v57 = vadd.f32 %v5422_v52, %v5421_v1  ;;  %v5450_v50 = vrot.slane %v5449_v59, 1  ;;  %v5553_v31 = vmul.f32 %v10292_v43, %v5444_v10 }
 0x3b8   : > { %v5496_v26 = vadd.f32 %v5495_v4, %v5494_v24  ;;  %v5501_v55 = vadd.f32 %v10499_v9, %v10493_v11  ;;  %v5476_v56 = vrot.slane %v5475_v36, 2  ;;  %v5737_v12 = vsel %vm5580_vm10, %v5736_v27, %v10328_v20 }
 0x3b9   : > { %v5451_v13 = vadd.f32 %v5450_v50, %v5449_v59  ;;  %v5470_v44 = vadd.f32 %v5469_v19, %v5468_v7  ;;  %v5612_v62 = vsel %vm5610_vm13, %v10371_v35, 0.0  ;;  %v10970_v63 = vrot.slane %v10338_v45, 6 }
 0x3ba   : > { %v5502_v30 = vrot.slane %v5501_v55, 4  ;;  %v5477_v42 = vadd.f32 %v5476_v56, %v5475_v36  ;;  %v5497_v0 = vrot.slane %v5496_v26, 2  ;;  %v10971_v54 = vrot.slane %v10345_v3, 5 }
 0x3bb   : > { %v5739_v47 = vsel %vm5583_vm11, %v10970_v63, %v5737_v12  ;;  %v5471_v2 = vrot.slane %v5470_v44, 1  ;;  %v5549_v20 = vmul.f32 %v10292_v43, %v5416_v5  ;;  %v5550_v27 = vmul.f32 %v10305_v34, %v5423_v57 }
 0x3bc   : > { %v5735_v40 = vsel %vm5586_vm12, %v10971_v54, %v10385_v18  ;;  %v5594_v48 = vrot.slane %v5553_v31, 7  ;;  %v5478_v1 = vrot.slane %v5477_v42, 1  ;;  %v5498_v35 = vadd.f32 %v5497_v0, %v5496_v26 }
 0x3bd   : > { %v5503_v37 = vadd.f32 %v5502_v30, %v5501_v55  ;;  %v5704_v45 = vmul.f32 %v10317_v6, %v5444_v10  ;;  %v5472_v8 = vadd.f32 %v5471_v2, %v5470_v44  ;;  %v5554_v24 = vmul.f32 %v10305_v34, %v5451_v13 }
 0x3be   : > { %v5700_v21 = vmul.f32 %v10317_v6, %v5416_v5  ;;  %v5705_v3 = vmul.f32 %v10335_v60, %v5451_v13  ;;  %v5479_v38 = vadd.f32 %v5478_v1, %v5477_v42  ;;  %v5499_v18 = vrot.slane %v5498_v35, 1 }
 0x3bf   : > { %v5504_v7 = vrot.slane %v5503_v37, 2  ;;  %v5742_v52 = vrot.slane %v5704_v45, 7  ;;  %v5557_v59 = vmul.f32 %v10292_v43, %v5472_v8  ;;  %v5595_v36 = vsel %vm5580_vm10, %v5594_v48, %v5549_v20 }
 0x3c0   : > { %v5701_v4 = vmul.f32 %v10335_v60, %v5423_v57  ;;  %v5708_v19 = vmul.f32 %v10317_v6, %v5472_v8  ;;  %v5500_v10 = vadd.f32 %v5499_v18, %v5498_v35  ;;  %v5558_v31 = vmul.f32 %v10305_v34, %v5479_v38 }
 0x3c1   : > { %v5505_v50 = vadd.f32 %v5504_v7, %v5503_v37  ;;  %v5709_v5 = vmul.f32 %v10335_v60, %v5479_v38  ;;  %v5596_v26 = vrot.slane %v5557_v59, 6  ;;  %v5600_v55 = vrot.slane %v5554_v24, 7 }
 0x3c2   : > { %v5744_v56 = vrot.slane %v5708_v19, 6  ;;  %v5748_v12 = vrot.slane %v5705_v3, 7  ;;  %v5561_v44 = vmul.f32 %v10292_v43, %v5500_v10  ;;  %v5712_v63 = vmul.f32 %v10317_v6, %v5500_v10  ;;  %v5509_v10 = vld [vmem:[%s10852_s6] sm:$0xff] }
 0x3c3   : > { %v5506_v13 = vrot.slane %v5505_v50, 1  ;;  %v5743_v30 = vsel %vm5580_vm10, %v5742_v52, %v5700_v21  ;;  %v5597_v57 = vsel %vm5583_vm11, %v5596_v26, %v5595_v36  ;;  %v5602_v42 = vrot.slane %v5558_v31, 6  ;;  %v10973_v31 = vld [vmem:[#allocation2_spill] sm:$0xff]  ;;  %v10974_v26 = vld [vmem:[#allocation37_spill] sm:$0xff] }
 0x3c4   : > { %v5745_v0 = vsel %vm5583_vm11, %v5744_v56, %v5743_v30  ;;  %v5750_v54 = vrot.slane %v5709_v5, 6  ;;  %v5598_v20 = vrot.slane %v5561_v44, 5  ;;  %v10972_v48 = vrot.slane %v10348_v53, 5  ;;  %v10975_v56 = vld [vmem:[#allocation55_spill] sm:$0xff]  ;;  %v10977_v30 = vld [vmem:[#allocation38_spill] sm:$0xff] }
 0x3c5   : > { %v5507_v2 = vadd.f32 %v5506_v13, %v5505_v50  ;;  %v5746_v35 = vrot.slane %v5712_v63, 5  ;;  %v5601_v37 = vsel %vm5580_vm10, %v5600_v55, %v5550_v27  ;;  %v5613_v43 = vadd.f32 %v5612_v62, %v10341_v23  ;;  %v10976_v44 = vld [vmem:[#allocation3_spill] sm:$0xff] }
 0x3c6   : > { %v5741_v1 = vsel %vm5586_vm12, %v10972_v48, %v5739_v47  ;;  %v5749_v6 = vsel %vm5580_vm10, %v5748_v12, %v5701_v4  ;;  %v5758_v45 = vsel %vm5610_vm13, %v5735_v40, 0.0  ;;  %v5599_v24 = vsel %vm5586_vm12, %v5598_v20, %v5597_v57 }
 0x3c7   : > { %v5562_v8 = vmul.f32 %v10305_v34, %v5507_v2  ;;  %v5713_v21 = vmul.f32 %v10335_v60, %v5507_v2  ;;  %v5747_v3 = vsel %vm5586_vm12, %v5746_v35, %v5745_v0  ;;  %v5603_v53 = vsel %vm5583_vm11, %v5602_v42, %v5601_v37 }
 0x3c8   : > { %v5614_v47 = vsel %vm5610_vm13, %v5599_v24, 0.0  ;;  %v5751_v27 = vsel %vm5583_vm11, %v5750_v54, %v5749_v6  ;;  %v5759_v23 = vsel %vm5610_vm13, %v5741_v1, 0.0  ;;  %v5761_v40 = vsel %vm5610_vm13, %v5747_v3, 0.0 }
 0x3c9   : > { %v5604_v62 = vrot.slane %v5562_v8, 5  ;;  %v5615_v38 = vadd.f32 %v5614_v47, %v5613_v43  ;;  %v5752_v18 = vrot.slane %v5713_v21, 5  ;;  %v5760_v60 = vadd.f32 %v5759_v23, %v5758_v45 }
 0x3ca   : > { %v5625_v50 = vrot.slane %v5509_v10, %v9138_v17  ;;  %v5629_v5 = vrot.slane %v5509_v10, %v10973_v31  ;;  %v5633_v55 = vrot.slane %v5509_v10, %v10974_v26  ;;  %v5637_v12 = vrot.slane %v5509_v10, %v10975_v56 }
 0x3cb   : > { %v5605_v34 = vsel %vm5586_vm12, %v5604_v62, %v5603_v53  ;;  %v5753_v7 = vsel %vm5586_vm12, %v5752_v18, %v5751_v27  ;;  %v5762_v36 = vadd.f32 %v5761_v40, %v5760_v60  ;;  %v5771_v13 = vrot.slane %v5509_v10, %v9154_v28 }
 0x3cc   : > { %v5616_v52 = vsel %vm5610_vm13, %v5605_v34, 0.0  ;;  %v5763_v4 = vsel %vm5610_vm13, %v5753_v7, 0.0  ;;  %v5775_v63 = vrot.slane %v5509_v10, %v10976_v44  ;;  %v5779_v57 = vrot.slane %v5509_v10, %v10977_v30  ;;  %v10979_v30 = vld [vmem:[#allocation36_spill] sm:$0xff] }
 0x3cd   : > { %v5617_v59 = vadd.f32 %v5616_v52, %v5615_v38  ;;  %v5764_v19 = vadd.f32 %v5763_v4, %v5762_v36  ;;  %v10978_v42 = vsub.s32 7, %v8803_v51  ;;  %v5645_v2 = vrot.slane %v5625_v50, %v9138_v17 }
 0x3ce   : > { %v5649_v20 = vrot.slane %v5629_v5, %v9138_v17  ;;  %v5653_v48 = vrot.slane %v5633_v55, %v9138_v17  ;;  %v5657_v1 = vrot.slane %v5637_v12, %v9138_v17  ;;  %v5791_v37 = vrot.slane %v5771_v13, %v9154_v28 }
 0x3cf   : > { %5618 = vadd.xlane.f32.xlu0 %v5617_v59  ;;  %v5783_v0 = vrot.slane %v5509_v10, %v10978_v42  ;;  %v5795_v43 = vrot.slane %v5775_v63, %v9154_v28  ;;  %v5799_v6 = vrot.slane %v5779_v57, %v9154_v28  ;;  %v7676_v13 = vmov 1966171168  }
 0x3d0   : > { %v5911_v63 = vunpack.c.l.s4 %v7676_v13  ;;  %v5839_v57 = vrot.slane %v10979_v30, %v10973_v31  ;;  %v5843_v42 = vrot.slane %v10979_v30, %v10975_v56 }
 0x3d1   : > { %v5803_v45 = vrot.slane %v5783_v0, %v9154_v28 }
 0x3d2   : > { %v5912_v0 = vunpack.c.0.s8 %v5911_v63  ;;  %v10997_v63 = vld [vmem:[#allocation16_spill] sm:$0xff] }
 0x3d3   : > { %5765 = vadd.xlane.f32.xlu0 %v5764_v19 }
 0x45c   : > { %v5619_v54 = vpop.xlane.xlu0 %5618 }
 0x45d   : > { %v5620_v35 = vmax.f32 %v5619_v54, 0.0  ;;  %v5859_v54 = vrot.slane %v5839_v57, %v10973_v31  ;;  %v10999_v57 = vld [vmem:[#allocation17_spill] sm:$0xff] }
 0x45f   : > { %v5658_v21 = vmul.f32 %v5645_v2, %v5620_v35  ;;  %v5659_v3 = vmul.f32 %v5649_v20, %v5620_v35  ;;  %v5660_v53 = vmul.f32 %v5653_v48, %v5620_v35  ;;  %v5661_v47 = vmul.f32 %v5657_v1, %v5620_v35  ;;  %v10980_v20 = vld [vmem:[#allocation56_spill] sm:$0xff] }
 0x460   : > { %v5766_v8 = vpop.xlane.xlu0 %5765  ;;  %v5863_v2 = vrot.slane %v5843_v42, %v10973_v31  ;;  %v5847_v48 = vrot.slane %v10980_v20, %v10973_v31  ;;  %v5851_v1 = vrot.slane %v10980_v20, %v10975_v56  ;;  %v10624_v30 = vadd.f32 %v5859_v54, %v10997_v63 }
 0x461   : > { %v5767_v24 = vmax.f32 %v5766_v8, 0.0  ;;  %v10982_v8 = vld [vmem:[#allocation5_spill] sm:$0xff] }
 0x462   : > { %10998 = vst [vmem:[#allocation38_spill] sm:$0xff] %v10624_v30  ;;  %v10627_v42 = vadd.f32 %v5863_v2, %v10999_v57  ;;  %v11017_v57 = vld [vmem:[#allocation29_spill] sm:$0xff]  ;;  %v11031_v30 = vld [vmem:[#allocation51_spill] sm:$0xff] }
 0x463   : > { %v5804_v27 = vmul.f32 %v5791_v37, %v5767_v24  ;;  %v5805_v23 = vmul.f32 %v5795_v43, %v5767_v24  ;;  %v5806_v62 = vmul.f32 %v5799_v6, %v5767_v24  ;;  %v5807_v38 = vmul.f32 %v5803_v45, %v5767_v24  ;;  %v10981_v6 = vld [vmem:[#allocation4_spill] sm:$0xff] }
 0x464   : > { %v5915_v37 = vsub.s32 %v5912_v0, %v8803_v51  ;;  %v10586_v45 = vadd.f32 %v5859_v54, %v10981_v6  ;;  %v10589_v24 = vadd.f32 %v5863_v2, %v10982_v8  ;;  %v10986_v51 = vld [vmem:[#allocation9_spill] sm:$0xff]  ;;  %11000 = vst [vmem:[#allocation36_spill] sm:$0xff] %v10627_v42  ;;  %v11001_v0 = vld [vmem:[#allocation18_spill] sm:$0xff] }
 0x465   : > { %v5808_v18 = vadd.f32 %v5804_v27, %v5658_v21  ;;  %v5809_v40 = vadd.f32 %v5805_v23, %v5659_v3  ;;  %v5810_v34 = vadd.f32 %v5806_v62, %v5660_v53  ;;  %v5811_v7 = vadd.f32 %v5807_v38, %v5661_v47  ;;  %v10983_v3 = vld [vmem:[#allocation6_spill] sm:$0xff]  ;;  %v10984_v47 = vld [vmem:[#allocation7_spill] sm:$0xff]  ;;  %v10985_v23 = vld [vmem:[#allocation8_spill] sm:$0xff] }
 0x466   : > { %v10592_v53 = vadd.f32 %v5859_v54, %v10983_v3  ;;  %v10595_v27 = vadd.f32 %v5863_v2, %v10984_v47  ;;  %v10598_v62 = vadd.f32 %v5859_v54, %v10985_v23  ;;  %v10630_v20 = vadd.f32 %v5859_v54, %v11001_v0  ;;  %v11006_v8 = vld [vmem:[#allocation21_spill] sm:$0xff]  ;;  %v11007_v3 = vld [vmem:[#allocation22_spill] sm:$0xff]  ;;  %v11008_v23 = vld [vmem:[#allocation23_spill] sm:$0xff] }
 0x467   : > { %v6747_v60 = vmul.f32 -1.442695, %v5808_v18  ;;  %v6748_v52 = vmul.f32 -1.442695, %v5809_v40  ;;  %v6749_v59 = vmul.f32 -1.442695, %v5810_v34  ;;  %v10601_v18 = vadd.f32 %v5863_v2, %v10986_v51 }
 0x468   : > { %v6750_v36 = vmul.f32 -1.442695, %v5811_v7  ;;  %v10987_v40 = vld [vmem:[#allocation10_spill] sm:$0xff]  ;;  %v5867_v7 = vrot.slane %v5847_v48, %v10973_v31  ;;  %11002 = vst [vmem:[#allocation56_spill] sm:$0xff] %v10630_v20  ;;  %v11003_v48 = vld [vmem:[#allocation19_spill] sm:$0xff] }
 0x469   : > { %7636 = vpow2.f32 %v6747_v60  ;;  %v10604_v34 = vadd.f32 %v5859_v54, %v10987_v40  ;;  %v5871_v60 = vrot.slane %v5851_v1, %v10973_v31  ;;  %v10633_v1 = vadd.f32 %v5863_v2, %v11003_v48  ;;  %v11019_v48 = vld [vmem:[#allocation30_spill] sm:$0xff] }
 0x46a   : > { %7638 = vpow2.f32 %v6748_v52  ;;  %v10988_v52 = vld [vmem:[#allocation11_spill] sm:$0xff]  ;;  %v10642_v47 = vadd.f32 %v5867_v7, %v11007_v3 }
 0x46b   : > { %7640 = vpow2.f32 %v6749_v59  ;;  %v10609_v59 = vadd.f32 %v5863_v2, %v10988_v52  ;;  %11004 = vst [vmem:[#allocation4_spill] sm:$0xff] %v10633_v1  ;;  %v10663_v0 = vadd.f32 %v5871_v60, %v11017_v57  ;;  %v11029_v1 = vld [vmem:[#allocation35_spill] sm:$0xff] }
 0x46c   : > { %7642 = vpow2.f32 %v6750_v36  ;;  %v10989_v36 = vld [vmem:[#allocation12_spill] sm:$0xff]  ;;  %v10681_v57 = vadd.f32 %v5871_v60, %v11029_v1 }
 0x46d   : > { %11018 = vst [vmem:[#allocation8_spill] sm:$0xff] %v10663_v0  ;;  %v11033_v0 = vld [vmem:[#allocation48_spill] sm:$0xff] }
 0x473   : > { %v7637_v4 = vpop.eup %7636 }
 0x474   : > { %v7639_v19 = vpop.eup %7638  ;;  %v5824_v10 = vadd.f32 1.0, %v7637_v4  ;;  %v10612_v4 = vadd.f32 %v5859_v54, %v10989_v36  ;;  %v11011_v36 = vld [vmem:[#allocation26_spill] sm:$0xff] }
 0x475   : > { %v7641_v50 = vpop.eup %7640  ;;  %v5825_v5 = vadd.f32 1.0, %v7639_v19 }
 0x476   : > { %v7643_v26 = vpop.eup %7642  ;;  %v5826_v55 = vadd.f32 1.0, %v7641_v50  ;;  %7644 = vrcp.f32 %v5824_v10  ;;  %10990 = vst [vmem:[#allocation2_spill] sm:$0xff] %v10612_v4  ;;  %v10991_v50 = vld [vmem:[#allocation13_spill] sm:$0xff] }
 0x477   : > { %v5827_v12 = vadd.f32 1.0, %v7643_v26  ;;  %7646 = vrcp.f32 %v5825_v5  ;;  %v10615_v5 = vadd.f32 %v5863_v2, %v10991_v50  ;;  %v10993_v26 = vld [vmem:[#allocation14_spill] sm:$0xff]  ;;  %v11013_v50 = vld [vmem:[#allocation27_spill] sm:$0xff]  ;;  %v11035_v4 = vld [vmem:[#allocation41_spill] sm:$0xff] }
 0x478   : > { %7648 = vrcp.f32 %v5826_v55  ;;  %v10618_v55 = vadd.f32 %v5859_v54, %v10993_v26  ;;  %v11010_v54 = vld [vmem:[#allocation25_spill] sm:$0xff]  ;;  %v10657_v26 = vadd.f32 %v5871_v60, %v11013_v50  ;;  %v11027_v50 = vld [vmem:[#allocation34_spill] sm:$0xff]  ;;  %11030 = vst [vmem:[#allocation14_spill] sm:$0xff] %v10681_v57 }
 0x479   : > { %7650 = vrcp.f32 %v5827_v12  ;;  %10992 = vst [vmem:[#allocation37_spill] sm:$0xff] %v10615_v5  ;;  %v10995_v12 = vld [vmem:[#allocation15_spill] sm:$0xff]  ;;  %v10651_v40 = vadd.f32 %v5871_v60, %v11010_v54  ;;  %v11025_v54 = vld [vmem:[#allocation33_spill] sm:$0xff] }
 0x47a   : > { %10994 = vst [vmem:[#allocation55_spill] sm:$0xff] %v10618_v55  ;;  %v10621_v13 = vadd.f32 %v5863_v2, %v10995_v12  ;;  %11014 = vst [vmem:[#allocation6_spill] sm:$0xff] %v10657_v26  ;;  %v11015_v12 = vld [vmem:[#allocation28_spill] sm:$0xff]  ;;  %v11034_v5 = vld [vmem:[#allocation49_spill] sm:$0xff] }
 0x47b   : > { %v10660_v63 = vadd.f32 %v5867_v7, %v11015_v12  ;;  %v10678_v12 = vadd.f32 %v5867_v7, %v11027_v50  ;;  %v11036_v26 = vld [vmem:[#allocation46_spill] sm:$0xff] }
 0x47c   : > { %10996 = vst [vmem:[#allocation3_spill] sm:$0xff] %v10621_v13 }
 0x47d   : > { %11016 = vst [vmem:[#allocation7_spill] sm:$0xff] %v10660_v63  ;;  %11028 = vst [vmem:[#allocation13_spill] sm:$0xff] %v10678_v12 }
 0x480   : > { %v7645_v35 = vpop.eup %7644 }
 0x481   : > { %v7647_v43 = vpop.eup %7646 }
 0x482   : > { %v7649_v21 = vpop.eup %7648  ;;  %v5908_v56 = vcombine.low %v7645_v35, %v7647_v43  ;;  %v11005_v43 = vld [vmem:[#allocation20_spill] sm:$0xff] }
 0x483   : > { %v7651_v38 = vpop.eup %7650  ;;  %v10636_v6 = vadd.f32 %v5867_v7, %v11005_v43  ;;  %v10666_v43 = vadd.f32 %v5867_v7, %v11019_v48 }
 0x484   : > { %v5909_v19 = vcombine.low %v7649_v21, %v7651_v38  ;;  %v5916_v10 = vrot.slane %v5908_v56, %v5915_v37  ;;  %v10639_v21 = vadd.f32 %v5871_v60, %v11006_v8  ;;  %v10645_v56 = vadd.f32 %v5871_v60, %v11008_v23  ;;  %v11009_v38 = vld [vmem:[#allocation24_spill] sm:$0xff]  ;;  %v11021_v8 = vld [vmem:[#allocation31_spill] sm:$0xff] }
 0x485   : > { %v10648_v51 = vadd.f32 %v5867_v7, %v11009_v38  ;;  %11020 = vst [vmem:[#allocation9_spill] sm:$0xff] %v10666_v43  ;;  %v10669_v3 = vadd.f32 %v5871_v60, %v11021_v8  ;;  %v11032_v43 = vld [vmem:[#allocation52_spill] sm:$0xff] }
 0x486   : > { %v5923_v35 = vrot.slane %v5909_v19, %v5915_v37  ;;  %v10654_v19 = vadd.f32 %v5867_v7, %v11011_v36  ;;  %v10675_v36 = vadd.f32 %v5871_v60, %v11025_v54 }
 0x487   : > { %11022 = vst [vmem:[#allocation10_spill] sm:$0xff] %v10669_v3 }
 0x488   : > { %v5924_v2 = vcombine.low %v5916_v10, %v5923_v35  ;;  %v5925_v52 = vcombine.high %v5916_v10, %v5923_v35  ;;  %11012 = vst [vmem:[#allocation5_spill] sm:$0xff] %v10654_v19  ;;  %v11023_v35 = vld [vmem:[#allocation32_spill] sm:$0xff]  ;;  %11026 = vst [vmem:[#allocation12_spill] sm:$0xff] %v10675_v36  ;;  %v11038_v19 = vld [vmem:[#allocation42_spill] sm:$0xff] }
 0x489   : > { %v10672_v38 = vadd.f32 %v5867_v7, %v11023_v35 }
 0x48a   : > { %v5932_v23 = vrot.slane %v5924_v2, %v5915_v37  ;;  %v5939_v10 = vrot.slane %v5925_v52, %v5915_v37 }
 0x48b   : > { %11024 = vst [vmem:[#allocation11_spill] sm:$0xff] %v10672_v38 }
 0x48c   : > { %v5940_v20 = vcombine.high %v5932_v23, %v5932_v23  ;;  %v5941_v48 = vcombine.high %v5939_v10, %v5939_v10  ;;  %v5945_v42 = vrot.slane %v5932_v23, %v9138_v17  ;;  %v5949_v8 = vrot.slane %v5932_v23, %v9154_v28 }
 0x48d   : > { %v5953_v37 = vrot.slane %v5932_v23, %v10973_v31  ;;  %v5957_v2 = vrot.slane %v5932_v23, %v10976_v44  ;;  %v5961_v52 = vrot.slane %v5939_v10, %v9138_v17  ;;  %v5965_v35 = vrot.slane %v5939_v10, %v9154_v28 }
 0x48e   : > { %v5969_v7 = vrot.slane %v5939_v10, %v10973_v31  ;;  %v5973_v54 = vrot.slane %v5939_v10, %v10976_v44  ;;  %v5977_v60 = vrot.slane %v5940_v20, %v9138_v17  ;;  %v5981_v1 = vrot.slane %v5940_v20, %v9154_v28 }
 0x48f   : > { %v5985_v50 = vrot.slane %v5940_v20, %v10973_v31  ;;  %v5989_v57 = vrot.slane %v5940_v20, %v10976_v44  ;;  %v5993_v12 = vrot.slane %v5941_v48, %v9138_v17  ;;  %v5997_v23 = vrot.slane %v5941_v48, %v9154_v28 }
 0x490   : > { %v6001_v36 = vrot.slane %v5941_v48, %v10973_v31  ;;  %v6005_v38 = vrot.slane %v5941_v48, %v10976_v44  ;;  %v6022_v3 = vmul.f32 %v5945_v42, %v11031_v30  ;;  %v6023_v10 = vmul.f32 %v5949_v8, %v11032_v43  ;;  %v11037_v48 = vld [vmem:[#allocation39_spill] sm:$0xff] }
 0x491   : > { %v6024_v13 = vmul.f32 %v5953_v37, %v10379_v15  ;;  %v6025_v55 = vmul.f32 %v5957_v2, %v10388_v33  ;;  %v6026_v63 = vmul.f32 %v5945_v42, %v11033_v0  ;;  %v6027_v20 = vmul.f32 %v5949_v8, %v11034_v5  ;;  %v11039_v0 = vld [vmem:[#allocation43_spill] sm:$0xff]  ;;  %v11040_v8 = vld [vmem:[#allocation50_spill] sm:$0xff] }
 0x492   : > { %v6028_v17 = vmul.f32 %v5953_v37, %v10382_v49  ;;  %v6029_v28 = vmul.f32 %v5957_v2, %v10391_v14  ;;  %v6030_v31 = vmul.f32 %v5961_v52, %v11035_v4  ;;  %v6031_v44 = vmul.f32 %v5965_v35, %v11036_v26  ;;  %v11041_v37 = vld [vmem:[#allocation40_spill] sm:$0xff]  ;;  %v11042_v2 = vld [vmem:[#allocation47_spill] sm:$0xff] }
 0x493   : > { %v6032_v30 = vmul.f32 %v5969_v7, %v10415_v22  ;;  %v6033_v43 = vmul.f32 %v5973_v54, %v10420_v61  ;;  %v6034_v15 = vmul.f32 %v5961_v52, %v11037_v48  ;;  %v6035_v33 = vmul.f32 %v5965_v35, %v11038_v19  ;;  %v11043_v35 = vld [vmem:[#allocation44_spill] sm:$0xff] }
 0x494   : > { %v6036_v42 = vmul.f32 %v5969_v7, %v10425_v25  ;;  %v6037_v5 = vmul.f32 %v5973_v54, %v10429_v16  ;;  %v6038_v49 = vmul.f32 %v5977_v60, %v11039_v0  ;;  %v6039_v14 = vmul.f32 %v5981_v1, %v11040_v8  ;;  %v11044_v7 = vld [vmem:[#allocation53_spill] sm:$0xff]  ;;  %v11046_v8 = vld [vmem:[#allocation54_spill] sm:$0xff] }
 0x495   : > { %v6040_v4 = vmul.f32 %v5985_v50, %v10432_v41  ;;  %v6041_v26 = vmul.f32 %v5989_v57, %v10437_v58  ;;  %v6042_v22 = vmul.f32 %v5977_v60, %v11041_v37  ;;  %v6043_v61 = vmul.f32 %v5981_v1, %v11042_v2  ;;  %v11045_v0 = vld [vmem:[#allocation45_spill] sm:$0xff]  ;;  %v11064_v2 = vld [vmem:[#allocation14_spill] sm:$0xff] }
 0x496   : > { %v6044_v52 = vmul.f32 %v5985_v50, %v10467_v46  ;;  %v6045_v19 = vmul.f32 %v5989_v57, %v10475_v29  ;;  %v6046_v25 = vmul.f32 %v5993_v12, %v11043_v35  ;;  %v6047_v16 = vmul.f32 %v5997_v23, %v11044_v7  ;;  %v11063_v37 = vld [vmem:[#allocation13_spill] sm:$0xff] }
 0x497   : > { %v6048_v54 = vmul.f32 %v6001_v36, %v10479_v32  ;;  %v6049_v48 = vmul.f32 %v6005_v38, %v10493_v11  ;;  %v6050_v41 = vmul.f32 %v5993_v12, %v11045_v0  ;;  %v6051_v58 = vmul.f32 %v5997_v23, %v11046_v8 }
 0x498   : > { %v6052_v60 = vmul.f32 %v6001_v36, %v10489_v39  ;;  %v6053_v1 = vmul.f32 %v6005_v38, %v10499_v9  ;;  %v6054_v46 = vadd.f32 %v6022_v3, %v10586_v45  ;;  %v6055_v29 = vadd.f32 %v6023_v10, %v10589_v24  ;;  %v11055_v10 = vld [vmem:[#allocation9_spill] sm:$0xff] }
 0x499   : > { %v6056_v57 = vadd.f32 %v6024_v13, %v10636_v6  ;;  %v6057_v50 = vadd.f32 %v6025_v55, %v10639_v21  ;;  %v6058_v32 = vadd.f32 %v6026_v63, %v10592_v53  ;;  %v6059_v11 = vadd.f32 %v6027_v20, %v10595_v27  ;;  %v11047_v53 = vld [vmem:[#allocation5_spill] sm:$0xff]  ;;  %v11048_v27 = vld [vmem:[#allocation6_spill] sm:$0xff] }
 0x49a   : > { %v6060_v12 = vadd.f32 %v6028_v17, %v10642_v47  ;;  %v6061_v23 = vadd.f32 %v6029_v28, %v10645_v56  ;;  %v6062_v39 = vadd.f32 %v6030_v31, %v10598_v62  ;;  %v6063_v9 = vadd.f32 %v6031_v44, %v10601_v18  ;;  %v11049_v47 = vld [vmem:[#allocation2_spill] sm:$0xff]  ;;  %v11050_v56 = vld [vmem:[#allocation37_spill] sm:$0xff]  ;;  %v11051_v62 = vld [vmem:[#allocation7_spill] sm:$0xff] }
 0x49b   : > { %v6064_v45 = vadd.f32 %v6032_v30, %v10648_v51  ;;  %v6065_v24 = vadd.f32 %v6033_v43, %v10651_v40  ;;  %v6066_v13 = vadd.f32 %v6034_v15, %v10604_v34  ;;  %v6067_v55 = vadd.f32 %v6035_v33, %v10609_v59  ;;  %v11052_v18 = vld [vmem:[#allocation8_spill] sm:$0xff]  ;;  %v11053_v40 = vld [vmem:[#allocation55_spill] sm:$0xff]  ;;  %v11056_v17 = vld [vmem:[#allocation10_spill] sm:$0xff] }
 0x49c   : > { %v6068_v6 = vadd.f32 %v6036_v42, %v11047_v53  ;;  %v6069_v21 = vadd.f32 %v6037_v5, %v11048_v27  ;;  %v6070_v63 = vadd.f32 %v6038_v49, %v11049_v47  ;;  %v6071_v3 = vadd.f32 %v6039_v14, %v11050_v56  ;;  %v11054_v34 = vld [vmem:[#allocation3_spill] sm:$0xff]  ;;  %v11057_v31 = vld [vmem:[#allocation38_spill] sm:$0xff]  ;;  %v11058_v30 = vld [vmem:[#allocation36_spill] sm:$0xff] }
 0x49d   : > { %v10751_v38 = vadd.f32 %v6040_v4, %v11051_v62  ;;  %v10754_v51 = vadd.f32 %v6041_v26, %v11052_v18  ;;  %v10757_v36 = vadd.f32 %v6042_v22, %v11053_v40  ;;  %v10760_v59 = vadd.f32 %v6043_v61, %v11054_v34  ;;  %v11059_v15 = vld [vmem:[#allocation11_spill] sm:$0xff]  ;;  %v11060_v42 = vld [vmem:[#allocation12_spill] sm:$0xff] }
 0x49e   : > { %v10763_v20 = vadd.f32 %v6044_v52, %v11055_v10  ;;  %v10766_v28 = vadd.f32 %v6045_v19, %v11056_v17  ;;  %v10769_v44 = vadd.f32 %v6046_v25, %v11057_v31  ;;  %v10772_v43 = vadd.f32 %v6047_v16, %v11058_v30  ;;  %v11061_v49 = vld [vmem:[#allocation56_spill] sm:$0xff] }
 0x49f   : > { %v10780_v33 = vadd.f32 %v6048_v54, %v11059_v15  ;;  %v10783_v5 = vadd.f32 %v6049_v48, %v11060_v42  ;;  %v10786_v14 = vadd.f32 %v6050_v41, %v11061_v49  ;;  %v11062_v4 = vld [vmem:[#allocation4_spill] sm:$0xff]  ;;  %v10792_v22 = vadd.f32 %v6052_v60, %v11063_v37 }
 0x4a0   : > { %v10789_v26 = vadd.f32 %v6051_v58, %v11062_v4  ;;  %v10795_v61 = vadd.f32 %v6053_v1, %v11064_v2  ;;  %v6086_v52 = vmax.f32 %v6054_v46, 0.0  ;;  %v6087_v19 = vmax.f32 %v6055_v29, 0.0 }
 0x4a1   : > { %v6088_v35 = vmax.f32 %v6056_v57, 0.0  ;;  %v6089_v25 = vmax.f32 %v6057_v50, 0.0  ;;  %v6090_v7 = vmax.f32 %v6058_v32, 0.0  ;;  %v6091_v16 = vmax.f32 %v6059_v11, 0.0 }
 0x4a2   : > { %v6092_v54 = vmax.f32 %v6060_v12, 0.0  ;;  %v6093_v48 = vmax.f32 %v6061_v23, 0.0  ;;  %v6094_v0 = vmax.f32 %v6062_v39, 0.0  ;;  %v6095_v41 = vmax.f32 %v6063_v9, 0.0  ;;  %6118 = vst [vmem:[%s10777_s17] sm:$0xff] %v6086_v52  ;;  %6119 = vst [vmem:[%s10777_s17 + $0x8] sm:$0xff] %v6087_v19 }
 0x4a3   : > { %v6096_v8 = vmax.f32 %v6064_v45, 0.0  ;;  %v6097_v58 = vmax.f32 %v6065_v24, 0.0  ;;  %v6098_v60 = vmax.f32 %v6066_v13, 0.0  ;;  %v6099_v1 = vmax.f32 %v6067_v55, 0.0  ;;  %6120 = vst [vmem:[%s10777_s17 + $0x10] sm:$0xff] %v6088_v35  ;;  %6121 = vst [vmem:[%s10777_s17 + $0x18] sm:$0xff] %v6089_v25 }
 0x4a4   : > { %6122 = vst [vmem:[%s10777_s17 + $0x20] sm:$0xff] %v6090_v7  ;;  %6123 = vst [vmem:[%s10777_s17 + $0x28] sm:$0xff] %v6091_v16  ;;  %v6100_v46 = vmax.f32 %v6068_v6, 0.0  ;;  %v6101_v29 = vmax.f32 %v6069_v21, 0.0  ;;  %v6102_v57 = vmax.f32 %v6070_v63, 0.0  ;;  %v6103_v50 = vmax.f32 %v6071_v3, 0.0 }
 0x4a5   : > { %6124 = vst [vmem:[%s10777_s17 + $0x30] sm:$0xff] %v6092_v54  ;;  %6125 = vst [vmem:[%s10777_s17 + $0x38] sm:$0xff] %v6093_v48  ;;  %v6104_v32 = vmax.f32 %v10751_v38, 0.0  ;;  %v6105_v11 = vmax.f32 %v10754_v51, 0.0  ;;  %v6106_v12 = vmax.f32 %v10757_v36, 0.0  ;;  %v6107_v23 = vmax.f32 %v10760_v59, 0.0 }
 0x4a6   : > { %6126 = vst [vmem:[%s10777_s17 + $0x40] sm:$0xff] %v6094_v0  ;;  %6127 = vst [vmem:[%s10777_s17 + $0x48] sm:$0xff] %v6095_v41  ;;  %v6108_v39 = vmax.f32 %v10763_v20, 0.0  ;;  %v6109_v9 = vmax.f32 %v10766_v28, 0.0  ;;  %v6110_v45 = vmax.f32 %v10769_v44, 0.0  ;;  %v6111_v24 = vmax.f32 %v10772_v43, 0.0 }
 0x4a7   : > { %6128 = vst [vmem:[%s10777_s17 + $0x50] sm:$0xff] %v6096_v8  ;;  %6129 = vst [vmem:[%s10777_s17 + $0x58] sm:$0xff] %v6097_v58  ;;  %v6112_v13 = vmax.f32 %v10780_v33, 0.0  ;;  %v6113_v55 = vmax.f32 %v10783_v5, 0.0  ;;  %v6114_v53 = vmax.f32 %v10786_v14, 0.0  ;;  %v6115_v6 = vmax.f32 %v10789_v26, 0.0 }
 0x4a8   : > { %6130 = vst [vmem:[%s10777_s17 + $0x60] sm:$0xff] %v6098_v60  ;;  %6131 = vst [vmem:[%s10777_s17 + $0x68] sm:$0xff] %v6099_v1  ;;  %v6116_v27 = vmax.f32 %v10792_v22, 0.0  ;;  %v6117_v21 = vmax.f32 %v10795_v61, 0.0 }
 0x4a9   : > { %6132 = vst [vmem:[%s10777_s17 + $0x70] sm:$0xff] %v6100_v46  ;;  %6133 = vst [vmem:[%s10777_s17 + $0x78] sm:$0xff] %v6101_v29 }
 0x4aa   : > { %6134 = vst [vmem:[%s10777_s17 + $0x80] sm:$0xff] %v6102_v57  ;;  %6135 = vst [vmem:[%s10777_s17 + $0x88] sm:$0xff] %v6103_v50 }
 0x4ab   : > { %6136 = vst [vmem:[%s10777_s17 + $0x90] sm:$0xff] %v6104_v32  ;;  %6137 = vst [vmem:[%s10777_s17 + $0x98] sm:$0xff] %v6105_v11 }
 0x4ac   : > { %6138 = vst [vmem:[%s10777_s17 + $0xa0] sm:$0xff] %v6106_v12  ;;  %6139 = vst [vmem:[%s10777_s17 + $0xa8] sm:$0xff] %v6107_v23 }
 0x4ad   : > { %6140 = vst [vmem:[%s10777_s17 + $0xb0] sm:$0xff] %v6108_v39  ;;  %6141 = vst [vmem:[%s10777_s17 + $0xb8] sm:$0xff] %v6109_v9 }
 0x4ae   : > { %6142 = vst [vmem:[%s10777_s17 + $0xc0] sm:$0xff] %v6110_v45  ;;  %6143 = vst [vmem:[%s10777_s17 + $0xc8] sm:$0xff] %v6111_v24 }
 0x4af   : > { %6144 = vst [vmem:[%s10777_s17 + $0xd0] sm:$0xff] %v6112_v13  ;;  %6145 = vst [vmem:[%s10777_s17 + $0xd8] sm:$0xff] %v6113_v55 }
 0x4b0   : > { %6146 = vst [vmem:[%s10777_s17 + $0xe0] sm:$0xff] %v6114_v53  ;;  %6147 = vst [vmem:[%s10777_s17 + $0xe8] sm:$0xff] %v6115_v6 }
 0x4b1   : > { %6148 = vst [vmem:[%s10777_s17 + $0xf0] sm:$0xff] %v6116_v27  ;;  %6149 = vst [vmem:[%s10777_s17 + $0xf8] sm:$0xff] %v6117_v21 }
 0x4b2 PF: > { %s17_s24 = sadd.s32 1, %s7674_s24  }
 0x4b3   : > { %p14_p4 = scmp.ge.s32.totalorder %s17_s24, 4  }
 0x4b5   :  { %16 = sbr.rel (!%p14_p4) target bundleno = 1 (0x1), region = 78 }

</bundles_post_ra>
